<compile_context>
chip_gen: v7x
topology: tpu7x:2x2x1
jax: 0.10.0
libtpu: 0.0.40
codegen_flags: <defaults>
</compile_context>

<pallas_src>
import functools

import jax
import jax.numpy as jnp
from jax.experimental import pallas as pl
from jax.experimental.pallas import tpu as pltpu


# ----------------------------- in-kernel helpers ----------------------------

def _conv_bn_relu_pool(h, w_ref, b_ref, batch):
    """Fused Conv1d(k=3, pad=1) + folded-BN + ReLU + MaxPool1d(2).

    h:     (batch*L, Cin) f32 activations, rows ordered (b, l), channels-last.
    w_ref: (3, Cin, Cout) bf16 conv taps (BN scale folded in).
    b_ref: (1, Cout)      f32  conv bias (BN scale/shift folded in).
    returns (batch*L//2, Cout) f32.
    """
    n, cin = h.shape
    cout = w_ref.shape[-1]
    seq = n // batch

    # Per-sample boundary masks via modulo: O(1) VPU work regardless of batch.
    row = jax.lax.broadcasted_iota(jnp.int32, (n, 1), 0)
    pos = row % seq
    is_first = pos == 0
    is_last = pos == seq - 1

    if cin == 1:
        # VPU broadcast-MAC: a (n,1)x(1,cout) matmul would waste the MXU.
        t0 = h * w_ref[0]
        t1 = h * w_ref[1]
        t2 = h * w_ref[2]
    else:
        hb = h.astype(jnp.bfloat16)  # bf16 operands, f32 accumulation on the MXU
        t0 = jnp.dot(hb, w_ref[0], preferred_element_type=jnp.float32)
        t1 = jnp.dot(hb, w_ref[1], preferred_element_type=jnp.float32)
        t2 = jnp.dot(hb, w_ref[2], preferred_element_type=jnp.float32)

    # Tap alignment via XLU sublane rolls (idle unit in this kernel); the masks zero the
    # rows that wrapped across a sample boundary, which also supplies the padding=1 zeros.
    acc = (jnp.where(is_first, 0.0, pltpu.roll(t0, shift=1, axis=0))
           + t1
           + jnp.where(is_last, 0.0, pltpu.roll(t2, shift=n - 1, axis=0)))

    y = jnp.maximum(acc + b_ref[...], 0.0)  # folded-BN bias + ReLU (f32)
    # MaxPool1d(2): adjacent row pairs never straddle a sample boundary (L is even).
    # Kept as pair-reshape + max: stride-2 value slices don't lower in Mosaic.
    return jnp.max(y.reshape(n // 2, 2, cout), axis=1)


# ----------------------------- fused kernel ---------------------------------

def net_kernel(x_ref,
               w1_ref, b1_ref, w2_ref, b2_ref, w3_ref, b3_ref,
               wf1_ref, bf1_ref, wf2_ref, bf2_ref, wf3_ref, bf3_ref,
               o_ref, *, batch):
    h = x_ref[...]                                     # (B*L, 1) f32
    h = _conv_bn_relu_pool(h, w1_ref, b1_ref, batch)   # (B*L/2, 64)
    h = _conv_bn_relu_pool(h, w2_ref, b2_ref, batch)   # (B*L/4, 128)
    h = _conv_bn_relu_pool(h, w3_ref, b3_ref, batch)   # (B*L/8, 256)

    # Flatten + fc1 as ONE K = l3*256 matmul so the MXU accumulates internally instead of
    # popping l3 result tiles and summing them on the VPU. The torch channel-major flatten
    # is folded into wf1's (l, c)-major row order at init, so the kernel only lays the l3
    # per-position slabs side by side along lanes (lane concat, no transpose).
    # TODO(synk): Dropout(p=0.5) is identity here (eval-mode semantics).
    c3 = h.shape[-1]
    l3 = wf1_ref.shape[0] // c3
    h3 = h.reshape(batch, l3, c3)
    hf = jnp.concatenate([h3[:, l, :] for l in range(l3)], axis=-1)   # (B, l3*256)
    y = jnp.dot(hf.astype(jnp.bfloat16), wf1_ref[...],
                preferred_element_type=jnp.float32) + bf1_ref[...]
    y = jnp.maximum(y, 0.0)                                           # fc1 + ReLU
    y = jnp.dot(y.astype(jnp.bfloat16), wf2_ref[...],
                preferred_element_type=jnp.float32) + bf2_ref[...]
    y = jnp.maximum(y, 0.0)                                           # fc2 + ReLU
    # fc3 (out_features=1): broadcast-multiply + lane reduction (avoids an N=1 matmul
    # whose result tile would be 1/128-lane dense).
    o_ref[...] = jnp.sum(y * wf3_ref[...], axis=-1, keepdims=True) + bf3_ref[...]


# ----------------------------- wrapper ---------------------------------------

def _full_spec(shape):
    zeros = (0,) * len(shape)
    return pl.BlockSpec(shape, lambda i, _z=zeros: _z)


def net_forward(x_ncl, params):
    """x_ncl: (B, 1, num_features) float32 (PyTorch NCL layout) -> (B, 1) float32."""
    batch, cin, seq = x_ncl.shape
    assert cin == 1 and seq % 8 == 0
    # (B, 1, L) -> (B*L, 1): channels-last rows ordered (b, l). Pure reshape (C=1), no copy.
    x2 = x_ncl.reshape(batch * seq, 1)

    args = [x2]
    for (w, b) in params["conv"]:
        args += [w, b]
    args += list(params["fc"])

    # Scaling note: for larger / repeated batches, add a "parallel" grid axis over sample
    # blocks (weight BlockSpecs with constant index_map stay VMEM-resident across steps and
    # both v7x TensorCores are engaged). At B=2 a single grid step is the right shape, and
    # the default double-buffering of the ~1.45 MiB bf16 weights (~3 MiB VMEM) is accepted.
    return pl.pallas_call(
        functools.partial(net_kernel, batch=batch),
        out_shape=jax.ShapeDtypeStruct((batch, 1), jnp.float32),
        grid=(1,),  # whole net fits in VMEM (~1.5 MiB bf16 weights, <100 KiB activations)
        in_specs=[_full_spec(a.shape) for a in args],
        out_specs=_full_spec((batch, 1)),
        compiler_params=pltpu.CompilerParams(
            dimension_semantics=("arbitrary",),
            vmem_limit_bytes=32 * 1024 * 1024,  # safe on v7x's 64 MiB physical VMEM too
        ),
    )(*args)


# ----------------------------- parameters -----------------------------------

def init_params(key, num_features):
    """Kernel-layout params: BN folded into conv, fc1 permuted to (l, c)-major flatten,
    large weights stored in bf16 (biases and the tiny fc3 weight stay f32)."""
    eps = 1e-5
    channels = [(1, 64), (64, 128), (128, 256)]
    keys = jax.random.split(key, 4)

    conv = []
    for i, (cin, cout) in enumerate(channels):
        kw, kb = jax.random.split(keys[i])
        # taps laid out (k, Cin, Cout): w[k, ci, co] == torch conv.weight[co, ci, k]
        w = jax.random.normal(kw, (3, cin, cout), jnp.float32) * (1.0 / (3.0 * cin) ** 0.5)
        b = jax.random.normal(kb, (1, cout), jnp.float32) * 0.01
        # Eval-mode BatchNorm1d folded in (PyTorch default running stats -> ~identity).
        # TODO(synk): substitute trained running_mean/var here for a trained model.
        gamma = jnp.ones((cout,), jnp.float32)
        beta = jnp.zeros((cout,), jnp.float32)
        mean = jnp.zeros((cout,), jnp.float32)
        var = jnp.ones((cout,), jnp.float32)
        scale = gamma / jnp.sqrt(var + eps)
        shift = beta - mean * scale
        w = (w * scale[None, None, :]).astype(jnp.bfloat16)   # streamed from HBM as bf16
        b = b * scale[None, :] + shift[None, :]               # bias stays f32
        conv.append((w, b))

    l3 = num_features // 8
    fc_in = 256 * l3
    k1, k2, k3, k4, k5, k6 = jax.random.split(keys[3], 6)
    # fc1 generated in the torch flatten order (row = c*l3 + l), permuted ONCE at init to
    # the kernel's (l, c)-major order and flattened to a single (l3*256, 512) matmul weight.
    w1 = jax.random.normal(k1, (fc_in, 512), jnp.float32) * (1.0 / fc_in ** 0.5)
    wf1 = jnp.transpose(w1.reshape(256, l3, 512), (1, 0, 2)).reshape(l3 * 256, 512)
    wf1 = wf1.astype(jnp.bfloat16)
    b1 = jax.random.normal(k2, (1, 512), jnp.float32) * 0.01
    w2 = (jax.random.normal(k3, (512, 128), jnp.float32) * (1.0 / 512 ** 0.5)).astype(jnp.bfloat16)
    b2 = jax.random.normal(k4, (1, 128), jnp.float32) * 0.01
    w3 = jax.random.normal(k5, (1, 128), jnp.float32) * (1.0 / 128 ** 0.5)  # fc3 row form, f32
    b3 = jax.random.normal(k6, (1, 1), jnp.float32) * 0.01
    return {"conv": conv, "fc": (wf1, b1, w2, b2, w3, b3)}


# ----------------------------- pure-XLA reference ---------------------------

def reference_forward(x_ncl, params):
    """Plain-jnp f32 reference with identical parameters (bf16 weights upcast)."""
    batch = x_ncl.shape[0]
    h = jnp.transpose(x_ncl, (0, 2, 1)).astype(jnp.float32)  # (B, L, 1) channels-last
    for (w, b) in params["conv"]:
        w = w.astype(jnp.float32)
        seq = h.shape[1]
        hp = jnp.pad(h, ((0, 0), (1, 1), (0, 0)))
        y = sum(jnp.einsum("blc,cd->bld", hp[:, k:k + seq, :], w[k]) for k in range(3)) + b
        y = jnp.maximum(y, 0.0)
        h = jnp.max(y.reshape(batch, seq // 2, 2, -1), axis=2)
    wf1, b1, w2, b2, w3, b3 = params["fc"]
    hflat = h.reshape(batch, -1)                 # (B, l3*256) in (l, c) order == wf1 rows
    y = jnp.maximum(hflat @ wf1.astype(jnp.float32) + b1, 0.0)
    y = jnp.maximum(y @ w2.astype(jnp.float32) + b2, 0.0)
    return jnp.sum(y * w3, axis=-1, keepdims=True) + b3


# ----------------------------- main ------------------------------------------

if __name__ == "__main__":
    num_features = 32  # fc1 shape implies num_features % 8 == 0
    batch = 2

    key = jax.random.PRNGKey(0)
    k_x, k_p = jax.random.split(key)
    x = jax.random.normal(k_x, (batch, 1, num_features), jnp.float32)
    params = init_params(k_p, num_features)

    out = jax.jit(net_forward)(x, params)
    out = jax.block_until_ready(out)
    assert out.shape == (batch, 1), out.shape
    assert out.dtype == jnp.float32

    ref = reference_forward(x, params)
    # Tolerance accounts for bf16 weight/activation operands (f32 accumulation) in the kernel.
    assert bool(jnp.allclose(out, ref, rtol=3e-2, atol=3e-2)), (out, ref)
    print("KERNEL_OK")
</pallas_src>

<mosaic_0001>
module attributes {stable_mosaic.version = 11 : i64} {
  func.func @net_kernel(%arg0: i32, %arg1: memref<64x1xf32, #tpu.memory_space<vmem>>, %arg2: memref<3x1x64xbf16, #tpu.memory_space<vmem>>, %arg3: memref<1x64xf32, #tpu.memory_space<vmem>>, %arg4: memref<3x64x128xbf16, #tpu.memory_space<vmem>>, %arg5: memref<1x128xf32, #tpu.memory_space<vmem>>, %arg6: memref<3x128x256xbf16, #tpu.memory_space<vmem>>, %arg7: memref<1x256xf32, #tpu.memory_space<vmem>>, %arg8: memref<1024x512xbf16, #tpu.memory_space<vmem>>, %arg9: memref<1x512xf32, #tpu.memory_space<vmem>>, %arg10: memref<512x128xbf16, #tpu.memory_space<vmem>>, %arg11: memref<1x128xf32, #tpu.memory_space<vmem>>, %arg12: memref<1x128xf32, #tpu.memory_space<vmem>>, %arg13: memref<1x1xf32, #tpu.memory_space<vmem>>, %arg14: memref<2x1xf32, #tpu.memory_space<vmem>>) attributes {dimension_semantics = [#tpu.dimension_semantics<arbitrary>], iteration_bounds = array<i64: 1>, scalar_prefetch = 0 : i64, scratch_operands = 0 : i64, tpu.core_type = #tpu.core_type<tc>, window_params = [{pipeline_mode = #tpu.pipeline_mode<synchronous>, transform_indices = @transform_0, window_bounds = array<i64: 64, 1>}, {pipeline_mode = #tpu.pipeline_mode<synchronous>, transform_indices = @transform_1, window_bounds = array<i64: 3, 1, 64>}, {pipeline_mode = #tpu.pipeline_mode<synchronous>, transform_indices = @transform_2, window_bounds = array<i64: 1, 64>}, {pipeline_mode = #tpu.pipeline_mode<synchronous>, transform_indices = @transform_3, window_bounds = array<i64: 3, 64, 128>}, {pipeline_mode = #tpu.pipeline_mode<synchronous>, transform_indices = @transform_4, window_bounds = array<i64: 1, 128>}, {pipeline_mode = #tpu.pipeline_mode<synchronous>, transform_indices = @transform_5, window_bounds = array<i64: 3, 128, 256>}, {pipeline_mode = #tpu.pipeline_mode<synchronous>, transform_indices = @transform_6, window_bounds = array<i64: 1, 256>}, {pipeline_mode = #tpu.pipeline_mode<synchronous>, transform_indices = @transform_7, window_bounds = array<i64: 1024, 512>}, {pipeline_mode = #tpu.pipeline_mode<synchronous>, transform_indices = @transform_8, window_bounds = array<i64: 1, 512>}, {pipeline_mode = #tpu.pipeline_mode<synchronous>, transform_indices = @transform_9, window_bounds = array<i64: 512, 128>}, {pipeline_mode = #tpu.pipeline_mode<synchronous>, transform_indices = @transform_10, window_bounds = array<i64: 1, 128>}, {pipeline_mode = #tpu.pipeline_mode<synchronous>, transform_indices = @transform_11, window_bounds = array<i64: 1, 128>}, {pipeline_mode = #tpu.pipeline_mode<synchronous>, transform_indices = @transform_12, window_bounds = array<i64: 1, 1>}, {pipeline_mode = #tpu.pipeline_mode<synchronous>, transform_indices = @transform_13, window_bounds = array<i64: 2, 1>}]} {
    %c0 = arith.constant 0 : index
    %c0_0 = arith.constant 0 : index
    %0 = vector.load %arg1[%c0, %c0_0] : memref<64x1xf32, #tpu.memory_space<vmem>>, vector<64x1xf32>
    %1 = tpu.iota {dimensions = array<i32: 0>} : vector<64x1xi32>
    %c32_i32 = arith.constant 32 : i32
    %c0_i32 = arith.constant 0 : i32
    %2 = arith.cmpi eq, %c32_i32, %c0_i32 : i32
    %c1_i32 = arith.constant 1 : i32
    %3 = arith.select %2, %c1_i32, %c32_i32 : i32
    %4 = vector.broadcast %3 : i32 to vector<64x1xi32>
    %5 = arith.remsi %1, %4 : vector<64x1xi32>
    %c0_i32_1 = arith.constant 0 : i32
    %6 = vector.broadcast %c0_i32_1 : i32 to vector<64x1xi32>
    %7 = arith.cmpi ne, %5, %6 : vector<64x1xi32>
    %c0_i32_2 = arith.constant 0 : i32
    %8 = vector.broadcast %c0_i32_2 : i32 to vector<64x1xi32>
    %9 = arith.cmpi slt, %5, %8 : vector<64x1xi32>
    %c0_i32_3 = arith.constant 0 : i32
    %10 = arith.cmpi slt, %3, %c0_i32_3 : i32
    %11 = vector.broadcast %10 : i1 to vector<64x1xi1>
    %12 = vector.broadcast %11 : vector<64x1xi1> to vector<64x1xi1>
    %13 = arith.xori %9, %12 : vector<64x1xi1>
    %14 = arith.andi %13, %7 : vector<64x1xi1>
    %15 = vector.broadcast %3 : i32 to vector<64x1xi32>
    %16 = arith.addi %5, %15 : vector<64x1xi32>
    %17 = arith.select %14, %16, %5 : vector<64x1xi1>, vector<64x1xi32>
    %c0_i32_4 = arith.constant 0 : i32
    %18 = vector.broadcast %c0_i32_4 : i32 to vector<64x1xi32>
    %19 = arith.cmpi eq, %17, %18 : vector<64x1xi32>
    %c31_i32 = arith.constant 31 : i32
    %20 = vector.broadcast %c31_i32 : i32 to vector<64x1xi32>
    %21 = arith.cmpi eq, %17, %20 : vector<64x1xi32>
    %c0_5 = arith.constant 0 : index
    %c0_6 = arith.constant 0 : index
    %c0_7 = arith.constant 0 : index
    %22 = vector.load %arg2[%c0_5, %c0_6, %c0_7] : memref<3x1x64xbf16, #tpu.memory_space<vmem>>, vector<1x1x64xbf16>
    %23 = vector.shape_cast %22 : vector<1x1x64xbf16> to vector<1x64xbf16>
    %24 = arith.extf %23 : vector<1x64xbf16> to vector<1x64xf32>
    %25 = vector.broadcast %0 : vector<64x1xf32> to vector<64x64xf32>
    %26 = vector.broadcast %24 : vector<1x64xf32> to vector<64x64xf32>
    %27 = arith.mulf %25, %26 : vector<64x64xf32>
    %c1 = arith.constant 1 : index
    %c0_8 = arith.constant 0 : index
    %c0_9 = arith.constant 0 : index
    %28 = vector.load %arg2[%c1, %c0_8, %c0_9] : memref<3x1x64xbf16, #tpu.memory_space<vmem>>, vector<1x1x64xbf16>
    %29 = vector.shape_cast %28 : vector<1x1x64xbf16> to vector<1x64xbf16>
    %30 = arith.extf %29 : vector<1x64xbf16> to vector<1x64xf32>
    %31 = vector.broadcast %0 : vector<64x1xf32> to vector<64x64xf32>
    %32 = vector.broadcast %30 : vector<1x64xf32> to vector<64x64xf32>
    %33 = arith.mulf %31, %32 : vector<64x64xf32>
    %c2 = arith.constant 2 : index
    %c0_10 = arith.constant 0 : index
    %c0_11 = arith.constant 0 : index
    %34 = vector.load %arg2[%c2, %c0_10, %c0_11] : memref<3x1x64xbf16, #tpu.memory_space<vmem>>, vector<1x1x64xbf16>
    %35 = vector.shape_cast %34 : vector<1x1x64xbf16> to vector<1x64xbf16>
    %36 = arith.extf %35 : vector<1x64xbf16> to vector<1x64xf32>
    %37 = vector.broadcast %0 : vector<64x1xf32> to vector<64x64xf32>
    %38 = vector.broadcast %36 : vector<1x64xf32> to vector<64x64xf32>
    %39 = arith.mulf %37, %38 : vector<64x64xf32>
    %c1_i32_12 = arith.constant 1 : i32
    %40 = tpu.dynamic_rotate %27 by %c1_i32_12 dim 0 : vector<64x64xf32>, i32 -> vector<64x64xf32>
    %cst = arith.constant 0.000000e+00 : f32
    %41 = vector.shape_cast %19 : vector<64x1xi1> to vector<64x1xi1>
    %42 = vector.broadcast %41 : vector<64x1xi1> to vector<64x64xi1>
    %43 = vector.broadcast %cst : f32 to vector<64x64xf32>
    %44 = arith.select %42, %43, %40 : vector<64x64xi1>, vector<64x64xf32>
    %45 = arith.addf %44, %33 : vector<64x64xf32>
    %c63_i32 = arith.constant 63 : i32
    %46 = tpu.dynamic_rotate %39 by %c63_i32 dim 0 : vector<64x64xf32>, i32 -> vector<64x64xf32>
    %cst_13 = arith.constant 0.000000e+00 : f32
    %47 = vector.shape_cast %21 : vector<64x1xi1> to vector<64x1xi1>
    %48 = vector.broadcast %47 : vector<64x1xi1> to vector<64x64xi1>
    %49 = vector.broadcast %cst_13 : f32 to vector<64x64xf32>
    %50 = arith.select %48, %49, %46 : vector<64x64xi1>, vector<64x64xf32>
    %51 = arith.addf %45, %50 : vector<64x64xf32>
    %c0_14 = arith.constant 0 : index
    %c0_15 = arith.constant 0 : index
    %52 = vector.load %arg3[%c0_14, %c0_15] : memref<1x64xf32, #tpu.memory_space<vmem>>, vector<1x64xf32>
    %53 = vector.broadcast %52 : vector<1x64xf32> to vector<64x64xf32>
    %54 = arith.addf %51, %53 : vector<64x64xf32>
    %cst_16 = arith.constant 0.000000e+00 : f32
    %55 = vector.broadcast %cst_16 : f32 to vector<64x64xf32>
    %56 = arith.maximumf %54, %55 : vector<64x64xf32>
    %57 = vector.shape_cast %56 : vector<64x64xf32> to vector<32x2x64xf32>
    %cst_17 = arith.constant dense<0xFF800000> : vector<32x64xf32>
    %58 = vector.multi_reduction <maximumf>, %57, %cst_17 [1] : vector<32x2x64xf32> to vector<32x64xf32>
    %59 = tpu.iota {dimensions = array<i32: 0>} : vector<32x1xi32>
    %c16_i32 = arith.constant 16 : i32
    %c0_i32_18 = arith.constant 0 : i32
    %60 = arith.cmpi eq, %c16_i32, %c0_i32_18 : i32
    %c1_i32_19 = arith.constant 1 : i32
    %61 = arith.select %60, %c1_i32_19, %c16_i32 : i32
    %62 = vector.broadcast %61 : i32 to vector<32x1xi32>
    %63 = arith.remsi %59, %62 : vector<32x1xi32>
    %c0_i32_20 = arith.constant 0 : i32
    %64 = vector.broadcast %c0_i32_20 : i32 to vector<32x1xi32>
    %65 = arith.cmpi ne, %63, %64 : vector<32x1xi32>
    %c0_i32_21 = arith.constant 0 : i32
    %66 = vector.broadcast %c0_i32_21 : i32 to vector<32x1xi32>
    %67 = arith.cmpi slt, %63, %66 : vector<32x1xi32>
    %c0_i32_22 = arith.constant 0 : i32
    %68 = arith.cmpi slt, %61, %c0_i32_22 : i32
    %69 = vector.broadcast %68 : i1 to vector<32x1xi1>
    %70 = vector.broadcast %69 : vector<32x1xi1> to vector<32x1xi1>
    %71 = arith.xori %67, %70 : vector<32x1xi1>
    %72 = arith.andi %71, %65 : vector<32x1xi1>
    %73 = vector.broadcast %61 : i32 to vector<32x1xi32>
    %74 = arith.addi %63, %73 : vector<32x1xi32>
    %75 = arith.select %72, %74, %63 : vector<32x1xi1>, vector<32x1xi32>
    %c0_i32_23 = arith.constant 0 : i32
    %76 = vector.broadcast %c0_i32_23 : i32 to vector<32x1xi32>
    %77 = arith.cmpi eq, %75, %76 : vector<32x1xi32>
    %c15_i32 = arith.constant 15 : i32
    %78 = vector.broadcast %c15_i32 : i32 to vector<32x1xi32>
    %79 = arith.cmpi eq, %75, %78 : vector<32x1xi32>
    %80 = arith.truncf %58 : vector<32x64xf32> to vector<32x64xbf16>
    %c0_24 = arith.constant 0 : index
    %c0_25 = arith.constant 0 : index
    %c0_26 = arith.constant 0 : index
    %81 = vector.load %arg4[%c0_24, %c0_25, %c0_26] : memref<3x64x128xbf16, #tpu.memory_space<vmem>>, vector<1x64x128xbf16>
    %82 = vector.shape_cast %81 : vector<1x64x128xbf16> to vector<64x128xbf16>
    %cst_27 = arith.constant dense<0.000000e+00> : vector<32x128xf32>
    %83 = tpu.matmul %80, %82, %cst_27 {dimension_numbers = #tpu.dot_dimension_numbers<[1], [0], [0], [1], [0, 0, 1, 1], [], []>} : vector<32x64xbf16>, vector<64x128xbf16>, vector<32x128xf32> -> vector<32x128xf32>
    %c1_28 = arith.constant 1 : index
    %c0_29 = arith.constant 0 : index
    %c0_30 = arith.constant 0 : index
    %84 = vector.load %arg4[%c1_28, %c0_29, %c0_30] : memref<3x64x128xbf16, #tpu.memory_space<vmem>>, vector<1x64x128xbf16>
    %85 = vector.shape_cast %84 : vector<1x64x128xbf16> to vector<64x128xbf16>
    %cst_31 = arith.constant dense<0.000000e+00> : vector<32x128xf32>
    %86 = tpu.matmul %80, %85, %cst_31 {dimension_numbers = #tpu.dot_dimension_numbers<[1], [0], [0], [1], [0, 0, 1, 1], [], []>} : vector<32x64xbf16>, vector<64x128xbf16>, vector<32x128xf32> -> vector<32x128xf32>
    %c2_32 = arith.constant 2 : index
    %c0_33 = arith.constant 0 : index
    %c0_34 = arith.constant 0 : index
    %87 = vector.load %arg4[%c2_32, %c0_33, %c0_34] : memref<3x64x128xbf16, #tpu.memory_space<vmem>>, vector<1x64x128xbf16>
    %88 = vector.shape_cast %87 : vector<1x64x128xbf16> to vector<64x128xbf16>
    %cst_35 = arith.constant dense<0.000000e+00> : vector<32x128xf32>
    %89 = tpu.matmul %80, %88, %cst_35 {dimension_numbers = #tpu.dot_dimension_numbers<[1], [0], [0], [1], [0, 0, 1, 1], [], []>} : vector<32x64xbf16>, vector<64x128xbf16>, vector<32x128xf32> -> vector<32x128xf32>
    %c1_i32_36 = arith.constant 1 : i32
    %90 = tpu.dynamic_rotate %83 by %c1_i32_36 dim 0 : vector<32x128xf32>, i32 -> vector<32x128xf32>
    %cst_37 = arith.constant 0.000000e+00 : f32
    %91 = vector.shape_cast %77 : vector<32x1xi1> to vector<32x1xi1>
    %92 = vector.broadcast %91 : vector<32x1xi1> to vector<32x128xi1>
    %93 = vector.broadcast %cst_37 : f32 to vector<32x128xf32>
    %94 = arith.select %92, %93, %90 : vector<32x128xi1>, vector<32x128xf32>
    %95 = arith.addf %94, %86 : vector<32x128xf32>
    %c31_i32_38 = arith.constant 31 : i32
    %96 = tpu.dynamic_rotate %89 by %c31_i32_38 dim 0 : vector<32x128xf32>, i32 -> vector<32x128xf32>
    %cst_39 = arith.constant 0.000000e+00 : f32
    %97 = vector.shape_cast %79 : vector<32x1xi1> to vector<32x1xi1>
    %98 = vector.broadcast %97 : vector<32x1xi1> to vector<32x128xi1>
    %99 = vector.broadcast %cst_39 : f32 to vector<32x128xf32>
    %100 = arith.select %98, %99, %96 : vector<32x128xi1>, vector<32x128xf32>
    %101 = arith.addf %95, %100 : vector<32x128xf32>
    %c0_40 = arith.constant 0 : index
    %c0_41 = arith.constant 0 : index
    %102 = vector.load %arg5[%c0_40, %c0_41] : memref<1x128xf32, #tpu.memory_space<vmem>>, vector<1x128xf32>
    %103 = vector.broadcast %102 : vector<1x128xf32> to vector<32x128xf32>
    %104 = arith.addf %101, %103 : vector<32x128xf32>
    %cst_42 = arith.constant 0.000000e+00 : f32
    %105 = vector.broadcast %cst_42 : f32 to vector<32x128xf32>
    %106 = arith.maximumf %104, %105 : vector<32x128xf32>
    %107 = vector.shape_cast %106 : vector<32x128xf32> to vector<16x2x128xf32>
    %cst_43 = arith.constant dense<0xFF800000> : vector<16x128xf32>
    %108 = vector.multi_reduction <maximumf>, %107, %cst_43 [1] : vector<16x2x128xf32> to vector<16x128xf32>
    %109 = tpu.iota {dimensions = array<i32: 0>} : vector<16x1xi32>
    %c8_i32 = arith.constant 8 : i32
    %c0_i32_44 = arith.constant 0 : i32
    %110 = arith.cmpi eq, %c8_i32, %c0_i32_44 : i32
    %c1_i32_45 = arith.constant 1 : i32
    %111 = arith.select %110, %c1_i32_45, %c8_i32 : i32
    %112 = vector.broadcast %111 : i32 to vector<16x1xi32>
    %113 = arith.remsi %109, %112 : vector<16x1xi32>
    %c0_i32_46 = arith.constant 0 : i32
    %114 = vector.broadcast %c0_i32_46 : i32 to vector<16x1xi32>
    %115 = arith.cmpi ne, %113, %114 : vector<16x1xi32>
    %c0_i32_47 = arith.constant 0 : i32
    %116 = vector.broadcast %c0_i32_47 : i32 to vector<16x1xi32>
    %117 = arith.cmpi slt, %113, %116 : vector<16x1xi32>
    %c0_i32_48 = arith.constant 0 : i32
    %118 = arith.cmpi slt, %111, %c0_i32_48 : i32
    %119 = vector.broadcast %118 : i1 to vector<16x1xi1>
    %120 = vector.broadcast %119 : vector<16x1xi1> to vector<16x1xi1>
    %121 = arith.xori %117, %120 : vector<16x1xi1>
    %122 = arith.andi %121, %115 : vector<16x1xi1>
    %123 = vector.broadcast %111 : i32 to vector<16x1xi32>
    %124 = arith.addi %113, %123 : vector<16x1xi32>
    %125 = arith.select %122, %124, %113 : vector<16x1xi1>, vector<16x1xi32>
    %c0_i32_49 = arith.constant 0 : i32
    %126 = vector.broadcast %c0_i32_49 : i32 to vector<16x1xi32>
    %127 = arith.cmpi eq, %125, %126 : vector<16x1xi32>
    %c7_i32 = arith.constant 7 : i32
    %128 = vector.broadcast %c7_i32 : i32 to vector<16x1xi32>
    %129 = arith.cmpi eq, %125, %128 : vector<16x1xi32>
    %130 = arith.truncf %108 : vector<16x128xf32> to vector<16x128xbf16>
    %c0_50 = arith.constant 0 : index
    %c0_51 = arith.constant 0 : index
    %c0_52 = arith.constant 0 : index
    %131 = vector.load %arg6[%c0_50, %c0_51, %c0_52] : memref<3x128x256xbf16, #tpu.memory_space<vmem>>, vector<1x128x256xbf16>
    %132 = vector.shape_cast %131 : vector<1x128x256xbf16> to vector<128x256xbf16>
    %cst_53 = arith.constant dense<0.000000e+00> : vector<16x256xf32>
    %133 = tpu.matmul %130, %132, %cst_53 {dimension_numbers = #tpu.dot_dimension_numbers<[1], [0], [0], [1], [0, 0, 1, 1], [], []>} : vector<16x128xbf16>, vector<128x256xbf16>, vector<16x256xf32> -> vector<16x256xf32>
    %c1_54 = arith.constant 1 : index
    %c0_55 = arith.constant 0 : index
    %c0_56 = arith.constant 0 : index
    %134 = vector.load %arg6[%c1_54, %c0_55, %c0_56] : memref<3x128x256xbf16, #tpu.memory_space<vmem>>, vector<1x128x256xbf16>
    %135 = vector.shape_cast %134 : vector<1x128x256xbf16> to vector<128x256xbf16>
    %cst_57 = arith.constant dense<0.000000e+00> : vector<16x256xf32>
    %136 = tpu.matmul %130, %135, %cst_57 {dimension_numbers = #tpu.dot_dimension_numbers<[1], [0], [0], [1], [0, 0, 1, 1], [], []>} : vector<16x128xbf16>, vector<128x256xbf16>, vector<16x256xf32> -> vector<16x256xf32>
    %c2_58 = arith.constant 2 : index
    %c0_59 = arith.constant 0 : index
    %c0_60 = arith.constant 0 : index
    %137 = vector.load %arg6[%c2_58, %c0_59, %c0_60] : memref<3x128x256xbf16, #tpu.memory_space<vmem>>, vector<1x128x256xbf16>
    %138 = vector.shape_cast %137 : vector<1x128x256xbf16> to vector<128x256xbf16>
    %cst_61 = arith.constant dense<0.000000e+00> : vector<16x256xf32>
    %139 = tpu.matmul %130, %138, %cst_61 {dimension_numbers = #tpu.dot_dimension_numbers<[1], [0], [0], [1], [0, 0, 1, 1], [], []>} : vector<16x128xbf16>, vector<128x256xbf16>, vector<16x256xf32> -> vector<16x256xf32>
    %c1_i32_62 = arith.constant 1 : i32
    %140 = tpu.dynamic_rotate %133 by %c1_i32_62 dim 0 : vector<16x256xf32>, i32 -> vector<16x256xf32>
    %cst_63 = arith.constant 0.000000e+00 : f32
    %141 = vector.shape_cast %127 : vector<16x1xi1> to vector<16x1xi1>
    %142 = vector.broadcast %141 : vector<16x1xi1> to vector<16x256xi1>
    %143 = vector.broadcast %cst_63 : f32 to vector<16x256xf32>
    %144 = arith.select %142, %143, %140 : vector<16x256xi1>, vector<16x256xf32>
    %145 = arith.addf %144, %136 : vector<16x256xf32>
    %c15_i32_64 = arith.constant 15 : i32
    %146 = tpu.dynamic_rotate %139 by %c15_i32_64 dim 0 : vector<16x256xf32>, i32 -> vector<16x256xf32>
    %cst_65 = arith.constant 0.000000e+00 : f32
    %147 = vector.shape_cast %129 : vector<16x1xi1> to vector<16x1xi1>
    %148 = vector.broadcast %147 : vector<16x1xi1> to vector<16x256xi1>
    %149 = vector.broadcast %cst_65 : f32 to vector<16x256xf32>
    %150 = arith.select %148, %149, %146 : vector<16x256xi1>, vector<16x256xf32>
    %151 = arith.addf %145, %150 : vector<16x256xf32>
    %c0_66 = arith.constant 0 : index
    %c0_67 = arith.constant 0 : index
    %152 = vector.load %arg7[%c0_66, %c0_67] : memref<1x256xf32, #tpu.memory_space<vmem>>, vector<1x256xf32>
    %153 = vector.broadcast %152 : vector<1x256xf32> to vector<16x256xf32>
    %154 = arith.addf %151, %153 : vector<16x256xf32>
    %cst_68 = arith.constant 0.000000e+00 : f32
    %155 = vector.broadcast %cst_68 : f32 to vector<16x256xf32>
    %156 = arith.maximumf %154, %155 : vector<16x256xf32>
    %157 = vector.shape_cast %156 : vector<16x256xf32> to vector<8x2x256xf32>
    %cst_69 = arith.constant dense<0xFF800000> : vector<8x256xf32>
    %158 = vector.multi_reduction <maximumf>, %157, %cst_69 [1] : vector<8x2x256xf32> to vector<8x256xf32>
    %159 = vector.shape_cast %158 : vector<8x256xf32> to vector<2x4x256xf32>
    %160 = vector.extract_strided_slice %159 {offsets = [0, 0, 0], sizes = [2, 1, 256], strides = [1, 1, 1]} : vector<2x4x256xf32> to vector<2x1x256xf32>
    %161 = vector.shape_cast %160 : vector<2x1x256xf32> to vector<2x256xf32>
    %162 = vector.extract_strided_slice %159 {offsets = [0, 1, 0], sizes = [2, 1, 256], strides = [1, 1, 1]} : vector<2x4x256xf32> to vector<2x1x256xf32>
    %163 = vector.shape_cast %162 : vector<2x1x256xf32> to vector<2x256xf32>
    %164 = vector.extract_strided_slice %159 {offsets = [0, 2, 0], sizes = [2, 1, 256], strides = [1, 1, 1]} : vector<2x4x256xf32> to vector<2x1x256xf32>
    %165 = vector.shape_cast %164 : vector<2x1x256xf32> to vector<2x256xf32>
    %166 = vector.extract_strided_slice %159 {offsets = [0, 3, 0], sizes = [2, 1, 256], strides = [1, 1, 1]} : vector<2x4x256xf32> to vector<2x1x256xf32>
    %167 = vector.shape_cast %166 : vector<2x1x256xf32> to vector<2x256xf32>
    %168 = tpu.concatenate %161, %163, %165, %167 in 1 : vector<2x256xf32>, vector<2x256xf32>, vector<2x256xf32>, vector<2x256xf32> -> vector<2x1024xf32>
    %169 = arith.truncf %168 : vector<2x1024xf32> to vector<2x1024xbf16>
    %c0_70 = arith.constant 0 : index
    %c0_71 = arith.constant 0 : index
    %170 = vector.load %arg8[%c0_70, %c0_71] : memref<1024x512xbf16, #tpu.memory_space<vmem>>, vector<1024x512xbf16>
    %cst_72 = arith.constant dense<0.000000e+00> : vector<2x512xf32>
    %171 = tpu.matmul %169, %170, %cst_72 {dimension_numbers = #tpu.dot_dimension_numbers<[1], [0], [0], [1], [0, 0, 1, 1], [], []>} : vector<2x1024xbf16>, vector<1024x512xbf16>, vector<2x512xf32> -> vector<2x512xf32>
    %c0_73 = arith.constant 0 : index
    %c0_74 = arith.constant 0 : index
    %172 = vector.load %arg9[%c0_73, %c0_74] : memref<1x512xf32, #tpu.memory_space<vmem>>, vector<1x512xf32>
    %173 = vector.broadcast %172 : vector<1x512xf32> to vector<2x512xf32>
    %174 = arith.addf %171, %173 : vector<2x512xf32>
    %cst_75 = arith.constant 0.000000e+00 : f32
    %175 = vector.broadcast %cst_75 : f32 to vector<2x512xf32>
    %176 = arith.maximumf %174, %175 : vector<2x512xf32>
    %177 = arith.truncf %176 : vector<2x512xf32> to vector<2x512xbf16>
    %c0_76 = arith.constant 0 : index
    %c0_77 = arith.constant 0 : index
    %178 = vector.load %arg10[%c0_76, %c0_77] : memref<512x128xbf16, #tpu.memory_space<vmem>>, vector<512x128xbf16>
    %cst_78 = arith.constant dense<0.000000e+00> : vector<2x128xf32>
    %179 = tpu.matmul %177, %178, %cst_78 {dimension_numbers = #tpu.dot_dimension_numbers<[1], [0], [0], [1], [0, 0, 1, 1], [], []>} : vector<2x512xbf16>, vector<512x128xbf16>, vector<2x128xf32> -> vector<2x128xf32>
    %c0_79 = arith.constant 0 : index
    %c0_80 = arith.constant 0 : index
    %180 = vector.load %arg11[%c0_79, %c0_80] : memref<1x128xf32, #tpu.memory_space<vmem>>, vector<1x128xf32>
    %181 = vector.broadcast %180 : vector<1x128xf32> to vector<2x128xf32>
    %182 = arith.addf %179, %181 : vector<2x128xf32>
    %cst_81 = arith.constant 0.000000e+00 : f32
    %183 = vector.broadcast %cst_81 : f32 to vector<2x128xf32>
    %184 = arith.maximumf %182, %183 : vector<2x128xf32>
    %c0_82 = arith.constant 0 : index
    %c0_83 = arith.constant 0 : index
    %185 = vector.load %arg12[%c0_82, %c0_83] : memref<1x128xf32, #tpu.memory_space<vmem>>, vector<1x128xf32>
    %186 = vector.broadcast %185 : vector<1x128xf32> to vector<2x128xf32>
    %187 = arith.mulf %184, %186 : vector<2x128xf32>
    %cst_84 = arith.constant dense<0.000000e+00> : vector<2xf32>
    %188 = vector.multi_reduction <add>, %187, %cst_84 [1] : vector<2x128xf32> to vector<2xf32>
    %189 = vector.shape_cast %188 : vector<2xf32> to vector<2x1xf32>
    %c0_85 = arith.constant 0 : index
    %c0_86 = arith.constant 0 : index
    %190 = vector.load %arg13[%c0_85, %c0_86] : memref<1x1xf32, #tpu.memory_space<vmem>>, vector<1x1xf32>
    %191 = vector.broadcast %190 : vector<1x1xf32> to vector<2x1xf32>
    %192 = arith.addf %189, %191 : vector<2x1xf32>
    %c0_87 = arith.constant 0 : index
    %c0_88 = arith.constant 0 : index
    %193 = vector.load %arg14[%c0_87, %c0_88] : memref<2x1xf32, #tpu.memory_space<vmem>>, vector<2x1xf32>
    tpu.vector_store %arg14[%c0_87, %c0_88], %192 {strides = array<i32>} : memref<2x1xf32, #tpu.memory_space<vmem>>, vector<2x1xf32>,
    return
  }
  func.func @transform_0(%arg0: i32) -> (i32, i32) {
    %c0_i32 = arith.constant 0 : i32
    %c0_i32_0 = arith.constant 0 : i32
    %c0_i32_1 = arith.constant 0 : i32
    return %c0_i32, %c0_i32_0 : i32, i32
  }
  func.func @transform_1(%arg0: i32) -> (i32, i32, i32) {
    %c0_i32 = arith.constant 0 : i32
    %c0_i32_0 = arith.constant 0 : i32
    %c0_i32_1 = arith.constant 0 : i32
    %c0_i32_2 = arith.constant 0 : i32
    return %c0_i32, %c0_i32_0, %c0_i32_1 : i32, i32, i32
  }
  func.func @transform_2(%arg0: i32) -> (i32, i32) {
    %c0_i32 = arith.constant 0 : i32
    %c0_i32_0 = arith.constant 0 : i32
    %c0_i32_1 = arith.constant 0 : i32
    return %c0_i32, %c0_i32_0 : i32, i32
  }
  func.func @transform_3(%arg0: i32) -> (i32, i32, i32) {
    %c0_i32 = arith.constant 0 : i32
    %c0_i32_0 = arith.constant 0 : i32
    %c0_i32_1 = arith.constant 0 : i32
    %c0_i32_2 = arith.constant 0 : i32
    return %c0_i32, %c0_i32_0, %c0_i32_1 : i32, i32, i32
  }
  func.func @transform_4(%arg0: i32) -> (i32, i32) {
    %c0_i32 = arith.constant 0 : i32
    %c0_i32_0 = arith.constant 0 : i32
    %c0_i32_1 = arith.constant 0 : i32
    return %c0_i32, %c0_i32_0 : i32, i32
  }
  func.func @transform_5(%arg0: i32) -> (i32, i32, i32) {
    %c0_i32 = arith.constant 0 : i32
    %c0_i32_0 = arith.constant 0 : i32
    %c0_i32_1 = arith.constant 0 : i32
    %c0_i32_2 = arith.constant 0 : i32
    return %c0_i32, %c0_i32_0, %c0_i32_1 : i32, i32, i32
  }
  func.func @transform_6(%arg0: i32) -> (i32, i32) {
    %c0_i32 = arith.constant 0 : i32
    %c0_i32_0 = arith.constant 0 : i32
    %c0_i32_1 = arith.constant 0 : i32
    return %c0_i32, %c0_i32_0 : i32, i32
  }
  func.func @transform_7(%arg0: i32) -> (i32, i32) {
    %c0_i32 = arith.constant 0 : i32
    %c0_i32_0 = arith.constant 0 : i32
    %c0_i32_1 = arith.constant 0 : i32
    return %c0_i32, %c0_i32_0 : i32, i32
  }
  func.func @transform_8(%arg0: i32) -> (i32, i32) {
    %c0_i32 = arith.constant 0 : i32
    %c0_i32_0 = arith.constant 0 : i32
    %c0_i32_1 = arith.constant 0 : i32
    return %c0_i32, %c0_i32_0 : i32, i32
  }
  func.func @transform_9(%arg0: i32) -> (i32, i32) {
    %c0_i32 = arith.constant 0 : i32
    %c0_i32_0 = arith.constant 0 : i32
    %c0_i32_1 = arith.constant 0 : i32
    return %c0_i32, %c0_i32_0 : i32, i32
  }
  func.func @transform_10(%arg0: i32) -> (i32, i32) {
    %c0_i32 = arith.constant 0 : i32
    %c0_i32_0 = arith.constant 0 : i32
    %c0_i32_1 = arith.constant 0 : i32
    return %c0_i32, %c0_i32_0 : i32, i32
  }
  func.func @transform_11(%arg0: i32) -> (i32, i32) {
    %c0_i32 = arith.constant 0 : i32
    %c0_i32_0 = arith.constant 0 : i32
    %c0_i32_1 = arith.constant 0 : i32
    return %c0_i32, %c0_i32_0 : i32, i32
  }
  func.func @transform_12(%arg0: i32) -> (i32, i32) {
    %c0_i32 = arith.constant 0 : i32
    %c0_i32_0 = arith.constant 0 : i32
    %c0_i32_1 = arith.constant 0 : i32
    return %c0_i32, %c0_i32_0 : i32, i32
  }
  func.func @transform_13(%arg0: i32) -> (i32, i32) {
    %c0_i32 = arith.constant 0 : i32
    %c0_i32_0 = arith.constant 0 : i32
    %c0_i32_1 = arith.constant 0 : i32
    return %c0_i32, %c0_i32_0 : i32, i32
  }
}

</mosaic_0001>

<bundles_post_ra>
// kernel: net_forward.1
= control target key start
LH: loop header
LB: loop body
LE: loop exit
PB: predicated region body
PF: predicated region fallthrough
CT: control target
= control target key end

     0   :  { %s6635_s0 = inlined_call_operand.vmem [shape: f32[64,1], index: 0, kind: input, shape index: {}]   ;;  %s6636_s1 = inlined_call_operand.vmem [shape: bf16[3,1,64], index: 1, kind: input, shape index: {}]   ;;  %s6637_s2 = inlined_call_operand.vmem [shape: f32[1,64], index: 2, kind: input, shape index: {}]   ;;  %s6638_s3 = inlined_call_operand.hbm [shape: bf16[3,64,128], index: 3, kind: input, shape index: {}]   ;;  %s6639_s4 = inlined_call_operand.vmem [shape: f32[1,128], index: 4, kind: input, shape index: {}]   ;;  %s6640_s5 = inlined_call_operand.hbm [shape: bf16[3,128,256], index: 5, kind: input, shape index: {}]   ;;  %s6641_s6 = inlined_call_operand.vmem [shape: f32[1,256], index: 6, kind: input, shape index: {}]   ;;  %s6642_s7 = inlined_call_operand.hbm [shape: bf16[1024,512], index: 7, kind: input, shape index: {}]   ;;  %s6643_s8 = inlined_call_operand.vmem [shape: f32[1,512], index: 8, kind: input, shape index: {}]   ;;  %s6644_s9 = inlined_call_operand.hbm [shape: bf16[512,128], index: 9, kind: input, shape index: {}]   ;;  %s6645_s10 = inlined_call_operand.vmem [shape: f32[1,128], index: 10, kind: input, shape index: {}]   ;;  %s6646_s11 = inlined_call_operand.vmem [shape: f32[1,128], index: 11, kind: input, shape index: {}]   ;;  %s6647_s12 = inlined_call_operand.<no memory space> [shape: f32[1,1], index: 12, kind: input, shape index: {}]   ;;  %s6648_s13 = inlined_call_operand.vmem [shape: f32[2,1], index: 13, kind: output, shape index: {}]  }
   0x1   :  { %v18_v0 = vstv %s6647_s12 }
   0x2   :  { %19 = vst [vmem:[#allocation2] sm:$0x1] %v18_v0 }
   0x3   :  { %20 = vsyncpa [#allocation4], 0 }
   0x4   :  { %21 = vsyncpa [#allocation6], 0 }
   0x5   :  { %22 = vsyncpa [#allocation9], 0  ;;  %s5747_s27 = smov [#allocation5]   ;;  %s5653_s14 = scalar_lea.hbm %s6640_s5, 6144 }
   0x6   :  { %s48_s28 = sshll.u32 %s5747_s27, 4  ;;  %p5654_p0 = scmp.ne.s32.totalorder %s6640_s5, %s5653_s14  ;;  %s49_s28 = int_to_ptr.vmem [resolvable:$true] %s48_s28 }
   0x7   :  { %p5657_p1 = scmp.lt.u32.totalorder %s5653_s14, %s6640_s5 }
   0x9   :  { %p5659_p2 = pnand %p5657_p1, %p5654_p0 }
   0xb   :  { %5662 = shalt.err (!%p5659_p2)
}
   0xc   :  { %s5663_s12 = scalar_lea.vmem %s49_s28, 6144  ;;  %p5668_p4 = scmp.lt.s32.totalorder %s49_s28, %s49_s28 }
   0xd   :  { %p5664_p3 = scmp.ne.s32.totalorder %s49_s28, %s5663_s12  ;;  %p5669_p5 = scmp.lt.s32.totalorder %s5663_s12, %s5663_s12 }
   0xf   :  { %p5670_p6 = por %p5669_p5, %p5668_p4 }
  0x11   :  { %p5671_p7 = pnand %p5670_p6, %p5664_p3 }
  0x13   :  { %5674 = shalt.err (!%p5671_p7)
}
  0x14   :  { %s5748_s19 = smov 128   ;;  %s5749_s20 = smov 8  }
  0x15   :  { %54 = dma.hbm_to_vmem [thread:$0]  %s6640_s5, 6144, %s49_s28, [#allocation6], %s5748_s19, %s5748_s19, %s5749_s20  }
  0x16   :  { %s5750_s23 = smov [#allocation3]   ;;  %s5675_s27 = scalar_lea.hbm %s6638_s3, 1536 }
  0x17   :  { %s34_s24 = sshll.u32 %s5750_s23, 4  ;;  %p5676_p8 = scmp.ne.s32.totalorder %s6638_s3, %s5675_s27  ;;  %s35_s24 = int_to_ptr.vmem [resolvable:$true] %s34_s24 }
  0x18   :  { %p5679_p9 = scmp.lt.u32.totalorder %s5675_s27, %s6638_s3 }
  0x1a   :  { %p5681_p10 = pnand %p5679_p9, %p5676_p8 }
  0x1c   :  { %5684 = shalt.err (!%p5681_p10)
}
  0x1d   :  { %s5685_s16 = scalar_lea.vmem %s35_s24, 1536  ;;  %p5690_p12 = scmp.lt.s32.totalorder %s35_s24, %s35_s24 }
  0x1e   :  { %p5686_p11 = scmp.ne.s32.totalorder %s35_s24, %s5685_s16  ;;  %p5691_p13 = scmp.lt.s32.totalorder %s5685_s16, %s5685_s16 }
  0x20   :  { %p5692_p0 = por %p5691_p13, %p5690_p12 }
  0x22   :  { %p5693_p1 = pnand %p5692_p0, %p5686_p11 }
  0x24   :  { %5696 = shalt.err (!%p5693_p1)
}
  0x25   :  { %s5751_s5 = smov 64   ;;  %s5752_s28 = smov 4  }
  0x26   :  { %40 = dma.hbm_to_vmem [thread:$0]  %s6638_s3, 1536, %s35_s24, [#allocation4], %s5751_s5, %s5751_s5, %s5752_s28  }
  0x27   :  { %s5753_s12 = smov [#allocation7]   ;;  %s5697_s22 = scalar_lea.hbm %s6642_s7, 32768 }
  0x28   :  { %s62_s19 = sshll.u32 %s5753_s12, 4  ;;  %p5698_p2 = scmp.ne.s32.totalorder %s6642_s7, %s5697_s22  ;;  %s63_s19 = int_to_ptr.vmem [resolvable:$true] %s62_s19 }
  0x29   :  { %p5701_p3 = scmp.lt.u32.totalorder %s5697_s22, %s6642_s7 }
  0x2b   :  { %p5703_p4 = pnand %p5701_p3, %p5698_p2 }
  0x2d   :  { %5706 = shalt.err (!%p5703_p4)
}
  0x2e   :  { %s5707_s29 = scalar_lea.vmem %s63_s19, 32768  ;;  %p5712_p6 = scmp.lt.s32.totalorder %s63_s19, %s63_s19 }
  0x2f   :  { %p5708_p5 = scmp.ne.s32.totalorder %s63_s19, %s5707_s29  ;;  %p5713_p7 = scmp.lt.s32.totalorder %s5707_s29, %s5707_s29 }
  0x31   :  { %p5714_p8 = por %p5713_p7, %p5712_p6 }
  0x33   :  { %p5715_p9 = pnand %p5714_p8, %p5708_p5 }
  0x35   :  { %5718 = shalt.err (!%p5715_p9)
}
  0x36   :  { %s5754_s3 = smov 256   ;;  %s5755_s24 = smov 16  }
  0x37   :  { %68 = dma.hbm_to_vmem [thread:$0]  %s6642_s7, 32768, %s63_s19, [#allocation6], %s5754_s3, %s5754_s3, %s5755_s24  }
  0x38   :  { %s5756_s15 = smov [#allocation8]   ;;  %s5719_s12 = scalar_lea.hbm %s6644_s9, 4096 }
  0x39   :  { %s76_s16 = sshll.u32 %s5756_s15, 4  ;;  %p5720_p10 = scmp.ne.s32.totalorder %s6644_s9, %s5719_s12  ;;  %s77_s16 = int_to_ptr.vmem [resolvable:$true] %s76_s16 }
  0x3a   :  { %p5723_p11 = scmp.lt.u32.totalorder %s5719_s12, %s6644_s9 }
  0x3c   :  { %p5725_p12 = pnand %p5723_p11, %p5720_p10 }
  0x3e   :  { %5728 = shalt.err (!%p5725_p12)
}
  0x3f   :  { %s5729_s25 = scalar_lea.vmem %s77_s16, 4096  ;;  %p5734_p0 = scmp.lt.s32.totalorder %s77_s16, %s77_s16 }
  0x40   :  { %p5730_p13 = scmp.ne.s32.totalorder %s77_s16, %s5729_s25  ;;  %p5735_p1 = scmp.lt.s32.totalorder %s5729_s25, %s5729_s25 }
  0x42   :  { %p5736_p2 = por %p5735_p1, %p5734_p0 }
  0x44   :  { %p5737_p3 = pnand %p5736_p2, %p5730_p13 }
  0x46   :  { %5740 = shalt.err (!%p5737_p3)
}
  0x47   :  { %82 = dma.hbm_to_vmem [thread:$0]  %s6644_s9, 4096, %s77_s16, [#allocation9], %s5751_s5, %s5751_s5, %s5752_s28  }
  0x48   :  { %5741 = dma.done.wait [#allocation4], 1536  }
  0x49   :  { %5742 = vsyncadd [#allocation4], 4294965760 }
  0x4a   :  { %5743 = dma.done.wait [#allocation6], 38912  }
  0x4b   :  { %5744 = vsyncadd [#allocation6], 4294928384 }
  0x4c   :  { %5745 = dma.done.wait [#allocation9], 4096  }
  0x4d   :  { %5746 = vsyncadd [#allocation9], 4294963200  ;;  %v6649_v1 = vmov 0   ;;  %v103_v2 = vld [vmem:[%s6635_s0 + $0x8] sm:$0xff]  ;;  %v102_v3 = vld [vmem:[%s6635_s0] sm:$0xff]  ;;  %v110_v19 = vlaneseq  ;;  %vm612_vm4 = vcmask 517120  }
  0x4e   :  { %5151 = vset.pattern.permute.xlu1 %v6649_v1  ;;  %5150 = vset.pattern.permute.xlu0 %v6649_v1  ;;  %v104_v4 = vld [vmem:[%s6635_s0 + $0x10] sm:$0xff]  ;;  %v109_v5 = vld [vmem:[%s6635_s0 + $0x38] sm:$0xff]  ;;  %v106_v6 = vld [vmem:[%s6635_s0 + $0x20] sm:$0xff]  ;;  %v5758_v41 = vmov 1983009808   ;;  %vm997_vm7 = vcmask 1041409  }
  0x4f   :  { %240 = vperm.xlu1 %5151, %v103_v2   ;;  %235 = vperm.xlu0 %5150, %v102_v3   ;;  %v105_v7 = vld [vmem:[%s6635_s0 + $0x18] sm:$0xff]  ;;  %v108_v8 = vld [vmem:[%s6635_s0 + $0x30] sm:$0xff]  ;;  %v107_v9 = vld [vmem:[%s6635_s0 + $0x28] sm:$0xff]  ;;  %v5912_v20 = vshrl.u32 %v110_v19, 7  ;;  %v446_v42 = vunpack.c.l.s4 %v5758_v41  ;;  %vm999_vm8 = vcmask 1042434   ;;  %vm1001_vm9 = vcmask 1043459  }
  0x50   :  { %v5152_v10 = vld [vmem:[#allocation3] sm:$0xff]   ;;  %v5154_v12 = vld [vmem:[#allocation3 + $0x8] sm:$0xff]   ;;  %v5156_v14 = vld [vmem:[#allocation3 + $0x10] sm:$0xff]   ;;  %vm1003_vm10 = vcmask 1044484   ;;  %vm1005_vm11 = vcmask 1045509   ;;  %vm1007_vm12 = vcmask 1046534  }
  0x51   :  { %v5153_v11 = vld [vmem:[#allocation3 + $0x20] sm:$0xff]   ;;  %5074 = vmatprep.subr.bf16.mxu0 %v5152_v10  ;;  %v5155_v13 = vld [vmem:[#allocation3 + $0x28] sm:$0xff]   ;;  %v5157_v15 = vld [vmem:[#allocation3 + $0x30] sm:$0xff]   ;;  %v5918_v22 = vsub.s32 0, %v5912_v20  ;;  %v118_v24 = vadd.s32 56, %v5912_v20  ;;  %vm323_vm0 = vcmp.lt.s32.totalorder %v5912_v20, 1  ;;  %v447_v57 = vunpack.c.0.s8 %v446_v42 }
  0x52   :  { %5075 = vmatpush3.bf16.msra.mxu0 %v5152_v10  ;;  %5086 = vmatprep.subr.bf16.mxu1 %v5153_v11  ;;  %v5158_v16 = vld [vmem:[#allocation3 + $0x18] sm:$0xff]   ;;  %v5160_v18 = vld [vmem:[#allocation3 + $0x40] sm:$0xff]   ;;  %v123_v28 = vand.u32 31, %v5912_v20  ;;  %v5930_v29 = vadd.s32 24, %v5912_v20  ;;  %vm372_vm1 = vcmp.lt.s32.totalorder %v5912_v20, 7  ;;  %v115_v36 = vadd.s32 32, %v5912_v20 }
  0x53   :  { %245 = vperm.xlu1 %5151, %v104_v4   ;;  %270 = vperm.xlu0 %5150, %v109_v5   ;;  %v5159_v17 = vld [vmem:[#allocation3 + $0x38] sm:$0xff]   ;;  %v4652_v23 = vld [vmem:[%s6636_s1 + $0x2] sm:$0x1]  ;;  %v4651_v26 = vld [vmem:[%s6636_s1 + $0x1] sm:$0x1]  ;;  %v172_v35 = vand.u32 31, %v118_v24  ;;  %v5985_v10 = vsub.s32 %v447_v57, %v5912_v20 }
  0x54   :  { %5087 = vmatpush3.bf16.msra.mxu1 %v5153_v11  ;;  %5076 = vmatprep.subr.bf16.mxu0 %v5154_v12  ;;  %v231_v21 = vld [vmem:[%s6636_s1] sm:$0x1]  ;;  %v302_v27 = vunpack.c.l.bf16 %v4652_v23  ;;  %v287_v32 = vunpack.c.l.bf16 %v4651_v26  ;;  %vm5946_vm2 = vcmp.eq.s32.totalorder %v123_v28, 0  ;;  %v144_v46 = vand.u32 31, %v5930_v29 }
  0x55   :  { %5088 = vmatprep.subr.bf16.mxu1 %v5155_v13  ;;  %v232_v25 = vunpack.c.l.bf16 %v231_v21  ;;  %vm5951_vm3 = vcmp.eq.s32.totalorder %v172_v35, 31  ;;  %v151_v51 = vand.u32 31, %v115_v36  ;;  %v5967_v59 = vld [vmem:[%s6637_s2] ss:$0 sm:$0xff]  ;;  %vm1009_vm13 = vcmask 1047559  }
  0x56   :  { %5077 = vmatpush3.bf16.msra.mxu0 %v5154_v12  ;;  %v5936_v31 = vrot.slane %v302_v27, %v5918_v22  ;;  %v5944_v40 = vrot.slane %v287_v32, %v5918_v22  ;;  %vm5973_vm5 = vcmp.eq.s32.totalorder %v144_v46, 31  ;;  %vm1058_vm14 = vcmask 523264  }
  0x57   :  { %255 = vperm.xlu1 %5151, %v106_v6   ;;  %250 = vperm.xlu0 %5150, %v105_v7   ;;  %v5933_v30 = vrot.slane %v232_v25, %v5918_v22  ;;  %vm5991_vm6 = vcmp.eq.s32.totalorder %v151_v51, 0 }
  0x58   :  { %5089 = vmatpush3.bf16.msra.mxu1 %v5155_v13  ;;  %5078 = vmatprep.subr.bf16.mxu0 %v5156_v14 }
  0x59   :  { %5090 = vmatprep.subr.bf16.mxu1 %v5157_v15 }
  0x5a   :  { %5079 = vmatpush3.bf16.msra.mxu0 %v5156_v14 }
  0x5b   :  { %265 = vperm.xlu1 %5151, %v108_v8   ;;  %260 = vperm.xlu0 %5150, %v107_v9  }
  0x5c   :  { %5091 = vmatpush3.bf16.msra.mxu1 %v5157_v15  ;;  %5080 = vmatprep.subr.bf16.mxu0 %v5158_v16 }
  0x5d   :  { %5092 = vmatprep.subr.bf16.mxu1 %v5159_v17 }
  0x5e   :  { %5081 = vmatpush3.bf16.msra.mxu0 %v5158_v16 }
  0x5f   :  { %5098 = vmatprep.subr.bf16.mxu0 %v5160_v18 }
  0x60   :  { %5093 = vmatpush3.bf16.msra.mxu1 %v5159_v17 }
  0xce   :  { %v241_v33 = vpop.permute.xlu1 %240  ;;  %v236_v34 = vpop.permute.xlu0 %235 }
  0xcf   :  { %v278_v37 = vmul.f32 %v5933_v30, %v241_v33  ;;  %v308_v38 = vmul.f32 %v5936_v31, %v241_v33  ;;  %v277_v39 = vmul.f32 %v5933_v30, %v236_v34  ;;  %v307_v52 = vmul.f32 %v5936_v31, %v236_v34 }
  0xd0   :  { %v293_v56 = vmul.f32 %v5944_v40, %v241_v33  ;;  %v292_v9 = vmul.f32 %v5944_v40, %v236_v34 }
  0xd1   :  { %v316_v43 = vrot.slane %v278_v37, 7  ;;  %v315_v44 = vrot.slane %v277_v39, 7  ;;  %v365_v47 = vrot.slane %v308_v38, 1  ;;  %v364_v4 = vrot.slane %v307_v52, 1 }
  0xd2   :  { %v246_v48 = vpop.permute.xlu1 %245  ;;  %v271_v50 = vpop.permute.xlu0 %270 }
  0xd3   :  { %v330_v53 = vsel %vm323_vm0, %v315_v44, %v316_v43  ;;  %v279_v54 = vmul.f32 %v5933_v30, %v246_v48  ;;  %v309_v55 = vmul.f32 %v5936_v31, %v246_v48  ;;  %v5962_v58 = vmul.f32 %v5933_v30, %v271_v50 }
  0xd4   :  { %v5970_v62 = vmul.f32 %v5936_v31, %v271_v50  ;;  %v357_v63 = vadd.f32 %v330_v53, %v293_v56  ;;  %v294_v14 = vmul.f32 %v5944_v40, %v246_v48  ;;  %v379_v24 = vsel %vm372_vm1, %v364_v4, %v365_v47 }
  0xd5   :  { %v317_v60 = vrot.slane %v279_v54, 7  ;;  %v366_v61 = vrot.slane %v309_v55, 1  ;;  %v322_v0 = vrot.slane %v5962_v58, 7  ;;  %v6017_v33 = vmul.f32 %v5944_v40, %v271_v50 }
  0xd6   :  { %v256_v2 = vpop.permute.xlu1 %255  ;;  %v371_v6 = vrot.slane %v5970_v62, 1  ;;  %v251_v8 = vpop.permute.xlu0 %250 }
  0xd7   :  { %v378_v5 = vsel %vm372_vm1, %v365_v47, %v366_v61  ;;  %v5981_v7 = vmul.f32 %v5933_v30, %v256_v2  ;;  %v331_v12 = vsel %vm323_vm0, %v322_v0, %v315_v44  ;;  %v329_v15 = vsel %vm323_vm0, %v316_v43, %v317_v60 }
  0xd8   :  { %v406_v11 = vadd.f32 %v378_v5, %v357_v63  ;;  %v348_v16 = vsel %vm5946_vm2, 0.0, %v331_v12  ;;  %v6001_v17 = vmul.f32 %v5936_v31, %v256_v2  ;;  %v6008_v21 = vsel %vm372_vm1, %v371_v6, %v364_v4 }
  0xd9   :  { %v356_v19 = vadd.f32 %v348_v16, %v292_v9  ;;  %v280_v23 = vmul.f32 %v5933_v30, %v251_v8  ;;  %v319_v25 = vrot.slane %v5981_v7, 7  ;;  %v310_v27 = vmul.f32 %v5936_v31, %v251_v8 }
  0xda   :  { %v421_v18 = vadd.f32 %v5967_v59, %v406_v11  ;;  %v368_v26 = vrot.slane %v6001_v17, 1  ;;  %v266_v28 = vpop.permute.xlu1 %265  ;;  %v358_v36 = vadd.f32 %v329_v15, %v294_v14  ;;  %v404_v37 = vsel %vm5951_vm3, 0.0, %v6008_v21  ;;  %v6048_v54 = vpop.permute.xlu0 %260 }
  0xdb   :  { %v405_v34 = vadd.f32 %v379_v24, %v356_v19  ;;  %v318_v35 = vrot.slane %v280_v23, 7  ;;  %v296_v38 = vmul.f32 %v5944_v40, %v256_v2  ;;  %v367_v39 = vrot.slane %v310_v27, 1 }
  0xdc   :  { %v429_v32 = vmax.f32 %v421_v18, 0.0  ;;  %v295_v43 = vmul.f32 %v5944_v40, %v251_v8  ;;  %v6027_v44 = vmul.f32 %v5933_v30, %v266_v28  ;;  %v6038_v48 = vmul.f32 %v5944_v40, %v266_v28 }
  0xdd   :  { %v420_v42 = vadd.f32 %v5967_v59, %v405_v34  ;;  %v328_v45 = vsel %vm323_vm0, %v317_v60, %v318_v35  ;;  %v376_v46 = vsel %vm372_vm1, %v367_v39, %v368_v26  ;;  %v377_v47 = vsel %vm372_vm1, %v366_v61, %v367_v39 }
  0xde   :  { %v468_v41 = vrot.slane %v429_v32, %v5985_v10  ;;  %v327_v52 = vsel %vm323_vm0, %v318_v35, %v319_v25  ;;  %v6046_v53 = vmul.f32 %v5936_v31, %v266_v28  ;;  %v461_v55 = vcombine.high %v429_v32, %v429_v32 }
  0xdf   :  { %v428_v51 = vmax.f32 %v420_v42, 0.0  ;;  %v359_v57 = vadd.f32 %v328_v45, %v295_v43  ;;  %v400_v60 = vsel %vm5973_vm5, 0.0, %v376_v46  ;;  %v407_v4 = vadd.f32 %v377_v47, %v358_v36 }
  0xe0   :  { %v641_v50 = vsel %vm612_vm4, %v468_v41, -inf  ;;  %v476_v61 = vcombine.high %v468_v41, %v468_v41  ;;  %v352_v5 = vsel %vm5991_vm6, 0.0, %v327_v52  ;;  %v321_v9 = vrot.slane %v6027_v44, 7 }
  0xe1   :  { %v642_v56 = vrot.slane %v641_v50, 4  ;;  %v444_v63 = vcombine.high %v428_v51, %v428_v51  ;;  %v451_v2 = vrot.slane %v428_v51, %v5985_v10  ;;  %v408_v8 = vadd.f32 %v400_v60, %v359_v57 }
  0xe2   :  { %v6058_v11 = vmul.f32 %v5933_v30, %v6048_v54  ;;  %v422_v15 = vadd.f32 %v5967_v59, %v407_v4  ;;  %v6064_v16 = vrot.slane %v461_v55, %v5985_v10  ;;  %v6068_v23 = vsel %vm612_vm4, %v476_v61, -inf }
  0xe3   :  { %v458_v12 = vrot.slane %v444_v63, %v5985_v10  ;;  %v459_v14 = vcombine.high %v451_v2, %v451_v2  ;;  %v613_v3 = vsel %vm612_vm4, %v451_v2, -inf  ;;  %v643_v18 = vmax.f32 %v641_v50, %v642_v56 }
  0xe4   :  { %v614_v13 = vrot.slane %v613_v3, 4  ;;  %v423_v19 = vadd.f32 %v5967_v59, %v408_v8  ;;  %v430_v27 = vmax.f32 %v422_v15, 0.0  ;;  %v324_v35 = vsel %vm323_vm0, %v321_v9, %v322_v0 }
  0xe5   :  { %v620_v30 = vsel %vm612_vm4, %v459_v14, -inf  ;;  %v627_v24 = vsel %vm612_vm4, %v458_v12, -inf  ;;  %v460_v28 = vcombine.high %v458_v12, %v458_v12  ;;  %v644_v43 = vrot.slane %v643_v18, 2 }
  0xe6   :  { %v615_v32 = vmax.f32 %v613_v3, %v614_v13  ;;  %v621_v34 = vrot.slane %v620_v30, 4  ;;  %v628_v36 = vrot.slane %v627_v24, 4  ;;  %v431_v39 = vmax.f32 %v423_v19, 0.0 }
  0xe7   :  { %v478_v41 = vcombine.high %v430_v27, %v430_v27  ;;  %v485_v42 = vrot.slane %v430_v27, %v5985_v10  ;;  %v649_v45 = vrot.slane %v6068_v23, 4  ;;  %v6080_v47 = vadd.f32 %v352_v5, %v296_v38 }
  0xe8   :  { %v616_v46 = vrot.slane %v615_v32, 2  ;;  %v495_v58 = vcombine.high %v431_v39, %v431_v39  ;;  %v502_v52 = vrot.slane %v431_v39, %v5985_v10  ;;  %v622_v55 = vmax.f32 %v620_v30, %v621_v34 }
  0xe9   :  { %v492_v50 = vrot.slane %v478_v41, %v5985_v10  ;;  %v493_v51 = vcombine.high %v485_v42, %v485_v42  ;;  %v6085_v0 = vsel %vm612_vm4, %v460_v28, -inf  ;;  %v669_v56 = vsel %vm612_vm4, %v485_v42, -inf }
  0xea   :  { %v363_v57 = vadd.f32 %v324_v35, %v6017_v33  ;;  %v6089_v60 = vmax.f32 %v627_v24, %v628_v36  ;;  %v510_v63 = vcombine.high %v502_v52, %v502_v52  ;;  %v670_v38 = vrot.slane %v669_v56, 4 }
  0xeb   :  { %v494_v61 = vcombine.high %v492_v50, %v492_v50  ;;  %v6091_v2 = vmax.f32 %v615_v32, %v616_v46  ;;  %v6094_v4 = vrot.slane %v495_v58, %v5985_v10  ;;  %v676_v5 = vsel %vm612_vm4, %v493_v51, -inf }
  0xec   :  { %v683_v8 = vsel %vm612_vm4, %v492_v50, -inf  ;;  %v6098_v12 = vmax.f32 %v643_v18, %v644_v43  ;;  %v671_v14 = vmax.f32 %v669_v56, %v670_v38  ;;  %v677_v3 = vrot.slane %v676_v5, 4 }
  0xed   :  { %v684_v15 = vrot.slane %v683_v8, 4  ;;  %v623_v33 = vrot.slane %v622_v55, 2  ;;  %v690_v13 = vsel %vm612_vm4, %v494_v61, -inf  ;;  %v697_v19 = vsel %vm612_vm4, %v502_v52, -inf }
  0xee   :  { %v704_v30 = vsel %vm612_vm4, %v510_v63, -inf  ;;  %v635_v24 = vrot.slane %v6085_v0, 4  ;;  %v672_v27 = vrot.slane %v671_v14, 2  ;;  %v678_v28 = vmax.f32 %v676_v5, %v677_v3 }
  0xef   :  { %v685_v32 = vmax.f32 %v683_v8, %v684_v15  ;;  %v618_v34 = vrot.slane %v6091_v2, 1  ;;  %v630_v18 = vrot.slane %v6089_v60, 2  ;;  %v698_v35 = vrot.slane %v697_v19, 4 }
  0xf0   :  { %v6108_v36 = vsel %vm612_vm4, %v6094_v4, -inf  ;;  %v673_v39 = vmax.f32 %v671_v14, %v672_v27  ;;  %v679_v41 = vrot.slane %v678_v28, 2  ;;  %v691_v42 = vrot.slane %v690_v13, 4 }
  0xf1   :  { %v705_v43 = vrot.slane %v704_v30, 4  ;;  %v6110_v46 = vmax.f32 %v622_v55, %v623_v33  ;;  %v699_v50 = vmax.f32 %v697_v19, %v698_v35  ;;  %v370_v51 = vrot.slane %v6046_v53, 1 }
  0xf2   :  { %v412_v58 = vadd.f32 %v404_v37, %v363_v57  ;;  %v511_v52 = vcombine.high %v6094_v4, %v6094_v4  ;;  %v674_v56 = vrot.slane %v673_v39, 1  ;;  %v680_v61 = vmax.f32 %v678_v28, %v679_v41 }
  0xf3   :  { %v686_v63 = vrot.slane %v685_v32, 2  ;;  %v700_v38 = vrot.slane %v699_v50, 2  ;;  %v712_v5 = vrot.slane %v6108_v36, 4  ;;  %v312_v8 = vmul.f32 %v5936_v31, %v6048_v54 }
  0xf4   :  { %v427_v55 = vadd.f32 %v5967_v59, %v412_v58  ;;  %v675_v53 = vmax.f32 %v673_v39, %v674_v56  ;;  %v6123_v14 = vmax.f32 %v690_v13, %v691_v42  ;;  %v6125_v49 = vmax.f32 %v704_v30, %v705_v43 }
  0xf5   :  { %v320_v21 = vrot.slane %v6058_v11, 7  ;;  %v373_v37 = vsel %vm372_vm1, %v370_v51, %v371_v6  ;;  %v297_v3 = vmul.f32 %v5944_v40, %v6048_v54  ;;  %v369_v15 = vrot.slane %v312_v8, 1 }
  0xf6   :  { %v435_v57 = vmax.f32 %v427_v55, 0.0  ;;  %v681_v33 = vrot.slane %v680_v61, 1  ;;  %v6134_v19 = vmax.f32 %v685_v32, %v686_v63  ;;  %v6144_v11 = vmax.f32 %v699_v50, %v700_v38 }
  0xf7   :  { %v325_v31 = vsel %vm323_vm0, %v320_v21, %v321_v9  ;;  %v326_v62 = vsel %vm323_vm0, %v319_v25, %v320_v21  ;;  %v901_v54 = vpack.c.bf16 %v675_v53, %v675_v53  ;;  %v374_v44 = vsel %vm372_vm1, %v369_v15, %v370_v51 }
  0xf8   :  { %v563_v6 = vcombine.high %v435_v57, %v435_v57  ;;  %v570_v13 = vrot.slane %v435_v57, %v5985_v10  ;;  %v361_v40 = vadd.f32 %v326_v62, %v297_v3  ;;  %v362_v30 = vadd.f32 %v325_v31, %v6038_v48 }
  0xf9   :  { %v375_v7 = vsel %vm372_vm1, %v368_v26, %v369_v15  ;;  %v693_v32 = vrot.slane %v6123_v14, 2  ;;  %v688_v41 = vrot.slane %v6134_v19, 1  ;;  %v6165_v43 = vmax.f32 %v680_v61, %v681_v33 }
  0xfa   :  { %v6155_v9 = vrot.slane %v563_v6, %v5985_v10  ;;  %v578_v25 = vcombine.high %v570_v13, %v570_v13  ;;  %v809_v27 = vsel %vm612_vm4, %v570_v13, -inf  ;;  %v409_v28 = vadd.f32 %v375_v7, %v6080_v47 }
  0xfb   :  { %v810_v35 = vrot.slane %v809_v27, 4  ;;  %v410_v48 = vadd.f32 %v374_v44, %v361_v40  ;;  %v411_v39 = vadd.f32 %v373_v37, %v362_v30  ;;  %v702_v50 = vrot.slane %v6144_v11, 1 }
  0xfc   :  { %v816_v17 = vsel %vm612_vm4, %v578_v25, -inf  ;;  %v823_v26 = vsel %vm612_vm4, %v6155_v9, -inf  ;;  %v424_v42 = vadd.f32 %v5967_v59, %v409_v28  ;;  %v477_v51 = vcombine.high %v6064_v16, %v6064_v16 }
  0xfd   :  { %v425_v47 = vadd.f32 %v5967_v59, %v410_v48  ;;  %v6171_v58 = vunpack.c.l.b16 %v901_v54  ;;  %v811_v56 = vmax.f32 %v809_v27, %v810_v35  ;;  %v426_v63 = vadd.f32 %v5967_v59, %v411_v39 }
  0xfe   :  { %v432_v38 = vmax.f32 %v424_v42, 0.0  ;;  %v817_v55 = vrot.slane %v816_v17, 4  ;;  %v824_v8 = vrot.slane %v823_v26, 4  ;;  %v6177_v61 = vmax.f32 %v6091_v2, %v618_v34 }
  0xff   :  { %v433_v53 = vmax.f32 %v425_v47, 0.0  ;;  %v434_v21 = vmax.f32 %v426_v63, 0.0  ;;  %v625_v3 = vrot.slane %v6110_v46, 1  ;;  %v6187_v31 = vmax.f32 %v6089_v60, %v630_v18 }
 0x100   :  { %v512_v37 = vcombine.high %v432_v38, %v432_v38  ;;  %v519_v57 = vrot.slane %v432_v38, %v5985_v10  ;;  %v812_v62 = vrot.slane %v811_v56, 2  ;;  %v6190_v13 = vmax.f32 %v816_v17, %v817_v55 }
 0x101   :  { %v529_v33 = vcombine.high %v433_v53, %v433_v53  ;;  %v536_v59 = vrot.slane %v433_v53, %v5985_v10  ;;  %v546_v6 = vcombine.high %v434_v21, %v434_v21  ;;  %v6194_v44 = vmax.f32 %v823_v26, %v824_v8 }
 0x102   :  { %v526_v2 = vrot.slane %v512_v37, %v5985_v10  ;;  %v527_v34 = vcombine.high %v519_v57, %v519_v57  ;;  %v725_v30 = vsel %vm612_vm4, %v519_v57, -inf  ;;  %v6197_v27 = vmax.f32 %v6110_v46, %v625_v3 }
 0x103   :  { %v543_v40 = vrot.slane %v529_v33, %v5985_v10  ;;  %v544_v54 = vcombine.high %v536_v59, %v536_v59  ;;  %v726_v25 = vrot.slane %v725_v30, 4  ;;  %v553_v60 = vrot.slane %v434_v21, %v5985_v10 }
 0x104   :  { %v528_v7 = vcombine.high %v526_v2, %v526_v2  ;;  %v732_v18 = vsel %vm612_vm4, %v527_v34, -inf  ;;  %v739_v28 = vsel %vm612_vm4, %v526_v2, -inf  ;;  %v753_v35 = vsel %vm612_vm4, %v536_v59, -inf }
 0x105   :  { %v560_v48 = vrot.slane %v546_v6, %v5985_v10  ;;  %v727_v39 = vmax.f32 %v725_v30, %v726_v25  ;;  %v733_v17 = vrot.slane %v732_v18, 4  ;;  %v740_v42 = vrot.slane %v739_v28, 4 }
 0x106   :  { %v746_v26 = vsel %vm612_vm4, %v528_v7, -inf  ;;  %v754_v47 = vrot.slane %v753_v35, 4  ;;  %v760_v63 = vsel %vm612_vm4, %v544_v54, -inf  ;;  %v767_v46 = vsel %vm612_vm4, %v543_v40, -inf }
 0x107   :  { %v728_v38 = vrot.slane %v727_v39, 2  ;;  %v734_v55 = vmax.f32 %v732_v18, %v733_v17  ;;  %v741_v8 = vmax.f32 %v739_v28, %v740_v42  ;;  %v747_v53 = vrot.slane %v746_v26, 4 }
 0x108   :  { %v545_v21 = vcombine.high %v543_v40, %v543_v40  ;;  %v755_v37 = vmax.f32 %v753_v35, %v754_v47  ;;  %v761_v57 = vrot.slane %v760_v63, 4  ;;  %v768_v3 = vrot.slane %v767_v46, 4 }
 0x109   :  { %v729_v33 = vmax.f32 %v727_v39, %v728_v38  ;;  %v735_v59 = vrot.slane %v734_v55, 2  ;;  %v742_v2 = vrot.slane %v741_v8, 2  ;;  %v748_v34 = vmax.f32 %v746_v26, %v747_v53 }
 0x10a   :  { %v6207_v6 = vmax.f32 %v811_v56, %v812_v62  ;;  %v561_v30 = vcombine.high %v553_v60, %v553_v60  ;;  %v756_v7 = vrot.slane %v755_v37, 2  ;;  %v762_v25 = vmax.f32 %v760_v63, %v761_v57 }
 0x10b   :  { %v819_v54 = vrot.slane %v6190_v13, 2  ;;  %v730_v1 = vrot.slane %v729_v33, 1  ;;  %v736_v15 = vmax.f32 %v734_v55, %v735_v59  ;;  %v743_v18 = vmax.f32 %v741_v8, %v742_v2 }
 0x10c   :  { %v562_v28 = vcombine.high %v560_v48, %v560_v48  ;;  %v757_v17 = vmax.f32 %v755_v37, %v756_v7  ;;  %v6211_v40 = vsel %vm612_vm4, %v545_v21, -inf  ;;  %v781_v35 = vsel %vm612_vm4, %v553_v60, -inf }
 0x10d   :  { %v737_v39 = vrot.slane %v736_v15, 1  ;;  %v744_v42 = vrot.slane %v743_v18, 1  ;;  %v749_v26 = vrot.slane %v748_v34, 2  ;;  %v6214_v56 = vmax.f32 %v767_v46, %v768_v3 }
 0x10e   :  { %v758_v62 = vrot.slane %v757_v17, 1  ;;  %v763_v47 = vrot.slane %v762_v25, 2  ;;  %v782_v63 = vrot.slane %v781_v35, 4  ;;  %v788_v38 = vsel %vm612_vm4, %v561_v30, -inf }
 0x10f   :  { %v731_v53 = vmax.f32 %v729_v33, %v730_v1  ;;  %v6217_v55 = vmax.f32 %v736_v15, %v737_v39  ;;  %v789_v8 = vrot.slane %v788_v38, 4  ;;  %v795_v37 = vsel %vm612_vm4, %v560_v48, -inf }
 0x110   :  { %v6220_v21 = vmax.f32 %v743_v18, %v744_v42  ;;  %v783_v57 = vmax.f32 %v781_v35, %v782_v63  ;;  %v796_v60 = vrot.slane %v795_v37, 4  ;;  %v802_v59 = vsel %vm612_vm4, %v562_v28, -inf }
 0x111   :  { %v814_v46 = vrot.slane %v6207_v6, 1  ;;  %v6224_v3 = vmax.f32 %v757_v17, %v758_v62  ;;  %v790_v2 = vmax.f32 %v788_v38, %v789_v8  ;;  %v803_v7 = vrot.slane %v802_v59, 4 }
 0x112   :  { %v770_v30 = vrot.slane %v6214_v56, 2  ;;  %v775_v1 = vrot.slane %v6211_v40, 4  ;;  %v784_v15 = vrot.slane %v783_v57, 2  ;;  %v797_v33 = vmax.f32 %v795_v37, %v796_v60 }
 0x113   :  { %v6228_v39 = vmax.f32 %v748_v34, %v749_v26  ;;  %v6230_v48 = vmax.f32 %v762_v25, %v763_v47  ;;  %v791_v18 = vrot.slane %v790_v2, 2  ;;  %v909_v35 = vpack.c.bf16 %v731_v53, %v731_v53 }
 0x114   :  { %v785_v42 = vmax.f32 %v783_v57, %v784_v15  ;;  %v798_v28 = vrot.slane %v797_v33, 2  ;;  %v6236_v38 = vmax.f32 %v802_v59, %v803_v7  ;;  %v636_v34 = vmax.f32 %v6085_v0, %v635_v24 }
 0x115   :  { %v792_v63 = vmax.f32 %v790_v2, %v791_v18  ;;  %v632_v47 = vrot.slane %v6187_v31, 1  ;;  %v650_v53 = vmax.f32 %v6068_v23, %v649_v45  ;;  %v646_v60 = vrot.slane %v6098_v12, 1 }
 0x116   :  { %v786_v25 = vrot.slane %v785_v42, 1  ;;  %v799_v26 = vmax.f32 %v797_v33, %v798_v28  ;;  %v637_v57 = vrot.slane %v636_v34, 2  ;;  %v655_v59 = vsel %vm612_vm4, %v6064_v16, -inf }
 0x117   :  { %v793_v37 = vrot.slane %v792_v63, 1  ;;  %v6250_v7 = vunpack.c.l.b16 %v909_v35  ;;  %v651_v15 = vrot.slane %v650_v53, 2  ;;  %v656_v0 = vrot.slane %v655_v59, 4 }
 0x118   :  { %v800_v2 = vrot.slane %v799_v26, 1  ;;  %v6252_v24 = vmax.f32 %v785_v42, %v786_v25  ;;  %v638_v18 = vmax.f32 %v636_v34, %v637_v57  ;;  %v662_v23 = vsel %vm612_vm4, %v477_v51, -inf }
 0x119   :  { %v6254_v33 = vmax.f32 %v792_v63, %v793_v37  ;;  %v805_v45 = vrot.slane %v6236_v38, 2  ;;  %v6262_v28 = vmax.f32 %v6187_v31, %v632_v47  ;;  %v652_v8 = vmax.f32 %v650_v53, %v651_v15 }
 0x11a   :  { %v657_v35 = vmax.f32 %v655_v59, %v656_v0  ;;  %v639_v62 = vrot.slane %v638_v18, 1  ;;  %v647_v17 = vmax.f32 %v6098_v12, %v646_v60  ;;  %v663_v42 = vrot.slane %v662_v23, 4 }
 0x11b   :  { %v694_v63 = vmax.f32 %v6123_v14, %v693_v32  ;;  %v6268_v34 = vmax.f32 %v799_v26, %v800_v2  ;;  %v653_v16 = vrot.slane %v652_v8, 1  ;;  %v689_v51 = vmax.f32 %v6134_v19, %v688_v41 }
 0x11c   :  { %v658_v25 = vrot.slane %v657_v35, 2  ;;  %v917_v31 = vpack.c.bf16 %v6252_v24, %v6252_v24  ;;  %v918_v47 = vpack.c.bf16 %v6254_v33, %v6254_v33  ;;  %v664_v12 = vmax.f32 %v662_v23, %v663_v42 }
 0x11d   :  { %v695_v53 = vrot.slane %v694_v63, 1  ;;  %v703_v14 = vmax.f32 %v6144_v11, %v702_v50  ;;  %v707_v32 = vrot.slane %v6125_v49, 2  ;;  %v713_v26 = vmax.f32 %v6108_v36, %v712_v5 }
 0x11e   :  { %v659_v37 = vmax.f32 %v657_v35, %v658_v25  ;;  %v640_v19 = vmax.f32 %v638_v18, %v639_v62  ;;  %v654_v41 = vmax.f32 %v652_v8, %v653_v16  ;;  %v665_v57 = vrot.slane %v664_v12, 2 }
 0x11f   :  { %v718_v60 = vsel %vm612_vm4, %v511_v52, -inf  ;;  %v708_v2 = vmax.f32 %v6125_v49, %v707_v32  ;;  %v714_v15 = vrot.slane %v713_v26, 2  ;;  %v696_v50 = vmax.f32 %v694_v63, %v695_v53 }
 0x120   :  { %v660_v59 = vrot.slane %v659_v37, 1  ;;  %v719_v0 = vrot.slane %v718_v60, 4  ;;  %v666_v11 = vmax.f32 %v664_v12, %v665_v57  ;;  %v893_v23 = vpack.c.bf16 %v6177_v61, %v6177_v61 }
 0x121   :  { %v894_v36 = vpack.c.bf16 %v6197_v27, %v6197_v27  ;;  %v709_v62 = vrot.slane %v708_v2, 1  ;;  %v715_v4 = vmax.f32 %v713_v26, %v714_v15  ;;  %v895_v49 = vpack.c.bf16 %v6262_v28, %v6262_v28 }
 0x122   :  { %v661_v5 = vmax.f32 %v659_v37, %v660_v59  ;;  %v720_v8 = vmax.f32 %v718_v60, %v719_v0  ;;  %v667_v52 = vrot.slane %v666_v11, 1  ;;  %v896_v18 = vpack.c.bf16 %v640_v19, %v640_v19 }
 0x123   :  { %v897_v35 = vpack.c.bf16 %v647_v17, %v647_v17  ;;  %v710_v42 = vmax.f32 %v708_v2, %v709_v62  ;;  %v716_v63 = vrot.slane %v715_v4, 1  ;;  %v898_v61 = vpack.c.bf16 %v654_v41, %v654_v41 }
 0x124   :  { %v721_v16 = vrot.slane %v720_v8, 2  ;;  %v668_v25 = vmax.f32 %v666_v11, %v667_v52  ;;  %v899_v27 = vpack.c.bf16 %v661_v5, %v661_v5  ;;  %v902_v12 = vpack.c.bf16 %v6165_v43, %v6165_v43 }
 0x125   :  { %v903_v53 = vpack.c.bf16 %v689_v51, %v689_v51  ;;  %v717_v37 = vmax.f32 %v715_v4, %v716_v63  ;;  %v904_v26 = vpack.c.bf16 %v696_v50, %v696_v50  ;;  %v905_v57 = vpack.c.bf16 %v703_v14, %v703_v14 }
 0x126   :  { %v722_v32 = vmax.f32 %v720_v8, %v721_v16  ;;  %v900_v28 = vpack.c.bf16 %v668_v25, %v668_v25  ;;  %v906_v17 = vpack.c.bf16 %v710_v42, %v710_v42  ;;  %v965_v19 = vunpack.c.l.b16 %v893_v23 }
 0x127   :  { %v966_v60 = vunpack.c.l.b16 %v894_v36  ;;  %v907_v2 = vpack.c.bf16 %v717_v37, %v717_v37  ;;  %v967_v41 = vunpack.c.l.b16 %v895_v49  ;;  %v968_v15 = vunpack.c.l.b16 %v896_v18 }
 0x128   :  { %v723_v59 = vrot.slane %v722_v32, 1  ;;  %v969_v0 = vunpack.c.l.b16 %v897_v35  ;;  %v970_v11 = vunpack.c.l.b16 %v898_v61  ;;  %v974_v5 = vunpack.c.l.b16 %v902_v12 }
 0x129   :  { %v975_v62 = vunpack.c.l.b16 %v903_v53  ;;  %v971_v51 = vunpack.c.l.b16 %v899_v27  ;;  %v972_v4 = vunpack.c.l.b16 %v900_v28  ;;  %v976_v8 = vunpack.c.l.b16 %v904_v26 }
 0x12a   :  { %v724_v43 = vmax.f32 %v722_v32, %v723_v59  ;;  %v977_v50 = vunpack.c.l.b16 %v905_v57  ;;  %v998_v14 = vsel %vm997_vm7, %v966_v60, %v965_v19  ;;  %v1011_v23 = vsel %vm997_vm7, %v974_v5, %v6171_v58 }
 0x12b   :  { %v751_v36 = vrot.slane %v6228_v39, 1  ;;  %v1000_v49 = vsel %vm999_vm8, %v967_v41, %v998_v14  ;;  %v1012_v18 = vsel %vm999_vm8, %v975_v62, %v1011_v23  ;;  %v765_v35 = vrot.slane %v6230_v48, 1 }
 0x12c   :  { %v908_v52 = vpack.c.bf16 %v724_v43, %v724_v43  ;;  %v978_v42 = vunpack.c.l.b16 %v906_v17  ;;  %v1002_v63 = vsel %vm1001_vm9, %v968_v15, %v1000_v49  ;;  %v1013_v16 = vsel %vm1001_vm9, %v976_v8, %v1012_v18 }
 0x12d   :  { %v771_v61 = vmax.f32 %v6214_v56, %v770_v30  ;;  %v979_v25 = vunpack.c.l.b16 %v907_v2  ;;  %v1004_v58 = vsel %vm1003_vm10, %v969_v0, %v1002_v63  ;;  %v1014_v27 = vsel %vm1003_vm10, %v977_v50, %v1013_v16 }
 0x12e   :  { %v752_v12 = vmax.f32 %v6228_v39, %v751_v36  ;;  %v980_v53 = vunpack.c.l.b16 %v908_v52  ;;  %v1006_v37 = vsel %vm1005_vm11, %v970_v11, %v1004_v58  ;;  %v1015_v32 = vsel %vm1005_vm11, %v978_v42, %v1014_v27 }
 0x12f   :  { %v776_v26 = vmax.f32 %v6211_v40, %v775_v1  ;;  %v1008_v57 = vsel %vm1007_vm12, %v971_v51, %v1006_v37  ;;  %v1016_v56 = vsel %vm1007_vm12, %v979_v25, %v1015_v32  ;;  %v766_v30 = vmax.f32 %v6230_v48, %v765_v35 }
 0x130   :  { %v806_v28 = vmax.f32 %v6236_v38, %v805_v45  ;;  %v1010_v39 = vsel %vm1009_vm13, %v972_v4, %v1008_v57  ;;  %v1017_v17 = vsel %vm1009_vm13, %v980_v53, %v1016_v56  ;;  %v772_v19 = vrot.slane %v771_v61, 1 }
 0x131   :  { %v777_v60 = vrot.slane %v776_v26, 2  ;;  %v6325_v59 = vpack.c.b16 %v1017_v17, %v1010_v39  ;;  %v820_v40 = vmax.f32 %v6190_v13, %v819_v54  ;;  %v826_v1 = vrot.slane %v6194_v44, 2 }
 0x132   :  { %v807_v2 = vrot.slane %v806_v28, 1  ;;  %v815_v38 = vmax.f32 %v6207_v6, %v814_v46  ;;  %v6659_v45 = vcombine.high %v6155_v9, %v6155_v9  ;;  %v912_v15 = vpack.c.bf16 %v752_v12, %v752_v12 }
 0x133   :  { %v778_v48 = vmax.f32 %v776_v26, %v777_v60  ;;  %5082 = vmatprep.mubr.msk.bf16.mxu0 %vm1058_vm14, %v6325_v59  ;;  %5094 = vmatprep.mubr.msk.bf16.mxu1 %vm1058_vm14, %v6325_v59  ;;  %v821_v54 = vrot.slane %v820_v40, 1  ;;  %v827_v0 = vmax.f32 %v6194_v44, %v826_v1  ;;  %v6660_v6 = vpack.c.bf16 %v6217_v55, %v6217_v55 }
 0x134   :  { %v830_v41 = vsel %vm612_vm4, %v6659_v45, -inf  ;;  %v808_v13 = vmax.f32 %v806_v28, %v807_v2  ;;  %v773_v5 = vmax.f32 %v771_v61, %v772_v19  ;;  %v919_v62 = vpack.c.bf16 %v6268_v34, %v6268_v34 }
 0x135   :  { %v831_v11 = vrot.slane %v830_v41, 4  ;;  %v982_v46 = vunpack.c.l.b16 %v6660_v6  ;;  %v779_v9 = vrot.slane %v778_v48, 1  ;;  %v822_v43 = vmax.f32 %v820_v40, %v821_v54  ;;  %v5164_v6 = vld [vmem:[#allocation5] ss:$8 sps:$4 sm:$0xff]  }
 0x136   :  { %v828_v51 = vrot.slane %v827_v0, 1  ;;  %v920_v8 = vpack.c.bf16 %v808_v13, %v808_v13  ;;  %v6661_v50 = vpack.c.bf16 %v6220_v21, %v6220_v21  ;;  %v989_v44 = vunpack.c.l.b16 %v917_v31  ;;  %v5162_v13 = vld [vmem:[#allocation3 + $0x50] sm:$0xff]  }
 0x137   :  { %v832_v4 = vmax.f32 %v830_v41, %v831_v11  ;;  %v990_v55 = vunpack.c.l.b16 %v918_v47  ;;  %v914_v23 = vpack.c.bf16 %v766_v30, %v766_v30  ;;  %v921_v34 = vpack.c.bf16 %v815_v38, %v815_v38  ;;  %v5161_v41 = vld [vmem:[#allocation3 + $0x48] sm:$0xff]  }
 0x138   :  { %v983_v14 = vunpack.c.l.b16 %v6661_v50  ;;  %v829_v36 = vmax.f32 %v827_v0, %v828_v51  ;;  %v984_v49 = vunpack.c.l.b16 %v912_v15  ;;  %v915_v18 = vpack.c.bf16 %v773_v5, %v773_v5  ;;  %v5652_v15 = vld [vmem:[#allocation3 + $0x40] sm:$0xff]   ;;  %v5163_v0 = vld [vmem:[#allocation3 + $0x58] sm:$0xff]  }
 0x139   :  { %v833_v52 = vrot.slane %v832_v4, 2  ;;  %v922_v35 = vpack.c.bf16 %v822_v43, %v822_v43  ;;  %v991_v42 = vunpack.c.l.b16 %v919_v62  ;;  %v992_v63 = vunpack.c.l.b16 %v920_v8  ;;  %v5166_v11 = vld [vmem:[#allocation5 + $0x4] ss:$8 sps:$4 sm:$0xff]   ;;  %v5167_v5 = vld [vmem:[#allocation5 + $0x80] ss:$8 sps:$4 sm:$0xff]  }
 0x13a   :  { %v780_v16 = vmax.f32 %v778_v48, %v779_v9  ;;  %v6662_v61 = vpack.c.bf16 %v6224_v3, %v6224_v3  ;;  %v1018_v31 = vsel %vm997_vm7, %v982_v46, %v6250_v7  ;;  %v923_v33 = vpack.c.bf16 %v829_v36, %v829_v36  ;;  %v5169_v46 = vld [vmem:[#allocation5 + $0x84] ss:$8 sps:$4 sm:$0xff]   ;;  %1730 = vmatprep.subr.bf16.mxu1 %v5166_v11  ;;  %v5170_v9 = vld [vmem:[#allocation5 + $0x10] ss:$8 sps:$4 sm:$0xff]   ;;  %v5175_v62 = vld [vmem:[#allocation5 + $0x94] ss:$8 sps:$4 sm:$0xff]  }
 0x13b   :  { %v834_v21 = vmax.f32 %v832_v4, %v833_v52  ;;  %v986_v47 = vunpack.c.l.b16 %v914_v23  ;;  %v1019_v25 = vsel %vm999_vm8, %v983_v14, %v1018_v31  ;;  %v1025_v58 = vsel %vm997_vm7, %v990_v55, %v989_v44  ;;  %v5173_v43 = vld [vmem:[#allocation5 + $0x90] ss:$8 sps:$4 sm:$0xff]   ;;  %v5178_v51 = vld [vmem:[#allocation5 + $0x24] ss:$8 sps:$4 sm:$0xff]   ;;  %v5176_v4 = vld [vmem:[#allocation5 + $0x20] ss:$8 sps:$4 sm:$0xff]  }
 0x13c   :  { %v985_v24 = vunpack.c.l.b16 %v6662_v61  ;;  %v993_v12 = vunpack.c.l.b16 %v921_v34  ;;  %v1020_v53 = vsel %vm1001_vm9, %v984_v49, %v1019_v25  ;;  %v1026_v37 = vsel %vm999_vm8, %v991_v42, %v1025_v58  ;;  %v5181_v8 = vld [vmem:[#allocation5 + $0xa4] ss:$8 sps:$4 sm:$0xff]   ;;  %v5179_v50 = vld [vmem:[#allocation5 + $0xa0] ss:$8 sps:$4 sm:$0xff]   ;;  %v5184_v14 = vld [vmem:[#allocation5 + $0x34] ss:$8 sps:$4 sm:$0xff]  }
 0x13d   :  { %v835_v27 = vrot.slane %v834_v21, 1  ;;  %v994_v32 = vunpack.c.l.b16 %v922_v35  ;;  %v1027_v3 = vsel %vm1001_vm9, %v992_v63, %v1026_v37  ;;  %v916_v56 = vpack.c.bf16 %v780_v16, %v780_v16  ;;  %v5182_v44 = vld [vmem:[#allocation5 + $0x30] ss:$8 sps:$4 sm:$0xff]   ;;  %v5187_v55 = vld [vmem:[#allocation5 + $0xb4] ss:$8 sps:$4 sm:$0xff]  }
 0x13e   :  { %v1021_v26 = vsel %vm1003_vm10, %v985_v24, %v1020_v53  ;;  %v1028_v30 = vsel %vm1003_vm10, %v993_v12, %v1027_v3  ;;  %v987_v28 = vunpack.c.l.b16 %v915_v18  ;;  %v995_v39 = vunpack.c.l.b16 %v923_v33  ;;  %v5185_v23 = vld [vmem:[#allocation5 + $0xb0] ss:$8 sps:$4 sm:$0xff]   ;;  %v5190_v36 = vld [vmem:[#allocation5 + $0x44] ss:$8 sps:$4 sm:$0xff]   ;;  %v5188_v52 = vld [vmem:[#allocation5 + $0x40] ss:$8 sps:$4 sm:$0xff]  }
 0x13f   :  { %v836_v57 = vmax.f32 %v834_v21, %v835_v27  ;;  %v1022_v7 = vsel %vm1005_vm11, %v986_v47, %v1021_v26  ;;  %v1029_v17 = vsel %vm1005_vm11, %v994_v32, %v1028_v30  ;;  %v988_v40 = vunpack.c.l.b16 %v916_v56  ;;  %v5193_v34 = vld [vmem:[#allocation5 + $0xc4] ss:$8 sps:$4 sm:$0xff]   ;;  %v5191_v49 = vld [vmem:[#allocation5 + $0xc0] ss:$8 sps:$4 sm:$0xff]   ;;  %v5196_v18 = vld [vmem:[#allocation5 + $0x54] ss:$8 sps:$4 sm:$0xff]  }
 0x140   :  { %v1023_v60 = vsel %vm1007_vm12, %v987_v28, %v1022_v7  ;;  %v1030_v2 = vsel %vm1007_vm12, %v995_v39, %v1029_v17  ;;  %v6663_v54 = vmov 0   ;;  %v5194_v35 = vld [vmem:[#allocation5 + $0x50] ss:$8 sps:$4 sm:$0xff]   ;;  %v5199_v42 = vld [vmem:[#allocation5 + $0xd4] ss:$8 sps:$4 sm:$0xff]   ;;  %v113_v27 = vadd.s32 16, %v5912_v20 }
 0x141   :  { %v924_v19 = vpack.c.bf16 %v836_v57, %v836_v57  ;;  %v1024_v48 = vsel %vm1009_vm13, %v988_v40, %v1023_v60  ;;  %v5197_v63 = vld [vmem:[#allocation5 + $0xd0] ss:$8 sps:$4 sm:$0xff]   ;;  %v5202_v16 = vld [vmem:[#allocation5 + $0x64] ss:$8 sps:$4 sm:$0xff]   ;;  %v5200_v21 = vld [vmem:[#allocation5 + $0x60] ss:$8 sps:$4 sm:$0xff]  }
 0x142   :  { %v5205_v61 = vld [vmem:[#allocation5 + $0xe4] ss:$8 sps:$4 sm:$0xff]   ;;  %v5203_v24 = vld [vmem:[#allocation5 + $0xe0] ss:$8 sps:$4 sm:$0xff]   ;;  %v5208_v31 = vld [vmem:[#allocation5 + $0x74] ss:$8 sps:$4 sm:$0xff]  }
 0x143   :  { %v996_v1 = vunpack.c.l.b16 %v924_v19  ;;  %v5211_v33 = vld [vmem:[#allocation5 + $0xf4] ss:$8 sps:$4 sm:$0xff]   ;;  %v5206_v47 = vld [vmem:[#allocation5 + $0x70] ss:$8 sps:$4 sm:$0xff]   ;;  %v5214_v58 = vld [vmem:[#allocation5 + $0x104] ss:$8 sps:$4 sm:$0xff]  }
 0x144   :  { %v5209_v25 = vld [vmem:[#allocation5 + $0xf0] ss:$8 sps:$4 sm:$0xff]   ;;  %v841_v12 = vand.u32 15, %v5912_v20  ;;  %v855_v32 = vand.u32 15, %v113_v27  ;;  %v862_v11 = vand.u32 15, %v5930_v29  ;;  %vm1429_vm5 = vcmask 1041408  }
 0x145   :  { %v1031_v38 = vsel %vm1009_vm13, %v996_v1, %v1030_v2  ;;  %v4672_v29 = vld [vmem:[%s6639_s4] ss:$0 sm:$0xff] }
 0x146   :  { %v1033_v45 = vpack.c.b16 %v1031_v38, %v1024_v48  ;;  %vm885_vm15 = vcmp.eq.s32.totalorder %v841_v12, 0  ;;  %vm887_vm2 = vcmp.eq.s32.totalorder %v855_v32, 0  ;;  %vm892_vm3 = vcmp.eq.s32.totalorder %v862_v11, 15 }
 0x148   :  { %5083 = vmatmul.mubr.msk.bf16.vlgmr.msra.gmra.mrb[0].mxu0 %vm1058_vm14, %v1033_v45  ;;  %5095 = vmatmul.mubr.msk.bf16.vlgmr.msra.gmra.mrb[0].mxu1 %vm1058_vm14, %v1033_v45 }
 0x149   :  { %5099 = vmatpush3.bf16.msra.mxu0 %v5652_v15  ;;  %5106 = vmatprep.mubr.msk.bf16.mxu0 %vm1058_vm14, %v6325_v59  ;;  %v5172_v59 = vld [vmem:[#allocation5 + $0x14] ss:$8 sps:$4 sm:$0xff]  }
 0x14a   :  { %5100 = vmatprep.subr.bf16.mxu0 %v5161_v41  ;;  %1762 = vmatprep.mubr.bf16.mxu1 %v6663_v54 }
 0x14b   :  { %1731 = vmatpush1.bf16.msra.mxu1 %v5164_v6 }
 0x14c   :  { %1732 = vmatprep.subr.bf16.mxu1 %v5172_v59 }
 0x14d   :  { %5101 = vmatpush3.bf16.msra.mxu0 %v5161_v41 }
 0x14e   :  { %5102 = vmatprep.subr.bf16.mxu0 %v5162_v13 }
 0x14f   :  { %1733 = vmatpush1.bf16.msra.mxu1 %v5170_v9 }
 0x150   :  { %1734 = vmatprep.subr.bf16.mxu1 %v5178_v51 }
 0x151   :  { %5103 = vmatpush3.bf16.msra.mxu0 %v5162_v13 }
 0x152   :  { %5104 = vmatprep.subr.bf16.mxu0 %v5163_v0 }
 0x153   :  { %1735 = vmatpush1.bf16.msra.mxu1 %v5176_v4 }
 0x154   :  { %1736 = vmatprep.subr.bf16.mxu1 %v5184_v14 }
 0x155   :  { %5105 = vmatpush3.bf16.msra.mxu0 %v5163_v0  ;;  %v6393_v0 = vadd.s32 8, %v5912_v20 }
 0x156   :  { %1870 = vmatprep.subr.bf16.mxu0 %v5169_v46 }
 0x157   :  { %1737 = vmatpush1.bf16.msra.mxu1 %v5182_v44  ;;  %v848_v46 = vand.u32 15, %v6393_v0 }
 0x158   :  { %5107 = vmatmul.mubr.msk.bf16.vlgmr.msra.gmra.mrb[4].mxu0 %vm1058_vm14, %v1033_v45  ;;  %1738 = vmatprep.subr.bf16.mxu1 %v5190_v36 }
 0x159   :  { %1902 = vmatprep.mubr.bf16.mxu0 %v6663_v54  ;;  %1871 = vmatpush1.bf16.msra.mxu0 %v5167_v5  ;;  %vm890_vm4 = vcmp.eq.s32.totalorder %v848_v46, 15 }
 0x15a   :  { %1872 = vmatprep.subr.bf16.mxu0 %v5175_v62 }
 0x15b   :  { %1739 = vmatpush1.bf16.msra.mxu1 %v5188_v52 }
 0x15c   :  { %1740 = vmatprep.subr.bf16.mxu1 %v5196_v18 }
 0x15d   :  { %1873 = vmatpush1.bf16.msra.mxu0 %v5173_v43 }
 0x15e   :  { %1874 = vmatprep.subr.bf16.mxu0 %v5181_v8 }
 0x15f   :  { %1741 = vmatpush1.bf16.msra.mxu1 %v5194_v35 }
 0x160   :  { %1742 = vmatprep.subr.bf16.mxu1 %v5202_v16 }
 0x161   :  { %1875 = vmatpush1.bf16.msra.mxu0 %v5179_v50 }
 0x162   :  { %1876 = vmatprep.subr.bf16.mxu0 %v5187_v55 }
 0x163   :  { %1743 = vmatpush1.bf16.msra.mxu1 %v5200_v21 }
 0x164   :  { %1744 = vmatprep.subr.bf16.mxu1 %v5208_v31 }
 0x165   :  { %1877 = vmatpush1.bf16.msra.mxu0 %v5185_v23 }
 0x166   :  { %1878 = vmatprep.subr.bf16.mxu0 %v5193_v34 }
 0x167   :  { %1745 = vmatpush1.bf16.msra.mxu1 %v5206_v47 }
 0x168   :  { %2010 = vmatprep.subr.bf16.mxu1 %v5214_v58 }
 0x169   :  { %1879 = vmatpush1.bf16.msra.mxu0 %v5191_v49 }
 0x16a   :  { %1880 = vmatprep.subr.bf16.mxu0 %v5199_v42 }
 0x16d   :  { %1881 = vmatpush1.bf16.msra.mxu0 %v5197_v63 }
 0x16e   :  { %1882 = vmatprep.subr.bf16.mxu0 %v5205_v61 }
 0x171   :  { %1883 = vmatpush1.bf16.msra.mxu0 %v5203_v24 }
 0x172   :  { %1884 = vmatprep.subr.bf16.mxu0 %v5211_v33 }
 0x175   :  { %1885 = vmatpush1.bf16.msra.mxu0 %v5209_v25 }
 0x21b   :  { %v5084_v53 = vpop.f32.mrb[0].mxu0  ;;  %v5096_v37 = vpop.f32.mrb[0].mxu1 }
 0x21c   :  { %v1099_v26 = vpop.f32.mrb[1].mxu0  ;;  %v1181_v3 = vpop.f32.mrb[1].mxu1  ;;  %v1280_v30 = vrot.slane %v5084_v53, 7 }
 0x21d   :  { %v1278_v57 = vrot.slane %v1099_v26, 7  ;;  %v5085_v56 = vpop.f32.mrb[2].mxu0  ;;  %v5097_v7 = vpop.f32.mrb[2].mxu1 }
 0x21e   :  { %v1281_v28 = vrot.slane %v5085_v56, 7  ;;  %v1102_v39 = vpop.f32.mrb[3].mxu0  ;;  %v1184_v17 = vpop.f32.mrb[3].mxu1 }
 0x21f   :  { %v1279_v19 = vrot.slane %v1102_v39, 7 }
 0x220   :  { %v1285_v60 = vsel %vm323_vm0, %v1281_v28, %v1278_v57  ;;  %v1282_v2 = vsel %vm323_vm0, %v1280_v30, %v1281_v28 }
 0x221   :  { %v1294_v40 = vsel %vm885_vm15, 0.0, %v1285_v60  ;;  %v1301_v1 = vadd.f32 %v5097_v7, %v1282_v2  ;;  %v1283_v48 = vsel %vm323_vm0, %v1279_v19, %v1280_v30  ;;  %v1284_v38 = vsel %vm323_vm0, %v1278_v57, %v1279_v19 }
 0x222   :  { %v1298_v45 = vadd.f32 %v1294_v40, %v1181_v3  ;;  %v1296_v41 = vsel %vm887_vm2, 0.0, %v1283_v48  ;;  %v1299_v15 = vadd.f32 %v1284_v38, %v1184_v17 }
 0x223   :  { %v1300_v13 = vadd.f32 %v5096_v37, %v1296_v41 }
 0x22b   :  { %v5108_v6 = vpop.f32.mrb[4].mxu0 }
 0x22c   :  { %v1263_v5 = vpop.f32.mrb[5].mxu0  ;;  %v1304_v62 = vrot.slane %v5108_v6, 1 }
 0x22d   :  { %v1302_v59 = vrot.slane %v1263_v5, 1  ;;  %v5109_v9 = vpop.f32.mrb[6].mxu0 }
 0x22e   :  { %v1305_v43 = vrot.slane %v5109_v9, 1  ;;  %v1266_v51 = vpop.f32.mrb[7].mxu0 }
 0x22f   :  { %v1303_v4 = vrot.slane %v1266_v51, 1 }
 0x230   :  { %v1306_v8 = vsel %vm372_vm1, %v1304_v62, %v1305_v43  ;;  %v1309_v50 = vsel %vm372_vm1, %v1305_v43, %v1302_v59 }
 0x231   :  { %v1321_v14 = vsel %vm892_vm3, 0.0, %v1309_v50  ;;  %v1324_v44 = vadd.f32 %v1306_v8, %v1300_v13  ;;  %v1307_v55 = vsel %vm372_vm1, %v1303_v4, %v1304_v62  ;;  %v1308_v23 = vsel %vm372_vm1, %v1302_v59, %v1303_v4 }
 0x232   :  { %v1325_v36 = vadd.f32 %v1321_v14, %v1301_v1  ;;  %v1319_v52 = vsel %vm890_vm4, 0.0, %v1307_v55  ;;  %v1322_v34 = vadd.f32 %v1308_v23, %v1298_v45 }
 0x233   :  { %v1335_v49 = vadd.f32 %v4672_v29, %v1324_v44  ;;  %v1323_v18 = vadd.f32 %v1319_v52, %v1299_v15 }
 0x234   :  { %v1336_v35 = vadd.f32 %v4672_v29, %v1325_v36  ;;  %v1333_v42 = vadd.f32 %v4672_v29, %v1322_v34 }
 0x235   :  { %v1339_v63 = vmax.f32 %v1335_v49, 0.0  ;;  %v1334_v16 = vadd.f32 %v4672_v29, %v1323_v18 }
 0x236   :  { %v1340_v21 = vmax.f32 %v1336_v35, 0.0  ;;  %v1337_v61 = vmax.f32 %v1333_v42, 0.0 }
 0x237   :  { %v1379_v24 = vcombine.high %v1339_v63, %v1339_v63  ;;  %v1386_v31 = vrot.slane %v1339_v63, %v5985_v10  ;;  %v1338_v25 = vmax.f32 %v1334_v16, 0.0 }
 0x238   :  { %v1396_v33 = vcombine.high %v1340_v21, %v1340_v21  ;;  %v1403_v47 = vrot.slane %v1340_v21, %v5985_v10  ;;  %v1345_v53 = vcombine.high %v1337_v61, %v1337_v61  ;;  %v1352_v6 = vrot.slane %v1337_v61, %v5985_v10 }
 0x239   :  { %v1393_v58 = vrot.slane %v1379_v24, %v5985_v10  ;;  %v1394_v27 = vcombine.high %v1386_v31, %v1386_v31  ;;  %v1486_v12 = vsel %vm1429_vm5, %v1386_v31, -inf  ;;  %v1362_v4 = vcombine.high %v1338_v25, %v1338_v25 }
 0x23a   :  { %v1410_v37 = vrot.slane %v1396_v33, %v5985_v10  ;;  %v1411_v32 = vcombine.high %v1403_v47, %v1403_v47  ;;  %v1487_v26 = vrot.slane %v1486_v12, 4  ;;  %v1514_v3 = vsel %vm1429_vm5, %v1403_v47, -inf }
 0x23b   :  { %v1395_v57 = vcombine.high %v1393_v58, %v1393_v58  ;;  %v1493_v56 = vsel %vm1429_vm5, %v1394_v27, -inf  ;;  %v1500_v7 = vsel %vm1429_vm5, %v1393_v58, -inf  ;;  %v1515_v30 = vrot.slane %v1514_v3, 4 }
 0x23c   :  { %v1412_v28 = vcombine.high %v1410_v37, %v1410_v37  ;;  %v1488_v39 = vmax.f32 %v1486_v12, %v1487_v26  ;;  %v1494_v17 = vrot.slane %v1493_v56, 4  ;;  %v1501_v19 = vrot.slane %v1500_v7, 4 }
 0x23d   :  { %v1507_v60 = vsel %vm1429_vm5, %v1395_v57, -inf  ;;  %v1516_v2 = vmax.f32 %v1514_v3, %v1515_v30  ;;  %v1521_v40 = vsel %vm1429_vm5, %v1411_v32, -inf  ;;  %v1528_v1 = vsel %vm1429_vm5, %v1410_v37, -inf }
 0x23e   :  { %v1489_v48 = vrot.slane %v1488_v39, 2  ;;  %v1495_v38 = vmax.f32 %v1493_v56, %v1494_v17  ;;  %v1502_v45 = vmax.f32 %v1500_v7, %v1501_v19  ;;  %v1508_v41 = vrot.slane %v1507_v60, 4 }
 0x23f   :  { %v1517_v15 = vrot.slane %v1516_v2, 2  ;;  %v1522_v13 = vrot.slane %v1521_v40, 4  ;;  %v1529_v11 = vrot.slane %v1528_v1, 4  ;;  %v6421_v51 = vsel %vm1429_vm5, %v1412_v28, -inf }
 0x240   :  { %v1490_v46 = vmax.f32 %v1488_v39, %v1489_v48  ;;  %v1496_v5 = vrot.slane %v1495_v38, 2  ;;  %v1503_v59 = vrot.slane %v1502_v45, 2  ;;  %v1509_v9 = vmax.f32 %v1507_v60, %v1508_v41 }
 0x241   :  { %v1518_v62 = vmax.f32 %v1516_v2, %v1517_v15  ;;  %v1523_v43 = vmax.f32 %v1521_v40, %v1522_v13  ;;  %v6423_v23 = vmax.f32 %v1528_v1, %v1529_v11  ;;  %v1359_v36 = vrot.slane %v1345_v53, %v5985_v10 }
 0x242   :  { %v1491_v8 = vrot.slane %v1490_v46, 1  ;;  %v1497_v50 = vmax.f32 %v1495_v38, %v1496_v5  ;;  %v1504_v29 = vmax.f32 %v1502_v45, %v1503_v59  ;;  %v1510_v14 = vrot.slane %v1509_v9, 2 }
 0x243   :  { %v1519_v44 = vrot.slane %v1518_v62, 1  ;;  %v1524_v55 = vrot.slane %v1523_v43, 2  ;;  %v1536_v42 = vrot.slane %v6421_v51, 4  ;;  %v1360_v63 = vcombine.high %v1352_v6, %v1352_v6 }
 0x244   :  { %v1492_v52 = vmax.f32 %v1490_v46, %v1491_v8  ;;  %v1498_v34 = vrot.slane %v1497_v50, 1  ;;  %v1505_v49 = vrot.slane %v1504_v29, 1  ;;  %v1511_v18 = vmax.f32 %v1509_v9, %v1510_v14 }
 0x245   :  { %v6426_v35 = vmax.f32 %v1518_v62, %v1519_v44  ;;  %v1361_v31 = vcombine.high %v1359_v36, %v1359_v36  ;;  %v1369_v33 = vrot.slane %v1338_v25, %v5985_v10  ;;  %v1376_v47 = vrot.slane %v1362_v4, %v5985_v10 }
 0x246   :  { %v1499_v16 = vmax.f32 %v1497_v50, %v1498_v34  ;;  %v6429_v21 = vmax.f32 %v1504_v29, %v1505_v49  ;;  %v1512_v61 = vrot.slane %v1511_v18, 1  ;;  %v1578_v24 = vpack.c.bf16 %v1492_v52, %v1492_v52 }
 0x247   :  { %v1430_v58 = vsel %vm1429_vm5, %v1352_v6, -inf  ;;  %v6436_v12 = vmax.f32 %v1523_v43, %v1524_v55  ;;  %v1531_v53 = vrot.slane %v6423_v23, 2  ;;  %v1582_v37 = vpack.c.bf16 %v6426_v35, %v6426_v35 }
 0x248   :  { %v6434_v27 = vmax.f32 %v1511_v18, %v1512_v61  ;;  %v1579_v32 = vpack.c.bf16 %v1499_v16, %v1499_v16  ;;  %v1580_v26 = vpack.c.bf16 %v6429_v21, %v6429_v21  ;;  %v1377_v3 = vcombine.high %v1369_v33, %v1369_v33 }
 0x249   :  { %v1431_v57 = vrot.slane %v1430_v58, 4  ;;  %v6445_v56 = vunpack.c.l.b16 %v1578_v24  ;;  %v1378_v7 = vcombine.high %v1376_v47, %v1376_v47  ;;  %v1437_v30 = vsel %vm1429_vm5, %v1360_v63, -inf }
 0x24a   :  { %v1581_v25 = vpack.c.bf16 %v6434_v27, %v6434_v27  ;;  %v1438_v39 = vrot.slane %v1437_v30, 4  ;;  %v1444_v17 = vsel %vm1429_vm5, %v1359_v36, -inf  ;;  %v1451_v19 = vsel %vm1429_vm5, %v1361_v31, -inf }
 0x24b   :  { %v1432_v28 = vmax.f32 %v1430_v58, %v1431_v57  ;;  %v1445_v60 = vrot.slane %v1444_v17, 4  ;;  %v1452_v2 = vrot.slane %v1451_v19, 4  ;;  %v1458_v40 = vsel %vm1429_vm5, %v1369_v33, -inf }
 0x24c   :  { %v1465_v1 = vsel %vm1429_vm5, %v1377_v3, -inf  ;;  %v1439_v38 = vmax.f32 %v1437_v30, %v1438_v39  ;;  %v1459_v45 = vrot.slane %v1458_v40, 4  ;;  %v1472_v11 = vsel %vm1429_vm5, %v1376_v47, -inf }
 0x24d   :  { %v1433_v48 = vrot.slane %v1432_v28, 2  ;;  %v1466_v41 = vrot.slane %v1465_v1, 4  ;;  %v1446_v15 = vmax.f32 %v1444_v17, %v1445_v60  ;;  %v1453_v13 = vmax.f32 %v1451_v19, %v1452_v2 }
 0x24e   :  { %v1479_v6 = vsel %vm1429_vm5, %v1378_v7, -inf  ;;  %v1440_v5 = vrot.slane %v1439_v38, 2  ;;  %v1460_v59 = vmax.f32 %v1458_v40, %v1459_v45  ;;  %v1473_v4 = vrot.slane %v1472_v11, 4 }
 0x24f   :  { %v1434_v46 = vmax.f32 %v1432_v28, %v1433_v48  ;;  %v1467_v9 = vmax.f32 %v1465_v1, %v1466_v41  ;;  %v1447_v62 = vrot.slane %v1446_v15, 2  ;;  %v1454_v43 = vrot.slane %v1453_v13, 2 }
 0x250   :  { %v1480_v8 = vrot.slane %v1479_v6, 4  ;;  %v1441_v29 = vmax.f32 %v1439_v38, %v1440_v5  ;;  %v1461_v14 = vrot.slane %v1460_v59, 2  ;;  %v1474_v52 = vmax.f32 %v1472_v11, %v1473_v4 }
 0x251   :  { %v1435_v50 = vrot.slane %v1434_v46, 1  ;;  %v1468_v44 = vrot.slane %v1467_v9, 2  ;;  %v1448_v55 = vmax.f32 %v1446_v15, %v1447_v62  ;;  %v1455_v36 = vmax.f32 %v1453_v13, %v1454_v43 }
 0x252   :  { %v1481_v34 = vmax.f32 %v1479_v6, %v1480_v8  ;;  %v1442_v18 = vrot.slane %v1441_v29, 1  ;;  %v1462_v63 = vmax.f32 %v1460_v59, %v1461_v14  ;;  %v1475_v24 = vrot.slane %v1474_v52, 2 }
 0x253   :  { %v1436_v49 = vmax.f32 %v1434_v46, %v1435_v50  ;;  %v1469_v16 = vmax.f32 %v1467_v9, %v1468_v44  ;;  %v1449_v21 = vrot.slane %v1448_v55, 1  ;;  %v1456_v61 = vrot.slane %v1455_v36, 1 }
 0x254   :  { %v1482_v31 = vrot.slane %v1481_v34, 2  ;;  %v1627_v33 = vunpack.c.l.b16 %v1579_v32  ;;  %v1443_v47 = vmax.f32 %v1441_v29, %v1442_v18  ;;  %v1463_v58 = vrot.slane %v1462_v63, 1 }
 0x255   :  { %v1470_v3 = vrot.slane %v1469_v16, 1  ;;  %v1450_v57 = vmax.f32 %v1448_v55, %v1449_v21  ;;  %v1457_v7 = vmax.f32 %v1455_v36, %v1456_v61  ;;  %v1476_v30 = vmax.f32 %v1474_v52, %v1475_v24 }
 0x256   :  { %v1483_v28 = vmax.f32 %v1481_v34, %v1482_v31  ;;  %v1464_v39 = vmax.f32 %v1462_v63, %v1463_v58  ;;  %v1570_v17 = vpack.c.bf16 %v1436_v49, %v1436_v49  ;;  %v1571_v19 = vpack.c.bf16 %v1443_v47, %v1443_v47 }
 0x257   :  { %v1471_v60 = vmax.f32 %v1469_v16, %v1470_v3  ;;  %v1572_v2 = vpack.c.bf16 %v1450_v57, %v1450_v57  ;;  %v1573_v40 = vpack.c.bf16 %v1457_v7, %v1457_v7  ;;  %v1477_v1 = vrot.slane %v1476_v30, 1  ;;  %v5212_v3 = vld [vmem:[#allocation5 + $0x100] ss:$8 sps:$4 sm:$0xff]  }
 0x258   :  { %v1484_v48 = vrot.slane %v1483_v28, 1  ;;  %v1628_v38 = vunpack.c.l.b16 %v1580_v26  ;;  %v1574_v45 = vpack.c.bf16 %v1464_v39, %v1464_v39  ;;  %v1526_v41 = vrot.slane %v6436_v12, 1  ;;  %v5220_v39 = vld [vmem:[#allocation5 + $0x124] ss:$8 sps:$4 sm:$0xff]  }
 0x259   :  { %v1532_v32 = vmax.f32 %v6423_v23, %v1531_v53  ;;  %v1619_v15 = vunpack.c.l.b16 %v1571_v19  ;;  %v1478_v13 = vmax.f32 %v1476_v30, %v1477_v1  ;;  %v1537_v6 = vmax.f32 %v6421_v51, %v1536_v42  ;;  %v5217_v30 = vld [vmem:[#allocation5 + $0x114] ss:$8 sps:$4 sm:$0xff]  }
 0x25a   :  { %v1485_v11 = vmax.f32 %v1483_v28, %v1484_v48  ;;  %v1620_v46 = vunpack.c.l.b16 %v1572_v2  ;;  %v1527_v5 = vmax.f32 %v6436_v12, %v1526_v41  ;;  %v1575_v9 = vpack.c.bf16 %v1471_v60, %v1471_v60  ;;  %v5215_v28 = vld [vmem:[#allocation5 + $0x110] ss:$8 sps:$4 sm:$0xff]   ;;  %v5223_v19 = vld [vmem:[#allocation5 + $0x134] ss:$8 sps:$4 sm:$0xff]   ;;  %v5226_v2 = vld [vmem:[#allocation5 + $0x144] ss:$8 sps:$4 sm:$0xff]  }
 0x25b   :  { %v1533_v59 = vrot.slane %v1532_v32, 1  ;;  %v1618_v26 = vunpack.c.l.b16 %v1570_v17  ;;  %v1538_v62 = vrot.slane %v1537_v6, 2  ;;  %v1576_v43 = vpack.c.bf16 %v1478_v13, %v1478_v13  ;;  %v5218_v17 = vld [vmem:[#allocation5 + $0x120] ss:$8 sps:$4 sm:$0xff]   ;;  %v5221_v60 = vld [vmem:[#allocation5 + $0x130] ss:$8 sps:$4 sm:$0xff]  }
 0x25c   :  { %v1621_v4 = vunpack.c.l.b16 %v1573_v40  ;;  %v1577_v50 = vpack.c.bf16 %v1485_v11, %v1485_v11  ;;  %v1583_v29 = vpack.c.bf16 %v1527_v5, %v1527_v5  ;;  %v1629_v23 = vunpack.c.l.b16 %v1581_v25  ;;  %v5224_v40 = vld [vmem:[#allocation5 + $0x140] ss:$8 sps:$4 sm:$0xff]   ;;  %v5229_v1 = vld [vmem:[#allocation5 + $0x154] ss:$8 sps:$4 sm:$0xff]   ;;  %v5227_v48 = vld [vmem:[#allocation5 + $0x150] ss:$8 sps:$4 sm:$0xff]  }
 0x25d   :  { %v1534_v8 = vmax.f32 %v1532_v32, %v1533_v59  ;;  %v1630_v51 = vunpack.c.l.b16 %v1582_v37  ;;  %v1622_v42 = vunpack.c.l.b16 %v1574_v45  ;;  %v1539_v53 = vmax.f32 %v1537_v6, %v1538_v62  ;;  %v5235_v45 = vld [vmem:[#allocation5 + $0x174] ss:$8 sps:$4 sm:$0xff]   ;;  %v5233_v41 = vld [vmem:[#allocation5 + $0x170] ss:$8 sps:$4 sm:$0xff]  }
 0x25e   :  { %v1634_v12 = vsel %vm997_vm7, %v1619_v15, %v1618_v26  ;;  %v1623_v44 = vunpack.c.l.b16 %v1575_v9  ;;  %v1641_v36 = vsel %vm997_vm7, %v1627_v33, %v6445_v56  ;;  %v1624_v34 = vunpack.c.l.b16 %v1576_v43  ;;  %v5238_v32 = vld [vmem:[#allocation7 + $0x4] ss:$16 sps:$4 sm:$0xff]   ;;  %v5241_v15 = vld [vmem:[#allocation7 + $0xc] ss:$16 sps:$4 sm:$0xff]   ;;  %v5236_v13 = vld [vmem:[#allocation7] ss:$16 sps:$4 sm:$0xff]  }
 0x25f   :  { %v1584_v14 = vpack.c.bf16 %v1534_v8, %v1534_v8  ;;  %v1635_v55 = vsel %vm999_vm8, %v1620_v46, %v1634_v12  ;;  %v1540_v52 = vrot.slane %v1539_v53, 1  ;;  %v1642_v25 = vsel %vm999_vm8, %v1628_v38, %v1641_v36  ;;  %v5232_v38 = vld [vmem:[#allocation5 + $0x164] ss:$8 sps:$4 sm:$0xff]   ;;  %v5239_v11 = vld [vmem:[#allocation7 + $0x8] ss:$16 sps:$4 sm:$0xff]   ;;  %3943 = vmatprep.subr.bf16.mxu0 %v5238_v32 }
 0x260   :  { %v1636_v27 = vsel %vm1001_vm9, %v1621_v4, %v1635_v55  ;;  %v1625_v49 = vunpack.c.l.b16 %v1577_v50  ;;  %v1631_v35 = vunpack.c.l.b16 %v1583_v29  ;;  %v1643_v18 = vsel %vm1001_vm9, %v1629_v23, %v1642_v25  ;;  %v5244_v6 = vld [vmem:[#allocation7 + $0x24] ss:$16 sps:$4 sm:$0xff]   ;;  %v5242_v46 = vld [vmem:[#allocation7 + $0x20] ss:$16 sps:$4 sm:$0xff]   ;;  %v5245_v5 = vld [vmem:[#allocation7 + $0x28] ss:$16 sps:$4 sm:$0xff]  }
 0x261   :  { %v1637_v37 = vsel %vm1003_vm10, %v1622_v42, %v1636_v27  ;;  %v1541_v63 = vmax.f32 %v1539_v53, %v1540_v52  ;;  %v1632_v16 = vunpack.c.l.b16 %v1584_v14  ;;  %v1644_v61 = vsel %vm1003_vm10, %v1630_v51, %v1643_v18  ;;  %v5247_v59 = vld [vmem:[#allocation7 + $0x2c] ss:$16 sps:$4 sm:$0xff]   ;;  %v5250_v9 = vld [vmem:[#allocation7 + $0x44] ss:$16 sps:$4 sm:$0xff]   ;;  %v5248_v62 = vld [vmem:[#allocation7 + $0x40] ss:$16 sps:$4 sm:$0xff]  }
 0x262   :  { %v1638_v21 = vsel %vm1005_vm11, %v1623_v44, %v1637_v37  ;;  %v1645_v24 = vsel %vm1005_vm11, %v1631_v35, %v1644_v61  ;;  %v5253_v26 = vld [vmem:[#allocation7 + $0x4c] ss:$16 sps:$4 sm:$0xff]   ;;  %v5251_v43 = vld [vmem:[#allocation7 + $0x48] ss:$16 sps:$4 sm:$0xff]   ;;  %v5256_v4 = vld [vmem:[#allocation7 + $0x64] ss:$16 sps:$4 sm:$0xff]  }
 0x263   :  { %v1639_v56 = vsel %vm1007_vm12, %v1624_v34, %v1638_v21  ;;  %v1585_v31 = vpack.c.bf16 %v1541_v63, %v1541_v63  ;;  %v1646_v47 = vsel %vm1007_vm12, %v1632_v16, %v1645_v24  ;;  %v5259_v8 = vld [vmem:[#allocation7 + $0x6c] ss:$16 sps:$4 sm:$0xff]   ;;  %v5254_v50 = vld [vmem:[#allocation7 + $0x60] ss:$16 sps:$4 sm:$0xff]   ;;  %v5257_v29 = vld [vmem:[#allocation7 + $0x68] ss:$16 sps:$4 sm:$0xff]  }
 0x264   :  { %v1640_v33 = vsel %vm1009_vm13, %v1625_v49, %v1639_v56  ;;  %v5262_v23 = vld [vmem:[#allocation7 + $0x84] ss:$16 sps:$4 sm:$0xff]   ;;  %v5265_v51 = vld [vmem:[#allocation7 + $0x8c] ss:$16 sps:$4 sm:$0xff]   ;;  %v5260_v42 = vld [vmem:[#allocation7 + $0x80] ss:$16 sps:$4 sm:$0xff]  }
 0x265   :  { %v1633_v58 = vunpack.c.l.b16 %v1585_v31  ;;  %v5263_v53 = vld [vmem:[#allocation7 + $0x88] ss:$16 sps:$4 sm:$0xff]   ;;  %v5268_v12 = vld [vmem:[#allocation7 + $0xa4] ss:$16 sps:$4 sm:$0xff]   ;;  %v5271_v14 = vld [vmem:[#allocation7 + $0xac] ss:$16 sps:$4 sm:$0xff]  }
 0x266   :  { %v5266_v44 = vld [vmem:[#allocation7 + $0xa0] ss:$16 sps:$4 sm:$0xff]   ;;  %v5269_v55 = vld [vmem:[#allocation7 + $0xa8] ss:$16 sps:$4 sm:$0xff]   ;;  %v5274_v36 = vld [vmem:[#allocation7 + $0xc4] ss:$16 sps:$4 sm:$0xff]  }
 0x267   :  { %v1647_v57 = vsel %vm1009_vm13, %v1633_v58, %v1646_v47  ;;  %v5277_v52 = vld [vmem:[#allocation7 + $0xcc] ss:$16 sps:$4 sm:$0xff]   ;;  %v5272_v34 = vld [vmem:[#allocation7 + $0xc0] ss:$16 sps:$4 sm:$0xff]   ;;  %v5275_v27 = vld [vmem:[#allocation7 + $0xc8] ss:$16 sps:$4 sm:$0xff]  }
 0x268   :  { %v1648_v7 = vpack.c.b16 %v1647_v57, %v1640_v33  ;;  %v5280_v25 = vld [vmem:[#allocation7 + $0xe4] ss:$16 sps:$4 sm:$0xff]   ;;  %v5283_v49 = vld [vmem:[#allocation7 + $0xec] ss:$16 sps:$4 sm:$0xff]   ;;  %v5278_v35 = vld [vmem:[#allocation7 + $0xe0] ss:$16 sps:$4 sm:$0xff]  }
 0x269   :  { %v5281_v37 = vld [vmem:[#allocation7 + $0xe8] ss:$16 sps:$4 sm:$0xff]   ;;  %v5286_v18 = vld [vmem:[#allocation7 + $0x104] ss:$16 sps:$4 sm:$0xff]   ;;  %v5289_v63 = vld [vmem:[#allocation7 + $0x10c] ss:$16 sps:$4 sm:$0xff]  }
 0x26a   :  { %1763 = vmatmul.mubr.bf16.vlgmr.msra.gmra.mrb[4].mxu1 %v1648_v7  ;;  %1903 = vmatmul.mubr.bf16.vlgmr.msra.gmra.mrb[8].mxu0 %v1648_v7  ;;  %v5284_v16 = vld [vmem:[#allocation7 + $0x100] ss:$16 sps:$4 sm:$0xff]   ;;  %v5287_v21 = vld [vmem:[#allocation7 + $0x108] ss:$16 sps:$4 sm:$0xff]   ;;  %v5292_v61 = vld [vmem:[#allocation7 + $0x124] ss:$16 sps:$4 sm:$0xff]  }
 0x26b   :  { %2011 = vmatpush1.bf16.msra.mxu1 %v5212_v3  ;;  %2042 = vmatprep.mubr.bf16.mxu1 %v6663_v54  ;;  %v5230_v54 = vld [vmem:[#allocation5 + $0x160] ss:$8 sps:$4 sm:$0xff]   ;;  %v5295_v56 = vld [vmem:[#allocation7 + $0x12c] ss:$16 sps:$4 sm:$0xff]   ;;  %v5298_v33 = vld [vmem:[#allocation7 + $0x144] ss:$16 sps:$4 sm:$0xff]  }
 0x26c   :  { %2012 = vmatprep.subr.bf16.mxu1 %v5217_v30  ;;  %3944 = vmatpush1.bf16.msra.mxu0 %v5236_v13  ;;  %v5290_v24 = vld [vmem:[#allocation7 + $0x120] ss:$16 sps:$4 sm:$0xff]   ;;  %v5293_v31 = vld [vmem:[#allocation7 + $0x128] ss:$16 sps:$4 sm:$0xff]   ;;  %v5301_v47 = vld [vmem:[#allocation7 + $0x14c] ss:$16 sps:$4 sm:$0xff]  }
 0x26d   :  { %3945 = vmatprep.subr.bf16.mxu0 %v5244_v6  ;;  %v5296_v58 = vld [vmem:[#allocation7 + $0x140] ss:$16 sps:$4 sm:$0xff]   ;;  %v5299_v3 = vld [vmem:[#allocation7 + $0x148] ss:$16 sps:$4 sm:$0xff]   ;;  %v5304_v57 = vld [vmem:[#allocation7 + $0x164] ss:$16 sps:$4 sm:$0xff]  }
 0x26e   :  { %v5302_v30 = vld [vmem:[#allocation7 + $0x160] ss:$16 sps:$4 sm:$0xff]   ;;  %v5328_v32 = vld [vmem:[#allocation7 + $0x1e4] ss:$16 sps:$4 sm:$0xff]  }
 0x26f   :  { %2013 = vmatpush1.bf16.msra.mxu1 %v5215_v28  ;;  %v5305_v28 = vld [vmem:[#allocation7 + $0x168] ss:$16 sps:$4 sm:$0xff]   ;;  %v5326_v13 = vld [vmem:[#allocation7 + $0x1e0] ss:$16 sps:$4 sm:$0xff]   ;;  %v5334_v6 = vld [vmem:[#allocation7 + $0x204] ss:$16 sps:$4 sm:$0xff]  }
 0x270   :  { %2014 = vmatprep.subr.bf16.mxu1 %v5220_v39  ;;  %3946 = vmatpush1.bf16.msra.mxu0 %v5242_v46  ;;  %v5310_v39 = vld [vmem:[#allocation7 + $0x184] ss:$16 sps:$4 sm:$0xff]   ;;  %v5337_v46 = vld [vmem:[#allocation7 + $0x20c] ss:$16 sps:$4 sm:$0xff]  }
 0x271   :  { %3947 = vmatprep.subr.bf16.mxu0 %v5250_v9 }
 0x273   :  { %2015 = vmatpush1.bf16.msra.mxu1 %v5218_v17  ;;  %v5313_v17 = vld [vmem:[#allocation7 + $0x18c] ss:$16 sps:$4 sm:$0xff]  }
 0x274   :  { %2016 = vmatprep.subr.bf16.mxu1 %v5223_v19  ;;  %3948 = vmatpush1.bf16.msra.mxu0 %v5248_v62  ;;  %v5308_v19 = vld [vmem:[#allocation7 + $0x180] ss:$16 sps:$4 sm:$0xff]  }
 0x275   :  { %3949 = vmatprep.subr.bf16.mxu0 %v5256_v4 }
 0x277   :  { %2017 = vmatpush1.bf16.msra.mxu1 %v5221_v60  ;;  %v5311_v60 = vld [vmem:[#allocation7 + $0x188] ss:$16 sps:$4 sm:$0xff]  }
 0x278   :  { %2018 = vmatprep.subr.bf16.mxu1 %v5226_v2  ;;  %3950 = vmatpush1.bf16.msra.mxu0 %v5254_v50  ;;  %v5316_v2 = vld [vmem:[#allocation7 + $0x1a4] ss:$16 sps:$4 sm:$0xff]  }
 0x279   :  { %3951 = vmatprep.subr.bf16.mxu0 %v5262_v23 }
 0x27b   :  { %2019 = vmatpush1.bf16.msra.mxu1 %v5224_v40  ;;  %v5319_v40 = vld [vmem:[#allocation7 + $0x1ac] ss:$16 sps:$4 sm:$0xff]  }
 0x27c   :  { %2020 = vmatprep.subr.bf16.mxu1 %v5229_v1  ;;  %3952 = vmatpush1.bf16.msra.mxu0 %v5260_v42  ;;  %v5314_v1 = vld [vmem:[#allocation7 + $0x1a0] ss:$16 sps:$4 sm:$0xff]  }
 0x27d   :  { %3953 = vmatprep.subr.bf16.mxu0 %v5268_v12 }
 0x27f   :  { %2021 = vmatpush1.bf16.msra.mxu1 %v5227_v48  ;;  %v5317_v48 = vld [vmem:[#allocation7 + $0x1a8] ss:$16 sps:$4 sm:$0xff]  }
 0x280   :  { %2022 = vmatprep.subr.bf16.mxu1 %v5232_v38  ;;  %3954 = vmatpush1.bf16.msra.mxu0 %v5266_v44  ;;  %v5322_v38 = vld [vmem:[#allocation7 + $0x1c4] ss:$16 sps:$4 sm:$0xff]  }
 0x281   :  { %3955 = vmatprep.subr.bf16.mxu0 %v5274_v36 }
 0x283   :  { %2023 = vmatpush1.bf16.msra.mxu1 %v5230_v54  ;;  %v5325_v54 = vld [vmem:[#allocation7 + $0x1cc] ss:$16 sps:$4 sm:$0xff]  }
 0x284   :  { %2024 = vmatprep.subr.bf16.mxu1 %v5235_v45  ;;  %3956 = vmatpush1.bf16.msra.mxu0 %v5272_v34  ;;  %v5320_v45 = vld [vmem:[#allocation7 + $0x1c0] ss:$16 sps:$4 sm:$0xff]  }
 0x285   :  { %3957 = vmatprep.subr.bf16.mxu0 %v5280_v25 }
 0x287   :  { %2025 = vmatpush1.bf16.msra.mxu1 %v5233_v41  ;;  %v5323_v41 = vld [vmem:[#allocation7 + $0x1c8] ss:$16 sps:$4 sm:$0xff]  }
 0x288   :  { %4107 = vmatprep.subr.bf16.mxu1 %v5241_v15  ;;  %3958 = vmatpush1.bf16.msra.mxu0 %v5278_v35  ;;  %v5331_v15 = vld [vmem:[#allocation7 + $0x1ec] ss:$16 sps:$4 sm:$0xff]  }
 0x289   :  { %3959 = vmatprep.subr.bf16.mxu0 %v5286_v18 }
 0x28a   :  { %2043 = vmatmul.mubr.bf16.vlgmr.msra.gmra.mrb[8].mxu1 %v1648_v7  ;;  %v5307_v7 = vld [vmem:[#allocation7 + $0x16c] ss:$16 sps:$4 sm:$0xff]  }
 0x28b   :  { %4108 = vmatpush1.bf16.msra.mxu1 %v5239_v11  ;;  %v5329_v11 = vld [vmem:[#allocation7 + $0x1e8] ss:$16 sps:$4 sm:$0xff]  }
 0x28c   :  { %4109 = vmatprep.subr.bf16.mxu1 %v5247_v59  ;;  %3960 = vmatpush1.bf16.msra.mxu0 %v5284_v16  ;;  %v1553_v59 = vand.u32 7, %v6393_v0 }
 0x28d   :  { %3961 = vmatprep.subr.bf16.mxu0 %v5292_v61 }
 0x28e   :  { %vm6490_vm8 = vcmp.eq.s32.totalorder %v1553_v59, 0 }
 0x28f   :  { %4110 = vmatpush1.bf16.msra.mxu1 %v5245_v5  ;;  %v1546_v5 = vand.u32 7, %v5912_v20 }
 0x290   :  { %4111 = vmatprep.subr.bf16.mxu1 %v5253_v26  ;;  %3962 = vmatpush1.bf16.msra.mxu0 %v5290_v24 }
 0x291   :  { %3963 = vmatprep.subr.bf16.mxu0 %v5298_v33  ;;  %vm6486_vm6 = vcmp.eq.s32.totalorder %v1546_v5, 0  ;;  %vm6518_vm9 = vcmp.eq.s32.totalorder %v1546_v5, 7 }
 0x293   :  { %4112 = vmatpush1.bf16.msra.mxu1 %v5251_v43 }
 0x294   :  { %4113 = vmatprep.subr.bf16.mxu1 %v5259_v8  ;;  %3964 = vmatpush1.bf16.msra.mxu0 %v5296_v58 }
 0x295   :  { %3965 = vmatprep.subr.bf16.mxu0 %v5304_v57 }
 0x297   :  { %4114 = vmatpush1.bf16.msra.mxu1 %v5257_v29 }
 0x298   :  { %4115 = vmatprep.subr.bf16.mxu1 %v5265_v51  ;;  %3966 = vmatpush1.bf16.msra.mxu0 %v5302_v30 }
 0x299   :  { %3967 = vmatprep.subr.bf16.mxu0 %v5310_v39 }
 0x29b   :  { %4116 = vmatpush1.bf16.msra.mxu1 %v5263_v53 }
 0x29c   :  { %4117 = vmatprep.subr.bf16.mxu1 %v5271_v14  ;;  %3968 = vmatpush1.bf16.msra.mxu0 %v5308_v19 }
 0x29d   :  { %3969 = vmatprep.subr.bf16.mxu0 %v5316_v2 }
 0x29f   :  { %4118 = vmatpush1.bf16.msra.mxu1 %v5269_v55 }
 0x2a0   :  { %4119 = vmatprep.subr.bf16.mxu1 %v5277_v52  ;;  %3970 = vmatpush1.bf16.msra.mxu0 %v5314_v1 }
 0x2a1   :  { %3971 = vmatprep.subr.bf16.mxu0 %v5322_v38 }
 0x2a3   :  { %4120 = vmatpush1.bf16.msra.mxu1 %v5275_v27 }
 0x2a4   :  { %4121 = vmatprep.subr.bf16.mxu1 %v5283_v49  ;;  %3972 = vmatpush1.bf16.msra.mxu0 %v5320_v45 }
 0x2a5   :  { %3973 = vmatprep.subr.bf16.mxu0 %v5328_v32 }
 0x2a7   :  { %4122 = vmatpush1.bf16.msra.mxu1 %v5281_v37 }
 0x2a8   :  { %4123 = vmatprep.subr.bf16.mxu1 %v5289_v63  ;;  %3974 = vmatpush1.bf16.msra.mxu0 %v5326_v13 }
 0x2a9   :  { %3984 = vmatprep.subr.bf16.mxu0 %v5334_v6 }
 0x2ab   :  { %4124 = vmatpush1.bf16.msra.mxu1 %v5287_v21  ;;  %v2101_v21 = vsub.s32 1, %v5912_v20 }
 0x2ac   :  { %4125 = vmatprep.subr.bf16.mxu1 %v5295_v56  ;;  %v2093_v56 = vld [vmem:[%s6641_s6] sm:$0x3] }
 0x2ad   :  { %v2102_v39 = vrot.slane %v2093_v56, %v2101_v21 }
 0x2af   :  { %4126 = vmatpush1.bf16.msra.mxu1 %v5293_v31 }
 0x2b0   :  { %4127 = vmatprep.subr.bf16.mxu1 %v5301_v47 }
 0x2b3   :  { %4128 = vmatpush1.bf16.msra.mxu1 %v5299_v3 }
 0x2b4   :  { %4129 = vmatprep.subr.bf16.mxu1 %v5307_v7 }
 0x2b7   :  { %4130 = vmatpush1.bf16.msra.mxu1 %v5305_v28  ;;  %v2098_v28 = vrot.slane %v2093_v56, %v5918_v22 }
 0x2b8   :  { %4131 = vmatprep.subr.bf16.mxu1 %v5313_v17 }
 0x2bb   :  { %4132 = vmatpush1.bf16.msra.mxu1 %v5311_v60 }
 0x2bc   :  { %4133 = vmatprep.subr.bf16.mxu1 %v5319_v40 }
 0x2bf   :  { %4134 = vmatpush1.bf16.msra.mxu1 %v5317_v48 }
 0x2c0   :  { %4135 = vmatprep.subr.bf16.mxu1 %v5325_v54 }
 0x2c3   :  { %4136 = vmatpush1.bf16.msra.mxu1 %v5323_v41 }
 0x2c4   :  { %4137 = vmatprep.subr.bf16.mxu1 %v5331_v15 }
 0x2c7   :  { %4138 = vmatpush1.bf16.msra.mxu1 %v5329_v11 }
 0x2c8   :  { %4148 = vmatprep.subr.bf16.mxu1 %v5337_v46 }
 0x33d   :  { %v1764_v9 = vpop.f32.mrb[4].mxu1  ;;  %v1904_v26 = vpop.f32.mrb[8].mxu0 }
 0x33e   :  { %v1766_v62 = vpop.f32.mrb[5].mxu1  ;;  %v1906_v43 = vpop.f32.mrb[9].mxu0  ;;  %v2053_v50 = vrot.slane %v1764_v9, 7 }
 0x33f   :  { %v1768_v4 = vpop.f32.mrb[6].mxu1  ;;  %v1908_v8 = vpop.f32.mrb[10].mxu0  ;;  %v2054_v12 = vrot.slane %v1766_v62, 7 }
 0x340   :  { %v2055_v23 = vrot.slane %v1768_v4, 7  ;;  %v1770_v42 = vpop.f32.mrb[7].mxu1  ;;  %v1910_v53 = vpop.f32.mrb[11].mxu0 }
 0x341   :  { %v2056_v0 = vrot.slane %v1770_v42, 7 }
 0x342   :  { %v2059_v14 = vsel %vm323_vm0, %v2055_v23, %v2053_v50  ;;  %v2057_v44 = vsel %vm323_vm0, %v2053_v50, %v2055_v23 }
 0x343   :  { %v2065_v55 = vsel %vm6486_vm6, 0.0, %v2059_v14  ;;  %v2067_v36 = vsel %vm6490_vm8, 0.0, %v2057_v44  ;;  %v2060_v52 = vsel %vm323_vm0, %v2056_v0, %v2054_v12  ;;  %v2058_v34 = vsel %vm323_vm0, %v2054_v12, %v2056_v0 }
 0x344   :  { %v2069_v27 = vadd.f32 %v2065_v55, %v1904_v26  ;;  %v2071_v25 = vadd.f32 %v2067_v36, %v1908_v8  ;;  %v2066_v49 = vsel %vm6486_vm6, 0.0, %v2060_v52  ;;  %v2068_v35 = vsel %vm6490_vm8, 0.0, %v2058_v34 }
 0x345   :  { %v2070_v37 = vadd.f32 %v2066_v49, %v1906_v43  ;;  %v2072_v18 = vadd.f32 %v2068_v35, %v1910_v53  ;;  %vm6514_vm0 = vcmp.eq.s32.totalorder %v1553_v59, 7 }
 0x35d   :  { %v2044_v63 = vpop.f32.mrb[8].mxu1 }
 0x35e   :  { %v2046_v16 = vpop.f32.mrb[9].mxu1  ;;  %v2073_v31 = vrot.slane %v2044_v63, 1 }
 0x35f   :  { %v2048_v61 = vpop.f32.mrb[10].mxu1  ;;  %v2074_v3 = vrot.slane %v2046_v16, 1 }
 0x360   :  { %v2075_v47 = vrot.slane %v2048_v61, 1  ;;  %v2050_v58 = vpop.f32.mrb[11].mxu1 }
 0x361   :  { %v2076_v57 = vrot.slane %v2050_v58, 1 }
 0x362   :  { %v2077_v7 = vsel %vm372_vm1, %v2073_v31, %v2075_v47  ;;  %v2079_v30 = vsel %vm372_vm1, %v2075_v47, %v2073_v31 }
 0x363   :  { %v2085_v17 = vsel %vm6518_vm9, 0.0, %v2077_v7  ;;  %v2087_v19 = vsel %vm6514_vm0, 0.0, %v2079_v30  ;;  %v2078_v60 = vsel %vm372_vm1, %v2074_v3, %v2076_v57  ;;  %v2080_v2 = vsel %vm372_vm1, %v2076_v57, %v2074_v3 }
 0x364   :  { %v2089_v40 = vadd.f32 %v2085_v17, %v2069_v27  ;;  %v2091_v1 = vadd.f32 %v2087_v19, %v2071_v25  ;;  %v2086_v48 = vsel %vm6518_vm9, 0.0, %v2078_v60  ;;  %v2088_v38 = vsel %vm6514_vm0, 0.0, %v2080_v2 }
 0x365   :  { %v2090_v54 = vadd.f32 %v2086_v48, %v2070_v37  ;;  %v2092_v45 = vadd.f32 %v2088_v38, %v2072_v18  ;;  %vm4642_vm1 = vcmask 1024  }
 0x366   :  { %v2105_v41 = vadd.f32 %v2098_v28, %v2089_v40  ;;  %v2107_v32 = vadd.f32 %v2098_v28, %v2091_v1 }
 0x367   :  { %v2106_v15 = vadd.f32 %v2102_v39, %v2090_v54  ;;  %v2108_v13 = vadd.f32 %v2102_v39, %v2092_v45 }
 0x368   :  { %v2109_v11 = vmax.f32 %v2105_v41, 0.0  ;;  %v2111_v6 = vmax.f32 %v2107_v32, 0.0 }
 0x369   :  { %v2110_v46 = vmax.f32 %v2106_v15, 0.0  ;;  %v2112_v5 = vmax.f32 %v2108_v13, 0.0 }
 0x36b   :  { %v2117_v59 = vcombine.low %v2109_v11, %v2110_v46  ;;  %v2118_v9 = vcombine.high %v2109_v11, %v2110_v46  ;;  %v2135_v26 = vcombine.low %v2111_v6, %v2112_v5  ;;  %v2136_v62 = vcombine.high %v2111_v6, %v2112_v5 }
 0x36d   :  { %v2125_v43 = vrot.slane %v2117_v59, %v5985_v10  ;;  %v2132_v4 = vrot.slane %v2118_v9, %v5985_v10  ;;  %v2143_v8 = vrot.slane %v2135_v26, %v5985_v10  ;;  %v2150_v50 = vrot.slane %v2136_v62, %v5985_v10 }
 0x36f   :  { %v2133_v29 = vcombine.high %v2125_v43, %v2125_v43  ;;  %v2134_v23 = vcombine.high %v2132_v4, %v2132_v4  ;;  %v2151_v51 = vcombine.high %v2143_v8, %v2143_v8  ;;  %v2152_v42 = vcombine.high %v2150_v50, %v2150_v50 }
 0x370   :  { %v2159_v53 = vrot.slane %v2125_v43, %v5985_v10  ;;  %v6547_v12 = vrot.slane %v2132_v4, %v5985_v10  ;;  %v2191_v0 = vrot.slane %v2143_v8, %v5985_v10  ;;  %v6551_v14 = vrot.slane %v2150_v50, %v5985_v10 }
 0x371   :  { %v2167_v44 = vrot.slane %v2133_v29, %v5985_v10  ;;  %v6555_v55 = vrot.slane %v2134_v23, %v5985_v10  ;;  %v2199_v36 = vrot.slane %v2151_v51, %v5985_v10  ;;  %v6559_v52 = vrot.slane %v2152_v42, %v5985_v10 }
 0x372   :  { %v2160_v34 = vcombine.high %v2159_v53, %v2159_v53  ;;  %v2192_v27 = vcombine.high %v2191_v0, %v2191_v0  ;;  %v2233_v25 = vsel %vm1429_vm5, %v2159_v53, -inf  ;;  %v2289_v49 = vsel %vm1429_vm5, %v2191_v0, -inf }
 0x373   :  { %v2234_v35 = vrot.slane %v2233_v25, 4  ;;  %v2290_v37 = vrot.slane %v2289_v49, 4  ;;  %v2168_v18 = vcombine.high %v2167_v44, %v2167_v44  ;;  %v2200_v63 = vcombine.high %v2199_v36, %v2199_v36 }
 0x374   :  { %v2240_v16 = vsel %vm1429_vm5, %v2160_v34, -inf  ;;  %v2296_v61 = vsel %vm1429_vm5, %v2192_v27, -inf  ;;  %v2247_v56 = vsel %vm1429_vm5, %v2167_v44, -inf  ;;  %v2303_v24 = vsel %vm1429_vm5, %v2199_v36, -inf }
 0x375   :  { %v2241_v10 = vrot.slane %v2240_v16, 4  ;;  %v2297_v31 = vrot.slane %v2296_v61, 4  ;;  %v2235_v33 = vmax.f32 %v2233_v25, %v2234_v35  ;;  %v2291_v47 = vmax.f32 %v2289_v49, %v2290_v37 }
 0x376   :  { %v2254_v58 = vsel %vm1429_vm5, %v2168_v18, -inf  ;;  %v2310_v3 = vsel %vm1429_vm5, %v2200_v63, -inf  ;;  %v2248_v57 = vrot.slane %v2247_v56, 4  ;;  %v2304_v7 = vrot.slane %v2303_v24, 4 }
 0x377   :  { %v2242_v30 = vmax.f32 %v2240_v16, %v2241_v10  ;;  %v2298_v28 = vmax.f32 %v2296_v61, %v2297_v31  ;;  %v2236_v39 = vrot.slane %v2235_v33, 2  ;;  %v2292_v17 = vrot.slane %v2291_v47, 2  ;;  %v5332_v16 = vld [vmem:[#allocation7 + $0x200] ss:$16 sps:$4 sm:$0xff]   ;;  %v5335_v61 = vld [vmem:[#allocation7 + $0x208] ss:$16 sps:$4 sm:$0xff]  }
 0x378   :  { %v2255_v19 = vrot.slane %v2254_v58, 4  ;;  %v2311_v60 = vrot.slane %v2310_v3, 4  ;;  %v2249_v2 = vmax.f32 %v2247_v56, %v2248_v57  ;;  %v2305_v40 = vmax.f32 %v2303_v24, %v2304_v7  ;;  %v5340_v57 = vld [vmem:[#allocation7 + $0x224] ss:$16 sps:$4 sm:$0xff]   ;;  %v5343_v7 = vld [vmem:[#allocation7 + $0x22c] ss:$16 sps:$4 sm:$0xff]  }
 0x379   :  { %v2243_v1 = vrot.slane %v2242_v30, 2  ;;  %v2299_v48 = vrot.slane %v2298_v28, 2  ;;  %v2237_v38 = vmax.f32 %v2235_v33, %v2236_v39  ;;  %v2293_v54 = vmax.f32 %v2291_v47, %v2292_v17 }
 0x37a   :  { %v2256_v45 = vmax.f32 %v2254_v58, %v2255_v19  ;;  %v2312_v41 = vmax.f32 %v2310_v3, %v2311_v60  ;;  %v2250_v32 = vrot.slane %v2249_v2, 2  ;;  %v2306_v15 = vrot.slane %v2305_v40, 2 }
 0x37b   :  { %v2244_v13 = vmax.f32 %v2242_v30, %v2243_v1  ;;  %v2300_v11 = vmax.f32 %v2298_v28, %v2299_v48  ;;  %v2238_v6 = vrot.slane %v2237_v38, 1  ;;  %v2294_v46 = vrot.slane %v2293_v54, 1 }
 0x37c   :  { %v2257_v5 = vrot.slane %v2256_v45, 2  ;;  %v2313_v59 = vrot.slane %v2312_v41, 2  ;;  %v2251_v9 = vmax.f32 %v2249_v2, %v2250_v32  ;;  %v2307_v26 = vmax.f32 %v2305_v40, %v2306_v15 }
 0x37d   :  { %v2245_v62 = vrot.slane %v2244_v13, 1  ;;  %v2301_v43 = vrot.slane %v2300_v11, 1  ;;  %v2239_v4 = vmax.f32 %v2237_v38, %v2238_v6  ;;  %v2295_v8 = vmax.f32 %v2293_v54, %v2294_v46  ;;  %v5346_v38 = vld [vmem:[#allocation7 + $0x244] ss:$16 sps:$4 sm:$0xff]   ;;  %v5349_v54 = vld [vmem:[#allocation7 + $0x24c] ss:$16 sps:$4 sm:$0xff]  }
 0x37e   :  { %v2258_v50 = vmax.f32 %v2256_v45, %v2257_v5  ;;  %v2314_v29 = vmax.f32 %v2312_v41, %v2313_v59  ;;  %v2252_v23 = vrot.slane %v2251_v9, 1  ;;  %v2308_v51 = vrot.slane %v2307_v26, 1 }
 0x37f   :  { %v2246_v42 = vmax.f32 %v2244_v13, %v2245_v62  ;;  %v2302_v53 = vmax.f32 %v2300_v11, %v2301_v43  ;;  %v2349_v0 = vsel %vm997_vm7, %v2295_v8, %v2239_v4  ;;  %v2176_v44 = vcombine.high %v6547_v12, %v6547_v12  ;;  %v5347_v62 = vld [vmem:[#allocation7 + $0x248] ss:$16 sps:$4 sm:$0xff]  }
 0x380   :  { %v2377_v36 = vpack.c.bf16 %v2349_v0, %v2349_v0  ;;  %v2259_v34 = vrot.slane %v2258_v50, 1  ;;  %v2315_v27 = vrot.slane %v2314_v29, 1  ;;  %v2253_v25 = vmax.f32 %v2251_v9, %v2252_v23  ;;  %v5355_v23 = vld [vmem:[#allocation7 + $0x26c] ss:$16 sps:$4 sm:$0xff]  }
 0x381   :  { %v2350_v49 = vsel %vm997_vm7, %v2302_v53, %v2246_v42  ;;  %v2309_v35 = vmax.f32 %v2307_v26, %v2308_v51  ;;  %v2208_v37 = vcombine.high %v6551_v14, %v6551_v14  ;;  %v2268_v18 = vsel %vm1429_vm5, %v2176_v44, -inf  ;;  %v5344_v26 = vld [vmem:[#allocation7 + $0x240] ss:$16 sps:$4 sm:$0xff]  }
 0x382   :  { %v2378_v63 = vpack.c.bf16 %v2350_v49, %v2350_v49  ;;  %v2260_v56 = vmax.f32 %v2258_v50, %v2259_v34  ;;  %v2316_v24 = vmax.f32 %v2314_v29, %v2315_v27  ;;  %v2269_v10 = vrot.slane %v2268_v18, 4  ;;  %v5352_v29 = vld [vmem:[#allocation7 + $0x264] ss:$16 sps:$4 sm:$0xff]  }
 0x383   :  { %v6577_v31 = vsel %vm997_vm7, %v2309_v35, %v2253_v25  ;;  %v2324_v33 = vsel %vm1429_vm5, %v2208_v37, -inf  ;;  %v2261_v47 = vsel %vm1429_vm5, %v6547_v12, -inf  ;;  %v2317_v58 = vsel %vm1429_vm5, %v6551_v14, -inf  ;;  %v5338_v12 = vld [vmem:[#allocation7 + $0x220] ss:$16 sps:$4 sm:$0xff]  }
 0x384   :  { %3975 = vmatprep.mubr.bf16.mxu0 %v2378_v63  ;;  %4139 = vmatprep.mubr.bf16.mxu1 %v2378_v63  ;;  %v2358_v3 = vsel %vm997_vm7, %v2316_v24, %v2260_v56  ;;  %v2270_v30 = vmax.f32 %v2268_v18, %v2269_v10  ;;  %v2325_v28 = vrot.slane %v2324_v33, 4  ;;  %v2262_v17 = vrot.slane %v2261_v47, 4  ;;  %v5341_v14 = vld [vmem:[#allocation7 + $0x228] ss:$16 sps:$4 sm:$0xff]   ;;  %v5350_v37 = vld [vmem:[#allocation7 + $0x260] ss:$16 sps:$4 sm:$0xff]  }
 0x385   :  { %3976 = vmatmul.mubr.bf16.vlgmr.msra.gmra.mrb[12].mxu0 %v2377_v36  ;;  %4140 = vmatmul.mubr.bf16.vlgmr.msra.gmra.mrb[12].mxu1 %v2377_v36  ;;  %v2380_v39 = vpack.c.bf16 %v2358_v3, %v2358_v3  ;;  %v2318_v19 = vrot.slane %v2317_v58, 4  ;;  %v2184_v60 = vcombine.high %v6555_v55, %v6555_v55  ;;  %v2216_v1 = vcombine.high %v6559_v52, %v6559_v52  ;;  %v5353_v18 = vld [vmem:[#allocation7 + $0x268] ss:$16 sps:$4 sm:$0xff]   ;;  %v5361_v56 = vld [vmem:[#allocation7 + $0x28c] ss:$16 sps:$4 sm:$0xff]  }
 0x386   :  { %3985 = vmatpush1.bf16.msra.mxu0 %v5332_v16  ;;  %4149 = vmatpush1.bf16.msra.mxu1 %v5335_v61  ;;  %v2271_v2 = vrot.slane %v2270_v30, 2  ;;  %v2326_v40 = vmax.f32 %v2324_v33, %v2325_v28  ;;  %v2275_v48 = vsel %vm1429_vm5, %v6555_v55, -inf  ;;  %v2263_v45 = vmax.f32 %v2261_v47, %v2262_v17  ;;  %v5358_v61 = vld [vmem:[#allocation7 + $0x284] ss:$16 sps:$4 sm:$0xff]   ;;  %v5359_v28 = vld [vmem:[#allocation7 + $0x288] ss:$16 sps:$4 sm:$0xff]  }
 0x387   :  { %4016 = vmatprep.mubr.bf16.mxu0 %v2380_v39  ;;  %4180 = vmatprep.mubr.bf16.mxu1 %v2380_v39  ;;  %v2319_v41 = vmax.f32 %v2317_v58, %v2318_v19  ;;  %v2282_v32 = vsel %vm1429_vm5, %v2184_v60, -inf  ;;  %v2276_v15 = vrot.slane %v2275_v48, 4  ;;  %v2338_v46 = vsel %vm1429_vm5, %v2216_v1, -inf  ;;  %v5364_v60 = vld [vmem:[#allocation7 + $0x2a4] ss:$16 sps:$4 sm:$0xff]  }
 0x388   :  { %3986 = vmatprep.subr.bf16.mxu0 %v5340_v57  ;;  %4150 = vmatprep.subr.bf16.mxu1 %v5343_v7  ;;  %v2272_v13 = vmax.f32 %v2270_v30, %v2271_v2  ;;  %v2327_v11 = vrot.slane %v2326_v40, 2  ;;  %v2283_v6 = vrot.slane %v2282_v32, 4  ;;  %v2264_v5 = vrot.slane %v2263_v45, 2  ;;  %v5356_v30 = vld [vmem:[#allocation7 + $0x280] ss:$16 sps:$4 sm:$0xff]  }
 0x389   :  { %v2320_v59 = vrot.slane %v2319_v41, 2  ;;  %v2339_v9 = vrot.slane %v2338_v46, 4  ;;  %v2277_v55 = vmax.f32 %v2275_v48, %v2276_v15  ;;  %v2331_v50 = vsel %vm1429_vm5, %v6559_v52, -inf  ;;  %v5362_v1 = vld [vmem:[#allocation7 + $0x2a0] ss:$16 sps:$4 sm:$0xff]  }
 0x38a   :  { %3987 = vmatpush1.bf16.msra.mxu0 %v5338_v12  ;;  %4151 = vmatpush1.bf16.msra.mxu1 %v5341_v14  ;;  %v2273_v43 = vrot.slane %v2272_v13, 1  ;;  %v2328_v4 = vmax.f32 %v2326_v40, %v2327_v11  ;;  %v2284_v8 = vmax.f32 %v2282_v32, %v2283_v6  ;;  %v2265_v51 = vmax.f32 %v2263_v45, %v2264_v5  ;;  %v5367_v12 = vld [vmem:[#allocation7 + $0x2ac] ss:$16 sps:$4 sm:$0xff]   ;;  %v5365_v48 = vld [vmem:[#allocation7 + $0x2a8] ss:$16 sps:$4 sm:$0xff]  }
 0x38b   :  { %3988 = vmatprep.subr.bf16.mxu0 %v5346_v38  ;;  %4152 = vmatprep.subr.bf16.mxu1 %v5349_v54  ;;  %v2321_v42 = vmax.f32 %v2319_v41, %v2320_v59  ;;  %v2340_v53 = vmax.f32 %v2338_v46, %v2339_v9  ;;  %v2278_v34 = vrot.slane %v2277_v55, 2  ;;  %v2332_v35 = vrot.slane %v2331_v50, 4  ;;  %v5370_v45 = vld [vmem:[#allocation7 + $0x2c4] ss:$16 sps:$4 sm:$0xff]   ;;  %v5373_v41 = vld [vmem:[#allocation7 + $0x2cc] ss:$16 sps:$4 sm:$0xff]  }
 0x38c   :  { %v2274_v0 = vmax.f32 %v2272_v13, %v2273_v43  ;;  %v2329_v44 = vrot.slane %v2328_v4, 1  ;;  %v2285_v36 = vrot.slane %v2284_v8, 2  ;;  %v2266_v27 = vrot.slane %v2265_v51, 1  ;;  %v5368_v15 = vld [vmem:[#allocation7 + $0x2c0] ss:$16 sps:$4 sm:$0xff]  }
 0x38d   :  { %v2322_v25 = vrot.slane %v2321_v42, 1  ;;  %v2341_v49 = vrot.slane %v2340_v53, 2  ;;  %v2279_v16 = vmax.f32 %v2277_v55, %v2278_v34  ;;  %v2333_v3 = vmax.f32 %v2331_v50, %v2332_v35  ;;  %v5371_v13 = vld [vmem:[#allocation7 + $0x2c8] ss:$16 sps:$4 sm:$0xff]   ;;  %v5376_v6 = vld [vmem:[#allocation7 + $0x2e4] ss:$16 sps:$4 sm:$0xff]  }
 0x38e   :  { %3989 = vmatpush1.bf16.msra.mxu0 %v5344_v26  ;;  %4153 = vmatpush1.bf16.msra.mxu1 %v5347_v62  ;;  %v2330_v52 = vmax.f32 %v2328_v4, %v2329_v44  ;;  %v2286_v63 = vmax.f32 %v2284_v8, %v2285_v36  ;;  %v2267_v24 = vmax.f32 %v2265_v51, %v2266_v27  ;;  %v5379_v46 = vld [vmem:[#allocation7 + $0x2ec] ss:$16 sps:$4 sm:$0xff]   ;;  %v5374_v5 = vld [vmem:[#allocation7 + $0x2e0] ss:$16 sps:$4 sm:$0xff]   ;;  %v5377_v59 = vld [vmem:[#allocation7 + $0x2e8] ss:$16 sps:$4 sm:$0xff]  }
 0x38f   :  { %3990 = vmatprep.subr.bf16.mxu0 %v5352_v29  ;;  %4154 = vmatprep.subr.bf16.mxu1 %v5355_v23  ;;  %v2323_v10 = vmax.f32 %v2321_v42, %v2322_v25  ;;  %v2342_v33 = vmax.f32 %v2340_v53, %v2341_v49  ;;  %v2280_v17 = vrot.slane %v2279_v16, 1  ;;  %v2334_v19 = vrot.slane %v2333_v3, 2  ;;  %v5382_v9 = vld [vmem:[#allocation7 + $0x304] ss:$16 sps:$4 sm:$0xff]   ;;  %v5385_v55 = vld [vmem:[#allocation7 + $0x30c] ss:$16 sps:$4 sm:$0xff]  }
 0x390   :  { %v6596_v47 = vsel %vm997_vm7, %v2330_v52, %v2274_v0  ;;  %v2287_v58 = vrot.slane %v2286_v63, 1  ;;  %v5380_v26 = vld [vmem:[#allocation7 + $0x300] ss:$16 sps:$4 sm:$0xff]   ;;  %v5383_v62 = vld [vmem:[#allocation7 + $0x308] ss:$16 sps:$4 sm:$0xff]  }
 0x391   :  { %v6599_v57 = vsel %vm997_vm7, %v2323_v10, %v2267_v24  ;;  %v2343_v7 = vrot.slane %v2342_v33, 1  ;;  %v2335_v2 = vmax.f32 %v2333_v3, %v2334_v19  ;;  %v2281_v38 = vmax.f32 %v2279_v16, %v2280_v17  ;;  %v5388_v43 = vld [vmem:[#allocation7 + $0x324] ss:$16 sps:$4 sm:$0xff]   ;;  %v5391_v4 = vld [vmem:[#allocation7 + $0x32c] ss:$16 sps:$4 sm:$0xff]  }
 0x392   :  { %3991 = vmatpush1.bf16.msra.mxu0 %v5350_v37  ;;  %4155 = vmatpush1.bf16.msra.mxu1 %v5353_v18  ;;  %v2288_v39 = vmax.f32 %v2286_v63, %v2287_v58  ;;  %v5386_v8 = vld [vmem:[#allocation7 + $0x320] ss:$16 sps:$4 sm:$0xff]   ;;  %v5389_v50 = vld [vmem:[#allocation7 + $0x328] ss:$16 sps:$4 sm:$0xff]   ;;  %v5394_v29 = vld [vmem:[#allocation7 + $0x344] ss:$16 sps:$4 sm:$0xff]   ;;  %v2382_v17 = vpack.c.bf16 %v6596_v47, %v6596_v47 }
 0x393   :  { %3992 = vmatprep.subr.bf16.mxu0 %v5358_v61  ;;  %4156 = vmatprep.subr.bf16.mxu1 %v5361_v56  ;;  %v2344_v14 = vmax.f32 %v2342_v33, %v2343_v7  ;;  %v2336_v54 = vrot.slane %v2335_v2, 1  ;;  %v5397_v23 = vld [vmem:[#allocation7 + $0x34c] ss:$16 sps:$4 sm:$0xff]   ;;  %v5392_v51 = vld [vmem:[#allocation7 + $0x340] ss:$16 sps:$4 sm:$0xff]  }
 0x394   :  { %v5395_v42 = vld [vmem:[#allocation7 + $0x348] ss:$16 sps:$4 sm:$0xff]   ;;  %v5400_v53 = vld [vmem:[#allocation7 + $0x364] ss:$16 sps:$4 sm:$0xff]   ;;  %v5403_v0 = vld [vmem:[#allocation7 + $0x36c] ss:$16 sps:$4 sm:$0xff]  }
 0x395   :  { %v6602_v40 = vsel %vm997_vm7, %v2344_v14, %v2288_v39  ;;  %v2337_v32 = vmax.f32 %v2335_v2, %v2336_v54  ;;  %v5398_v44 = vld [vmem:[#allocation7 + $0x360] ss:$16 sps:$4 sm:$0xff]   ;;  %v5401_v36 = vld [vmem:[#allocation7 + $0x368] ss:$16 sps:$4 sm:$0xff]   ;;  %v5406_v34 = vld [vmem:[#allocation7 + $0x384] ss:$16 sps:$4 sm:$0xff]  }
 0x396   :  { %3993 = vmatpush1.bf16.msra.mxu0 %v5356_v30  ;;  %4157 = vmatpush1.bf16.msra.mxu1 %v5359_v28  ;;  %v5409_v27 = vld [vmem:[#allocation7 + $0x38c] ss:$16 sps:$4 sm:$0xff]   ;;  %v5404_v25 = vld [vmem:[#allocation7 + $0x380] ss:$16 sps:$4 sm:$0xff]   ;;  %v5407_v49 = vld [vmem:[#allocation7 + $0x388] ss:$16 sps:$4 sm:$0xff]   ;;  %v2379_v28 = vpack.c.bf16 %v6577_v31, %v6577_v31 }
 0x397   :  { %3994 = vmatprep.subr.bf16.mxu0 %v5364_v60  ;;  %4158 = vmatprep.subr.bf16.mxu1 %v5367_v12  ;;  %v6605_v11 = vsel %vm997_vm7, %v2337_v32, %v2281_v38  ;;  %v5412_v35 = vld [vmem:[#allocation7 + $0x3a4] ss:$16 sps:$4 sm:$0xff]   ;;  %v5415_v37 = vld [vmem:[#allocation7 + $0x3ac] ss:$16 sps:$4 sm:$0xff]   ;;  %v5410_v18 = vld [vmem:[#allocation7 + $0x3a0] ss:$16 sps:$4 sm:$0xff]  }
 0x398   :  { %v5413_v52 = vld [vmem:[#allocation7 + $0x3a8] ss:$16 sps:$4 sm:$0xff]   ;;  %v5418_v63 = vld [vmem:[#allocation7 + $0x3c4] ss:$16 sps:$4 sm:$0xff]   ;;  %v5421_v16 = vld [vmem:[#allocation7 + $0x3cc] ss:$16 sps:$4 sm:$0xff]  }
 0x399   :  { %v5416_v61 = vld [vmem:[#allocation7 + $0x3c0] ss:$16 sps:$4 sm:$0xff]   ;;  %v5419_v56 = vld [vmem:[#allocation7 + $0x3c8] ss:$16 sps:$4 sm:$0xff]   ;;  %v5424_v24 = vld [vmem:[#allocation7 + $0x3e4] ss:$16 sps:$4 sm:$0xff]  }
 0x39a   :  { %3995 = vmatpush1.bf16.msra.mxu0 %v5362_v1  ;;  %4159 = vmatpush1.bf16.msra.mxu1 %v5365_v48  ;;  %v5427_v10 = vld [vmem:[#allocation7 + $0x3ec] ss:$16 sps:$4 sm:$0xff]   ;;  %v5422_v33 = vld [vmem:[#allocation7 + $0x3e0] ss:$16 sps:$4 sm:$0xff]   ;;  %v5425_v58 = vld [vmem:[#allocation7 + $0x3e8] ss:$16 sps:$4 sm:$0xff]  }
 0x39b   :  { %3996 = vmatprep.subr.bf16.mxu0 %v5370_v45  ;;  %4160 = vmatprep.subr.bf16.mxu1 %v5373_v41  ;;  %v5430_v3 = vld [vmem:[#allocation7 + $0x404] ss:$16 sps:$4 sm:$0xff]   ;;  %v5433_v7 = vld [vmem:[#allocation7 + $0x40c] ss:$16 sps:$4 sm:$0xff]   ;;  %v5428_v30 = vld [vmem:[#allocation7 + $0x400] ss:$16 sps:$4 sm:$0xff]  }
 0x39c   :  { %v5431_v39 = vld [vmem:[#allocation7 + $0x408] ss:$16 sps:$4 sm:$0xff]   ;;  %v5436_v19 = vld [vmem:[#allocation7 + $0x424] ss:$16 sps:$4 sm:$0xff]   ;;  %v5439_v60 = vld [vmem:[#allocation7 + $0x42c] ss:$16 sps:$4 sm:$0xff]  }
 0x39d   :  { %v5434_v12 = vld [vmem:[#allocation7 + $0x420] ss:$16 sps:$4 sm:$0xff]   ;;  %v5437_v14 = vld [vmem:[#allocation7 + $0x428] ss:$16 sps:$4 sm:$0xff]   ;;  %v5442_v2 = vld [vmem:[#allocation7 + $0x444] ss:$16 sps:$4 sm:$0xff]  }
 0x39e   :  { %3997 = vmatpush1.bf16.msra.mxu0 %v5368_v15  ;;  %4161 = vmatpush1.bf16.msra.mxu1 %v5371_v13  ;;  %v5445_v31 = vld [vmem:[#allocation7 + $0x44c] ss:$16 sps:$4 sm:$0xff]   ;;  %v5440_v1 = vld [vmem:[#allocation7 + $0x440] ss:$16 sps:$4 sm:$0xff]   ;;  %v5443_v48 = vld [vmem:[#allocation7 + $0x448] ss:$16 sps:$4 sm:$0xff]  }
 0x39f   :  { %3998 = vmatprep.subr.bf16.mxu0 %v5376_v6  ;;  %4162 = vmatprep.subr.bf16.mxu1 %v5379_v46  ;;  %v5448_v47 = vld [vmem:[#allocation7 + $0x464] ss:$16 sps:$4 sm:$0xff]   ;;  %v5451_v38 = vld [vmem:[#allocation7 + $0x46c] ss:$16 sps:$4 sm:$0xff]   ;;  %v5446_v54 = vld [vmem:[#allocation7 + $0x460] ss:$16 sps:$4 sm:$0xff]  }
 0x3a0   :  { %v5449_v45 = vld [vmem:[#allocation7 + $0x468] ss:$16 sps:$4 sm:$0xff]   ;;  %v5454_v41 = vld [vmem:[#allocation7 + $0x484] ss:$16 sps:$4 sm:$0xff]   ;;  %v5457_v32 = vld [vmem:[#allocation7 + $0x48c] ss:$16 sps:$4 sm:$0xff]  }
 0x3a1   :  { %v5452_v15 = vld [vmem:[#allocation7 + $0x480] ss:$16 sps:$4 sm:$0xff]   ;;  %v5455_v13 = vld [vmem:[#allocation7 + $0x488] ss:$16 sps:$4 sm:$0xff]   ;;  %v5460_v6 = vld [vmem:[#allocation7 + $0x4a4] ss:$16 sps:$4 sm:$0xff]  }
 0x3a2   :  { %3999 = vmatpush1.bf16.msra.mxu0 %v5374_v5  ;;  %4163 = vmatpush1.bf16.msra.mxu1 %v5377_v59  ;;  %v5463_v46 = vld [vmem:[#allocation7 + $0x4ac] ss:$16 sps:$4 sm:$0xff]   ;;  %v5458_v5 = vld [vmem:[#allocation7 + $0x4a0] ss:$16 sps:$4 sm:$0xff]   ;;  %v5461_v59 = vld [vmem:[#allocation7 + $0x4a8] ss:$16 sps:$4 sm:$0xff]  }
 0x3a3   :  { %4000 = vmatprep.subr.bf16.mxu0 %v5382_v9  ;;  %4164 = vmatprep.subr.bf16.mxu1 %v5385_v55  ;;  %v5466_v9 = vld [vmem:[#allocation7 + $0x4c4] ss:$16 sps:$4 sm:$0xff]   ;;  %v5469_v55 = vld [vmem:[#allocation7 + $0x4cc] ss:$16 sps:$4 sm:$0xff]  }
 0x3a6   :  { %4001 = vmatpush1.bf16.msra.mxu0 %v5380_v26  ;;  %4165 = vmatpush1.bf16.msra.mxu1 %v5383_v62  ;;  %v5464_v26 = vld [vmem:[#allocation7 + $0x4c0] ss:$16 sps:$4 sm:$0xff]   ;;  %v5467_v62 = vld [vmem:[#allocation7 + $0x4c8] ss:$16 sps:$4 sm:$0xff]  }
 0x3a7   :  { %4002 = vmatprep.subr.bf16.mxu0 %v5388_v43  ;;  %4166 = vmatprep.subr.bf16.mxu1 %v5391_v4  ;;  %v5472_v43 = vld [vmem:[#allocation7 + $0x4e4] ss:$16 sps:$4 sm:$0xff]   ;;  %v5475_v4 = vld [vmem:[#allocation7 + $0x4ec] ss:$16 sps:$4 sm:$0xff]  }
 0x3aa   :  { %4003 = vmatpush1.bf16.msra.mxu0 %v5386_v8  ;;  %4167 = vmatpush1.bf16.msra.mxu1 %v5389_v50  ;;  %v5470_v8 = vld [vmem:[#allocation7 + $0x4e0] ss:$16 sps:$4 sm:$0xff]   ;;  %v5473_v50 = vld [vmem:[#allocation7 + $0x4e8] ss:$16 sps:$4 sm:$0xff]  }
 0x3ab   :  { %4004 = vmatprep.subr.bf16.mxu0 %v5394_v29  ;;  %4168 = vmatprep.subr.bf16.mxu1 %v5397_v23  ;;  %v5478_v29 = vld [vmem:[#allocation7 + $0x504] ss:$16 sps:$4 sm:$0xff]   ;;  %v5481_v23 = vld [vmem:[#allocation7 + $0x50c] ss:$16 sps:$4 sm:$0xff]  }
 0x3ae   :  { %4005 = vmatpush1.bf16.msra.mxu0 %v5392_v51  ;;  %4169 = vmatpush1.bf16.msra.mxu1 %v5395_v42  ;;  %v5476_v51 = vld [vmem:[#allocation7 + $0x500] ss:$16 sps:$4 sm:$0xff]   ;;  %v5479_v42 = vld [vmem:[#allocation7 + $0x508] ss:$16 sps:$4 sm:$0xff]  }
 0x3af   :  { %4006 = vmatprep.subr.bf16.mxu0 %v5400_v53  ;;  %4170 = vmatprep.subr.bf16.mxu1 %v5403_v0  ;;  %v5484_v53 = vld [vmem:[#allocation7 + $0x524] ss:$16 sps:$4 sm:$0xff]   ;;  %v5487_v0 = vld [vmem:[#allocation7 + $0x52c] ss:$16 sps:$4 sm:$0xff]  }
 0x3b2   :  { %4007 = vmatpush1.bf16.msra.mxu0 %v5398_v44  ;;  %4171 = vmatpush1.bf16.msra.mxu1 %v5401_v36  ;;  %v5482_v44 = vld [vmem:[#allocation7 + $0x520] ss:$16 sps:$4 sm:$0xff]   ;;  %v5485_v36 = vld [vmem:[#allocation7 + $0x528] ss:$16 sps:$4 sm:$0xff]  }
 0x3b3   :  { %4008 = vmatprep.subr.bf16.mxu0 %v5406_v34  ;;  %4172 = vmatprep.subr.bf16.mxu1 %v5409_v27  ;;  %v5490_v34 = vld [vmem:[#allocation7 + $0x544] ss:$16 sps:$4 sm:$0xff]   ;;  %v5493_v27 = vld [vmem:[#allocation7 + $0x54c] ss:$16 sps:$4 sm:$0xff]  }
 0x3b6   :  { %4009 = vmatpush1.bf16.msra.mxu0 %v5404_v25  ;;  %4173 = vmatpush1.bf16.msra.mxu1 %v5407_v49  ;;  %v5488_v25 = vld [vmem:[#allocation7 + $0x540] ss:$16 sps:$4 sm:$0xff]   ;;  %v5491_v49 = vld [vmem:[#allocation7 + $0x548] ss:$16 sps:$4 sm:$0xff]  }
 0x3b7   :  { %4010 = vmatprep.subr.bf16.mxu0 %v5412_v35  ;;  %4174 = vmatprep.subr.bf16.mxu1 %v5415_v37  ;;  %v5496_v35 = vld [vmem:[#allocation7 + $0x564] ss:$16 sps:$4 sm:$0xff]   ;;  %v5499_v37 = vld [vmem:[#allocation7 + $0x56c] ss:$16 sps:$4 sm:$0xff]  }
 0x3ba   :  { %4011 = vmatpush1.bf16.msra.mxu0 %v5410_v18  ;;  %4175 = vmatpush1.bf16.msra.mxu1 %v5413_v52  ;;  %v5494_v18 = vld [vmem:[#allocation7 + $0x560] ss:$16 sps:$4 sm:$0xff]   ;;  %v5497_v52 = vld [vmem:[#allocation7 + $0x568] ss:$16 sps:$4 sm:$0xff]  }
 0x3bb   :  { %4012 = vmatprep.subr.bf16.mxu0 %v5418_v63  ;;  %4176 = vmatprep.subr.bf16.mxu1 %v5421_v16  ;;  %v5502_v63 = vld [vmem:[#allocation7 + $0x584] ss:$16 sps:$4 sm:$0xff]   ;;  %v5505_v16 = vld [vmem:[#allocation7 + $0x58c] ss:$16 sps:$4 sm:$0xff]  }
 0x3be   :  { %4013 = vmatpush1.bf16.msra.mxu0 %v5416_v61  ;;  %4177 = vmatpush1.bf16.msra.mxu1 %v5419_v56  ;;  %v5500_v61 = vld [vmem:[#allocation7 + $0x580] ss:$16 sps:$4 sm:$0xff]   ;;  %v5503_v56 = vld [vmem:[#allocation7 + $0x588] ss:$16 sps:$4 sm:$0xff]  }
 0x3bf   :  { %4014 = vmatprep.subr.bf16.mxu0 %v5424_v24  ;;  %4178 = vmatprep.subr.bf16.mxu1 %v5427_v10  ;;  %v5508_v24 = vld [vmem:[#allocation7 + $0x5a4] ss:$16 sps:$4 sm:$0xff]   ;;  %v5511_v10 = vld [vmem:[#allocation7 + $0x5ac] ss:$16 sps:$4 sm:$0xff]  }
 0x3c2   :  { %4015 = vmatpush1.bf16.msra.mxu0 %v5422_v33  ;;  %4179 = vmatpush1.bf16.msra.mxu1 %v5425_v58  ;;  %v5506_v33 = vld [vmem:[#allocation7 + $0x5a0] ss:$16 sps:$4 sm:$0xff]   ;;  %v5509_v58 = vld [vmem:[#allocation7 + $0x5a8] ss:$16 sps:$4 sm:$0xff]  }
 0x3c3   :  { %4025 = vmatprep.subr.bf16.mxu0 %v5430_v3  ;;  %4189 = vmatprep.subr.bf16.mxu1 %v5433_v7  ;;  %v5514_v3 = vld [vmem:[#allocation7 + $0x5c4] ss:$16 sps:$4 sm:$0xff]   ;;  %v5517_v7 = vld [vmem:[#allocation7 + $0x5cc] ss:$16 sps:$4 sm:$0xff]  }
 0x3c5   :  { %4017 = vmatmul.mubr.bf16.vlgmr.msra.gmra.mrb[12].mxu0 %v2379_v28  ;;  %4181 = vmatmul.mubr.bf16.vlgmr.msra.gmra.mrb[12].mxu1 %v2379_v28  ;;  %v5515_v28 = vld [vmem:[#allocation7 + $0x5c8] ss:$16 sps:$4 sm:$0xff]  }
 0x3c6   :  { %4026 = vmatpush1.bf16.msra.mxu0 %v5428_v30  ;;  %4057 = vmatprep.mubr.bf16.mxu0 %v2382_v17  ;;  %v5512_v30 = vld [vmem:[#allocation7 + $0x5c0] ss:$16 sps:$4 sm:$0xff]  }
 0x3c7   :  { %4190 = vmatpush1.bf16.msra.mxu1 %v5431_v39  ;;  %4221 = vmatprep.mubr.bf16.mxu1 %v2382_v17  ;;  %v5520_v39 = vld [vmem:[#allocation7 + $0x5e4] ss:$16 sps:$4 sm:$0xff]   ;;  %v5523_v17 = vld [vmem:[#allocation7 + $0x5ec] ss:$16 sps:$4 sm:$0xff]  }
 0x3c8   :  { %4027 = vmatprep.subr.bf16.mxu0 %v5436_v19  ;;  %4191 = vmatprep.subr.bf16.mxu1 %v5439_v60  ;;  %v5518_v19 = vld [vmem:[#allocation7 + $0x5e0] ss:$16 sps:$4 sm:$0xff]   ;;  %v5521_v60 = vld [vmem:[#allocation7 + $0x5e8] ss:$16 sps:$4 sm:$0xff]  }
 0x3ca   :  { %4028 = vmatpush1.bf16.msra.mxu0 %v5434_v12  ;;  %v5526_v12 = vld [vmem:[#allocation7 + $0x604] ss:$16 sps:$4 sm:$0xff]  }
 0x3cb   :  { %4192 = vmatpush1.bf16.msra.mxu1 %v5437_v14  ;;  %4029 = vmatprep.subr.bf16.mxu0 %v5442_v2  ;;  %v5529_v14 = vld [vmem:[#allocation7 + $0x60c] ss:$16 sps:$4 sm:$0xff]   ;;  %v5524_v2 = vld [vmem:[#allocation7 + $0x600] ss:$16 sps:$4 sm:$0xff]  }
 0x3cc   :  { %4193 = vmatprep.subr.bf16.mxu1 %v5445_v31  ;;  %v2381_v31 = vpack.c.bf16 %v6599_v57, %v6599_v57  ;;  %v5536_v57 = vld [vmem:[#allocation7 + $0x640] ss:$16 sps:$4 sm:$0xff]  }
 0x3ce   :  { %4030 = vmatpush1.bf16.msra.mxu0 %v5440_v1  ;;  %v5527_v1 = vld [vmem:[#allocation7 + $0x608] ss:$16 sps:$4 sm:$0xff]  }
 0x3cf   :  { %4194 = vmatpush1.bf16.msra.mxu1 %v5443_v48  ;;  %4031 = vmatprep.subr.bf16.mxu0 %v5448_v47  ;;  %v5532_v48 = vld [vmem:[#allocation7 + $0x624] ss:$16 sps:$4 sm:$0xff]   ;;  %v2384_v47 = vpack.c.bf16 %v6602_v40, %v6602_v40  ;;  %v5547_v40 = vld [vmem:[#allocation7 + $0x66c] ss:$16 sps:$4 sm:$0xff]  }
 0x3d0   :  { %4195 = vmatprep.subr.bf16.mxu1 %v5451_v38  ;;  %v5535_v38 = vld [vmem:[#allocation7 + $0x62c] ss:$16 sps:$4 sm:$0xff]  }
 0x3d2   :  { %4032 = vmatpush1.bf16.msra.mxu0 %v5446_v54  ;;  %v5530_v54 = vld [vmem:[#allocation7 + $0x620] ss:$16 sps:$4 sm:$0xff]  }
 0x3d3   :  { %4196 = vmatpush1.bf16.msra.mxu1 %v5449_v45  ;;  %4033 = vmatprep.subr.bf16.mxu0 %v5454_v41  ;;  %v5533_v45 = vld [vmem:[#allocation7 + $0x628] ss:$16 sps:$4 sm:$0xff]   ;;  %v5538_v41 = vld [vmem:[#allocation7 + $0x644] ss:$16 sps:$4 sm:$0xff]  }
 0x3d4   :  { %4197 = vmatprep.subr.bf16.mxu1 %v5457_v32  ;;  %v5541_v32 = vld [vmem:[#allocation7 + $0x64c] ss:$16 sps:$4 sm:$0xff]  }
 0x3d6   :  { %4034 = vmatpush1.bf16.msra.mxu0 %v5452_v15  ;;  %v5539_v15 = vld [vmem:[#allocation7 + $0x648] ss:$16 sps:$4 sm:$0xff]  }
 0x3d7   :  { %4198 = vmatpush1.bf16.msra.mxu1 %v5455_v13  ;;  %4035 = vmatprep.subr.bf16.mxu0 %v5460_v6  ;;  %v5544_v13 = vld [vmem:[#allocation7 + $0x664] ss:$16 sps:$4 sm:$0xff]   ;;  %v5542_v6 = vld [vmem:[#allocation7 + $0x660] ss:$16 sps:$4 sm:$0xff]  }
 0x3d8   :  { %4199 = vmatprep.subr.bf16.mxu1 %v5463_v46  ;;  %v5545_v46 = vld [vmem:[#allocation7 + $0x668] ss:$16 sps:$4 sm:$0xff]  }
 0x3da   :  { %4036 = vmatpush1.bf16.msra.mxu0 %v5458_v5  ;;  %v5550_v5 = vld [vmem:[#allocation7 + $0x684] ss:$16 sps:$4 sm:$0xff]  }
 0x3db   :  { %4200 = vmatpush1.bf16.msra.mxu1 %v5461_v59  ;;  %4037 = vmatprep.subr.bf16.mxu0 %v5466_v9  ;;  %v5553_v59 = vld [vmem:[#allocation7 + $0x68c] ss:$16 sps:$4 sm:$0xff]   ;;  %v5548_v9 = vld [vmem:[#allocation7 + $0x680] ss:$16 sps:$4 sm:$0xff]  }
 0x3dc   :  { %4201 = vmatprep.subr.bf16.mxu1 %v5469_v55  ;;  %v5551_v55 = vld [vmem:[#allocation7 + $0x688] ss:$16 sps:$4 sm:$0xff]  }
 0x3de   :  { %4038 = vmatpush1.bf16.msra.mxu0 %v5464_v26  ;;  %v5556_v26 = vld [vmem:[#allocation7 + $0x6a4] ss:$16 sps:$4 sm:$0xff]  }
 0x3df   :  { %4202 = vmatpush1.bf16.msra.mxu1 %v5467_v62  ;;  %4039 = vmatprep.subr.bf16.mxu0 %v5472_v43  ;;  %v5559_v62 = vld [vmem:[#allocation7 + $0x6ac] ss:$16 sps:$4 sm:$0xff]   ;;  %v5554_v43 = vld [vmem:[#allocation7 + $0x6a0] ss:$16 sps:$4 sm:$0xff]  }
 0x3e0   :  { %4203 = vmatprep.subr.bf16.mxu1 %v5475_v4  ;;  %v5557_v4 = vld [vmem:[#allocation7 + $0x6a8] ss:$16 sps:$4 sm:$0xff]  }
 0x3e2   :  { %4040 = vmatpush1.bf16.msra.mxu0 %v5470_v8  ;;  %v5562_v8 = vld [vmem:[#allocation7 + $0x6c4] ss:$16 sps:$4 sm:$0xff]  }
 0x3e3   :  { %4204 = vmatpush1.bf16.msra.mxu1 %v5473_v50  ;;  %4041 = vmatprep.subr.bf16.mxu0 %v5478_v29  ;;  %v5565_v50 = vld [vmem:[#allocation7 + $0x6cc] ss:$16 sps:$4 sm:$0xff]   ;;  %v5560_v29 = vld [vmem:[#allocation7 + $0x6c0] ss:$16 sps:$4 sm:$0xff]  }
 0x3e4   :  { %4205 = vmatprep.subr.bf16.mxu1 %v5481_v23  ;;  %v5563_v23 = vld [vmem:[#allocation7 + $0x6c8] ss:$16 sps:$4 sm:$0xff]  }
 0x3e6   :  { %4042 = vmatpush1.bf16.msra.mxu0 %v5476_v51  ;;  %v5568_v51 = vld [vmem:[#allocation7 + $0x6e4] ss:$16 sps:$4 sm:$0xff]  }
 0x3e7   :  { %4206 = vmatpush1.bf16.msra.mxu1 %v5479_v42  ;;  %4043 = vmatprep.subr.bf16.mxu0 %v5484_v53  ;;  %v5571_v42 = vld [vmem:[#allocation7 + $0x6ec] ss:$16 sps:$4 sm:$0xff]   ;;  %v5566_v53 = vld [vmem:[#allocation7 + $0x6e0] ss:$16 sps:$4 sm:$0xff]  }
 0x3e8   :  { %4207 = vmatprep.subr.bf16.mxu1 %v5487_v0  ;;  %v5569_v0 = vld [vmem:[#allocation7 + $0x6e8] ss:$16 sps:$4 sm:$0xff]  }
 0x3ea   :  { %4044 = vmatpush1.bf16.msra.mxu0 %v5482_v44  ;;  %v5574_v44 = vld [vmem:[#allocation7 + $0x704] ss:$16 sps:$4 sm:$0xff]  }
 0x3eb   :  { %4208 = vmatpush1.bf16.msra.mxu1 %v5485_v36  ;;  %4045 = vmatprep.subr.bf16.mxu0 %v5490_v34  ;;  %v5577_v36 = vld [vmem:[#allocation7 + $0x70c] ss:$16 sps:$4 sm:$0xff]   ;;  %v5572_v34 = vld [vmem:[#allocation7 + $0x700] ss:$16 sps:$4 sm:$0xff]  }
 0x3ec   :  { %4209 = vmatprep.subr.bf16.mxu1 %v5493_v27  ;;  %v5575_v27 = vld [vmem:[#allocation7 + $0x708] ss:$16 sps:$4 sm:$0xff]  }
 0x3ee   :  { %4046 = vmatpush1.bf16.msra.mxu0 %v5488_v25  ;;  %v5580_v25 = vld [vmem:[#allocation7 + $0x724] ss:$16 sps:$4 sm:$0xff]  }
 0x3ef   :  { %4210 = vmatpush1.bf16.msra.mxu1 %v5491_v49  ;;  %4047 = vmatprep.subr.bf16.mxu0 %v5496_v35  ;;  %v5583_v49 = vld [vmem:[#allocation7 + $0x72c] ss:$16 sps:$4 sm:$0xff]   ;;  %v5578_v35 = vld [vmem:[#allocation7 + $0x720] ss:$16 sps:$4 sm:$0xff]  }
 0x3f0   :  { %4211 = vmatprep.subr.bf16.mxu1 %v5499_v37  ;;  %v5581_v37 = vld [vmem:[#allocation7 + $0x728] ss:$16 sps:$4 sm:$0xff]  }
 0x3f2   :  { %4048 = vmatpush1.bf16.msra.mxu0 %v5494_v18  ;;  %v5586_v18 = vld [vmem:[#allocation7 + $0x744] ss:$16 sps:$4 sm:$0xff]  }
 0x3f3   :  { %4212 = vmatpush1.bf16.msra.mxu1 %v5497_v52  ;;  %4049 = vmatprep.subr.bf16.mxu0 %v5502_v63  ;;  %v5589_v52 = vld [vmem:[#allocation7 + $0x74c] ss:$16 sps:$4 sm:$0xff]   ;;  %v5584_v63 = vld [vmem:[#allocation7 + $0x740] ss:$16 sps:$4 sm:$0xff]  }
 0x3f4   :  { %4213 = vmatprep.subr.bf16.mxu1 %v5505_v16  ;;  %v5587_v16 = vld [vmem:[#allocation7 + $0x748] ss:$16 sps:$4 sm:$0xff]  }
 0x3f6   :  { %4050 = vmatpush1.bf16.msra.mxu0 %v5500_v61  ;;  %v5592_v61 = vld [vmem:[#allocation7 + $0x764] ss:$16 sps:$4 sm:$0xff]  }
 0x3f7   :  { %4214 = vmatpush1.bf16.msra.mxu1 %v5503_v56  ;;  %4051 = vmatprep.subr.bf16.mxu0 %v5508_v24  ;;  %v5595_v56 = vld [vmem:[#allocation7 + $0x76c] ss:$16 sps:$4 sm:$0xff]   ;;  %v5590_v24 = vld [vmem:[#allocation7 + $0x760] ss:$16 sps:$4 sm:$0xff]  }
 0x3f8   :  { %4215 = vmatprep.subr.bf16.mxu1 %v5511_v10  ;;  %v5593_v10 = vld [vmem:[#allocation7 + $0x768] ss:$16 sps:$4 sm:$0xff]  }
 0x3fa   :  { %4052 = vmatpush1.bf16.msra.mxu0 %v5506_v33  ;;  %v5598_v33 = vld [vmem:[#allocation7 + $0x784] ss:$16 sps:$4 sm:$0xff]  }
 0x3fb   :  { %4216 = vmatpush1.bf16.msra.mxu1 %v5509_v58  ;;  %4053 = vmatprep.subr.bf16.mxu0 %v5514_v3  ;;  %v5601_v58 = vld [vmem:[#allocation7 + $0x78c] ss:$16 sps:$4 sm:$0xff]   ;;  %v5596_v3 = vld [vmem:[#allocation7 + $0x780] ss:$16 sps:$4 sm:$0xff]  }
 0x3fc   :  { %4217 = vmatprep.subr.bf16.mxu1 %v5517_v7  ;;  %v5599_v7 = vld [vmem:[#allocation7 + $0x788] ss:$16 sps:$4 sm:$0xff]  }
 0x3fe   :  { %4054 = vmatpush1.bf16.msra.mxu0 %v5512_v30  ;;  %v5604_v30 = vld [vmem:[#allocation7 + $0x7a4] ss:$16 sps:$4 sm:$0xff]  }
 0x3ff   :  { %4218 = vmatpush1.bf16.msra.mxu1 %v5515_v28  ;;  %4055 = vmatprep.subr.bf16.mxu0 %v5520_v39  ;;  %v5607_v28 = vld [vmem:[#allocation7 + $0x7ac] ss:$16 sps:$4 sm:$0xff]   ;;  %v5602_v39 = vld [vmem:[#allocation7 + $0x7a0] ss:$16 sps:$4 sm:$0xff]  }
 0x400   :  { %4219 = vmatprep.subr.bf16.mxu1 %v5523_v17  ;;  %v5605_v17 = vld [vmem:[#allocation7 + $0x7a8] ss:$16 sps:$4 sm:$0xff]  }
 0x402   :  { %4056 = vmatpush1.bf16.msra.mxu0 %v5518_v19  ;;  %v5610_v19 = vld [vmem:[#allocation7 + $0x7c4] ss:$16 sps:$4 sm:$0xff]  }
 0x403   :  { %4220 = vmatpush1.bf16.msra.mxu1 %v5521_v60  ;;  %4066 = vmatprep.subr.bf16.mxu0 %v5526_v12  ;;  %v5613_v60 = vld [vmem:[#allocation7 + $0x7cc] ss:$16 sps:$4 sm:$0xff]   ;;  %v5608_v12 = vld [vmem:[#allocation7 + $0x7c0] ss:$16 sps:$4 sm:$0xff]  }
 0x404   :  { %4230 = vmatprep.subr.bf16.mxu1 %v5529_v14  ;;  %v5611_v14 = vld [vmem:[#allocation7 + $0x7c8] ss:$16 sps:$4 sm:$0xff]  }
 0x405   :  { %4058 = vmatmul.mubr.bf16.vlgmr.msra.gmra.mrb[12].mxu0 %v2381_v31 }
 0x406   :  { %4222 = vmatmul.mubr.bf16.vlgmr.msra.gmra.mrb[12].mxu1 %v2381_v31  ;;  %4067 = vmatpush1.bf16.msra.mxu0 %v5524_v2  ;;  %v5616_v2 = vld [vmem:[#allocation7 + $0x7e4] ss:$16 sps:$4 sm:$0xff]   ;;  %v5619_v31 = vld [vmem:[#allocation7 + $0x7ec] ss:$16 sps:$4 sm:$0xff]  }
 0x407   :  { %4098 = vmatprep.mubr.bf16.mxu0 %v2384_v47  ;;  %4231 = vmatpush1.bf16.msra.mxu1 %v5527_v1  ;;  %v5614_v1 = vld [vmem:[#allocation7 + $0x7e0] ss:$16 sps:$4 sm:$0xff]  }
 0x408   :  { %4262 = vmatprep.mubr.bf16.mxu1 %v2384_v47  ;;  %4068 = vmatprep.subr.bf16.mxu0 %v5532_v48  ;;  %v5617_v48 = vld [vmem:[#allocation7 + $0x7e8] ss:$16 sps:$4 sm:$0xff]   ;;  %v5620_v47 = vld [vmem:[#allocation8 + $0x40] sm:$0xff]  }
 0x409   :  { %4232 = vmatprep.subr.bf16.mxu1 %v5535_v38  ;;  %v5621_v38 = vld [vmem:[#allocation8 + $0xc0] sm:$0xff]  }
 0x40a   :  { %4069 = vmatpush1.bf16.msra.mxu0 %v5530_v54  ;;  %v5622_v54 = vld [vmem:[#allocation8] sm:$0xff]  }
 0x40b   :  { %4233 = vmatpush1.bf16.msra.mxu1 %v5533_v45  ;;  %4070 = vmatprep.subr.bf16.mxu0 %v5538_v41  ;;  %v2383_v45 = vpack.c.bf16 %v6605_v11, %v6605_v11  ;;  %v5623_v41 = vld [vmem:[#allocation8 + $0x80] sm:$0xff]   ;;  %v5631_v11 = vld [vmem:[#allocation8 + $0x90] sm:$0xff]  }
 0x40c   :  { %4234 = vmatprep.subr.bf16.mxu1 %v5541_v32  ;;  %v5624_v32 = vld [vmem:[#allocation8 + $0x48] sm:$0xff]  }
 0x40e   :  { %4071 = vmatpush1.bf16.msra.mxu0 %v5536_v57  ;;  %v5625_v57 = vld [vmem:[#allocation8 + $0xc8] sm:$0xff]  }
 0x40f   :  { %4235 = vmatpush1.bf16.msra.mxu1 %v5539_v15  ;;  %4072 = vmatprep.subr.bf16.mxu0 %v5544_v13  ;;  %v5626_v15 = vld [vmem:[#allocation8 + $0x8] sm:$0xff]  }
 0x410   :  { %4236 = vmatprep.subr.bf16.mxu1 %v5547_v40  ;;  %v5627_v13 = vld [vmem:[#allocation8 + $0x88] sm:$0xff]   ;;  %v5628_v40 = vld [vmem:[#allocation8 + $0x50] sm:$0xff]  }
 0x412   :  { %4073 = vmatpush1.bf16.msra.mxu0 %v5542_v6  ;;  %v5629_v6 = vld [vmem:[#allocation8 + $0xd0] sm:$0xff]  }
 0x413   :  { %4237 = vmatpush1.bf16.msra.mxu1 %v5545_v46  ;;  %4074 = vmatprep.subr.bf16.mxu0 %v5550_v5  ;;  %v5630_v46 = vld [vmem:[#allocation8 + $0x10] sm:$0xff]   ;;  %v5632_v5 = vld [vmem:[#allocation8 + $0x58] sm:$0xff]  }
 0x414   :  { %4238 = vmatprep.subr.bf16.mxu1 %v5553_v59  ;;  %v5633_v59 = vld [vmem:[#allocation8 + $0xd8] sm:$0xff]  }
 0x416   :  { %4075 = vmatpush1.bf16.msra.mxu0 %v5548_v9  ;;  %v5634_v9 = vld [vmem:[#allocation8 + $0x18] sm:$0xff]  }
 0x417   :  { %4239 = vmatpush1.bf16.msra.mxu1 %v5551_v55  ;;  %4076 = vmatprep.subr.bf16.mxu0 %v5556_v26  ;;  %v5635_v55 = vld [vmem:[#allocation8 + $0x98] sm:$0xff]   ;;  %v5636_v26 = vld [vmem:[#allocation8 + $0x60] sm:$0xff]  }
 0x418   :  { %4240 = vmatprep.subr.bf16.mxu1 %v5559_v62  ;;  %v5637_v62 = vld [vmem:[#allocation8 + $0xe0] sm:$0xff]  }
 0x41a   :  { %4077 = vmatpush1.bf16.msra.mxu0 %v5554_v43  ;;  %v5638_v43 = vld [vmem:[#allocation8 + $0x20] sm:$0xff]  }
 0x41b   :  { %4241 = vmatpush1.bf16.msra.mxu1 %v5557_v4  ;;  %4078 = vmatprep.subr.bf16.mxu0 %v5562_v8  ;;  %v5639_v4 = vld [vmem:[#allocation8 + $0xa0] sm:$0xff]   ;;  %v5640_v8 = vld [vmem:[#allocation8 + $0x68] sm:$0xff]  }
 0x41c   :  { %4242 = vmatprep.subr.bf16.mxu1 %v5565_v50  ;;  %v5641_v50 = vld [vmem:[#allocation8 + $0xe8] sm:$0xff]  }
 0x41e   :  { %4079 = vmatpush1.bf16.msra.mxu0 %v5560_v29  ;;  %v5642_v29 = vld [vmem:[#allocation8 + $0x28] sm:$0xff]  }
 0x41f   :  { %4243 = vmatpush1.bf16.msra.mxu1 %v5563_v23  ;;  %4080 = vmatprep.subr.bf16.mxu0 %v5568_v51  ;;  %v5643_v23 = vld [vmem:[#allocation8 + $0xa8] sm:$0xff]   ;;  %v5644_v51 = vld [vmem:[#allocation8 + $0x70] sm:$0xff]  }
 0x420   :  { %4244 = vmatprep.subr.bf16.mxu1 %v5571_v42  ;;  %v5645_v42 = vld [vmem:[#allocation8 + $0xf0] sm:$0xff]  }
 0x422   :  { %4081 = vmatpush1.bf16.msra.mxu0 %v5566_v53  ;;  %v5646_v53 = vld [vmem:[#allocation8 + $0x30] sm:$0xff]  }
 0x423   :  { %4245 = vmatpush1.bf16.msra.mxu1 %v5569_v0  ;;  %4082 = vmatprep.subr.bf16.mxu0 %v5574_v44  ;;  %v5647_v0 = vld [vmem:[#allocation8 + $0xb0] sm:$0xff]   ;;  %v5648_v44 = vld [vmem:[#allocation8 + $0x78] sm:$0xff]  }
 0x424   :  { %4246 = vmatprep.subr.bf16.mxu1 %v5577_v36  ;;  %v5649_v36 = vld [vmem:[#allocation8 + $0xf8] sm:$0xff]  }
 0x426   :  { %4083 = vmatpush1.bf16.msra.mxu0 %v5572_v34  ;;  %v5650_v34 = vld [vmem:[#allocation8 + $0x38] sm:$0xff]  }
 0x427   :  { %4247 = vmatpush1.bf16.msra.mxu1 %v5575_v27  ;;  %4084 = vmatprep.subr.bf16.mxu0 %v5580_v25  ;;  %v5651_v27 = vld [vmem:[#allocation8 + $0xb8] sm:$0xff]  }
 0x428   :  { %4248 = vmatprep.subr.bf16.mxu1 %v5583_v49  ;;  %v2641_v25 = vld [vmem:[%s6643_s8] sm:$0xf]  ;;  %v2653_v49 = vsub.s32 2, %v5912_v20 }
 0x42a   :  { %4085 = vmatpush1.bf16.msra.mxu0 %v5578_v35  ;;  %v2657_v35 = vsub.s32 3, %v5912_v20 }
 0x42b   :  { %4249 = vmatpush1.bf16.msra.mxu1 %v5581_v37  ;;  %4086 = vmatprep.subr.bf16.mxu0 %v5586_v18  ;;  %v2646_v37 = vrot.slane %v2641_v25, %v5918_v22  ;;  %v2654_v18 = vrot.slane %v2641_v25, %v2653_v49 }
 0x42c   :  { %4250 = vmatprep.subr.bf16.mxu1 %v5589_v52  ;;  %v2650_v52 = vrot.slane %v2641_v25, %v2101_v21 }
 0x42e   :  { %4087 = vmatpush1.bf16.msra.mxu0 %v5584_v63  ;;  %v2658_v63 = vrot.slane %v2641_v25, %v2657_v35 }
 0x42f   :  { %4251 = vmatpush1.bf16.msra.mxu1 %v5587_v16  ;;  %4088 = vmatprep.subr.bf16.mxu0 %v5592_v61 }
 0x430   :  { %4252 = vmatprep.subr.bf16.mxu1 %v5595_v56 }
 0x432   :  { %4089 = vmatpush1.bf16.msra.mxu0 %v5590_v24 }
 0x433   :  { %4253 = vmatpush1.bf16.msra.mxu1 %v5593_v10  ;;  %4090 = vmatprep.subr.bf16.mxu0 %v5598_v33 }
 0x434   :  { %4254 = vmatprep.subr.bf16.mxu1 %v5601_v58 }
 0x436   :  { %4091 = vmatpush1.bf16.msra.mxu0 %v5596_v3 }
 0x437   :  { %4255 = vmatpush1.bf16.msra.mxu1 %v5599_v7  ;;  %4092 = vmatprep.subr.bf16.mxu0 %v5604_v30 }
 0x438   :  { %4256 = vmatprep.subr.bf16.mxu1 %v5607_v28 }
 0x43a   :  { %4093 = vmatpush1.bf16.msra.mxu0 %v5602_v39 }
 0x43b   :  { %4257 = vmatpush1.bf16.msra.mxu1 %v5605_v17  ;;  %4094 = vmatprep.subr.bf16.mxu0 %v5610_v19 }
 0x43c   :  { %4258 = vmatprep.subr.bf16.mxu1 %v5613_v60 }
 0x43e   :  { %4095 = vmatpush1.bf16.msra.mxu0 %v5608_v12 }
 0x43f   :  { %4259 = vmatpush1.bf16.msra.mxu1 %v5611_v14  ;;  %4096 = vmatprep.subr.bf16.mxu0 %v5616_v2 }
 0x440   :  { %4260 = vmatprep.subr.bf16.mxu1 %v5619_v31 }
 0x442   :  { %4097 = vmatpush1.bf16.msra.mxu0 %v5614_v1  ;;  %v4977_v1 = vld [vmem:[%s6645_s10] ss:$0 sm:$0xff] }
 0x443   :  { %4261 = vmatpush1.bf16.msra.mxu1 %v5617_v48  ;;  %5030 = vmatprep.subr.bf16.mxu0 %v5620_v47 }
 0x444   :  { %5052 = vmatprep.subr.bf16.mxu1 %v5621_v38 }
 0x445   :  { %4099 = vmatmul.mubr.bf16.vlgmr.msra.gmra.mrb[12].mxu0 %v2383_v45 }
 0x446   :  { %4263 = vmatmul.mubr.bf16.vlgmr.msra.gmra.mrb[12].mxu1 %v2383_v45  ;;  %5031 = vmatpush3.bf16.msra.mxu0 %v5622_v54 }
 0x447   :  { %5053 = vmatpush3.bf16.msra.mxu1 %v5623_v41  ;;  %5032 = vmatprep.subr.bf16.mxu0 %v5624_v32 }
 0x448   :  { %5054 = vmatprep.subr.bf16.mxu1 %v5625_v57 }
 0x44a   :  { %5033 = vmatpush3.bf16.msra.mxu0 %v5626_v15 }
 0x44b   :  { %5055 = vmatpush3.bf16.msra.mxu1 %v5627_v13  ;;  %5034 = vmatprep.subr.bf16.mxu0 %v5628_v40  ;;  %v5010_v40 = vld [vmem:[%s6646_s11] ss:$0 sm:$0xff] }
 0x44c   :  { %5056 = vmatprep.subr.bf16.mxu1 %v5629_v6 }
 0x44e   :  { %5035 = vmatpush3.bf16.msra.mxu0 %v5630_v46 }
 0x44f   :  { %5057 = vmatpush3.bf16.msra.mxu1 %v5631_v11  ;;  %5036 = vmatprep.subr.bf16.mxu0 %v5632_v5  ;;  %v5011_v5 = vld [vmem:[#allocation2] ss:$0 sm:$0xff] }
 0x450   :  { %5058 = vmatprep.subr.bf16.mxu1 %v5633_v59 }
 0x452   :  { %5037 = vmatpush3.bf16.msra.mxu0 %v5634_v9 }
 0x453   :  { %5059 = vmatpush3.bf16.msra.mxu1 %v5635_v55  ;;  %5038 = vmatprep.subr.bf16.mxu0 %v5636_v26 }
 0x454   :  { %5060 = vmatprep.subr.bf16.mxu1 %v5637_v62 }
 0x456   :  { %5039 = vmatpush3.bf16.msra.mxu0 %v5638_v43 }
 0x457   :  { %5061 = vmatpush3.bf16.msra.mxu1 %v5639_v4  ;;  %5040 = vmatprep.subr.bf16.mxu0 %v5640_v8 }
 0x458   :  { %5062 = vmatprep.subr.bf16.mxu1 %v5641_v50 }
 0x45a   :  { %5041 = vmatpush3.bf16.msra.mxu0 %v5642_v29 }
 0x45b   :  { %5063 = vmatpush3.bf16.msra.mxu1 %v5643_v23  ;;  %5042 = vmatprep.subr.bf16.mxu0 %v5644_v51 }
 0x45c   :  { %5064 = vmatprep.subr.bf16.mxu1 %v5645_v42 }
 0x45e   :  { %5043 = vmatpush3.bf16.msra.mxu0 %v5646_v53 }
 0x45f   :  { %5065 = vmatpush3.bf16.msra.mxu1 %v5647_v0  ;;  %5044 = vmatprep.subr.bf16.mxu0 %v5648_v44 }
 0x460   :  { %5066 = vmatprep.subr.bf16.mxu1 %v5649_v36 }
 0x462   :  { %5045 = vmatpush3.bf16.msra.mxu0 %v5650_v34 }
 0x463   :  { %5067 = vmatpush3.bf16.msra.mxu1 %v5651_v27 }
 0x518   :  { %v4100_v16 = vpop.f32.mrb[12].mxu0 }
 0x519   :  { %v5110_v61 = vadd.f32 %v4100_v16, %v2646_v37  ;;  %v4264_v56 = vpop.f32.mrb[12].mxu1  ;;  %v4102_v24 = vpop.f32.mrb[13].mxu0 }
 0x51a   :  { %v5112_v10 = vadd.f32 %v4264_v56, %v2654_v18  ;;  %v5111_v33 = vadd.f32 %v4102_v24, %v2650_v52  ;;  %v4266_v58 = vpop.f32.mrb[13].mxu1  ;;  %v4104_v3 = vpop.f32.mrb[14].mxu0 }
 0x51b   :  { %v4271_v7 = vmax.f32 %v5110_v61, 0.0  ;;  %v5113_v30 = vadd.f32 %v4266_v58, %v2658_v63  ;;  %v4268_v28 = vpop.f32.mrb[14].mxu1  ;;  %v4105_v39 = vpop.f32.mrb[15].mxu0 }
 0x51c   :  { %v4273_v17 = vmax.f32 %v5112_v10, 0.0  ;;  %v4272_v19 = vmax.f32 %v5111_v33, 0.0  ;;  %v4269_v22 = vpop.f32.mrb[15].mxu1 }
 0x51d   :  { %v4274_v60 = vmax.f32 %v5113_v30, 0.0  ;;  %v4275_v20 = vpack.c.bf16 %v4271_v7, %v4271_v7 }
 0x51e   :  { %v4276_v12 = vpack.c.bf16 %v4272_v19, %v4272_v19  ;;  %v4277_v14 = vpack.c.bf16 %v4273_v17, %v4273_v17 }
 0x51f   :  { %v4278_v21 = vpack.c.bf16 %v4274_v60, %v4274_v60 }
 0x520   :  { %4574 = vmatprep.mubr.bf16.mxu0 %v4276_v12 }
 0x521   :  { %4614 = vmatprep.mubr.bf16.mxu1 %v4278_v21  ;;  %4575 = vmatmul.mubr.bf16.vlgmr.msra.gmra.mrb[16].mxu0 %v4275_v20 }
 0x522   :  { %4615 = vmatmul.mubr.bf16.vlgmr.msra.gmra.mrb[16].mxu1 %v4277_v14 }
 0x5f4   :  { %v5046_v2 = vpop.f32.mrb[16].mxu0 }
 0x5f5   :  { %v5068_v31 = vpop.f32.mrb[16].mxu1  ;;  %v5047_v48 = vpop.f32.mrb[17].mxu0 }
 0x5f6   :  { %v5048_v47 = vadd.f32 %v5047_v48, %v5046_v2  ;;  %v5069_v38 = vpop.f32.mrb[17].mxu1  ;;  %v5049_v54 = vpop.f32.mrb[18].mxu0 }
 0x5f7   :  { %v5070_v45 = vadd.f32 %v5069_v38, %v5068_v31  ;;  %v5071_v41 = vpop.f32.mrb[18].mxu1  ;;  %v5050_v32 = vpop.f32.mrb[19].mxu0 }
 0x5f8   :  { %v4577_v57 = vadd.f32 %v5048_v47, %v4977_v1  ;;  %v5072_v15 = vpop.f32.mrb[19].mxu1 }
 0x5fa   :  { %v4617_v13 = vadd.f32 %v5070_v45, %v4577_v57 }
 0x5fc   :  { %v4622_v6 = vmax.f32 %v4617_v13, 0.0 }
 0x5fe   :  { %v4630_v46 = vmul.f32 %v5010_v40, %v4622_v6 }
 0x600   :  { %v4631_v11 = vsel %vm1429_vm5, %v4630_v46, 0.0 }
 0x601   :  { %4632 = vadd.xlane.f32.xlu0 %v4631_v11 }
 0x68e   :  { %v4633_v59 = vpop.xlane.xlu0 %4632 }
 0x68f   :  { %v4641_v9 = vadd.f32 %v5011_v5, %v4633_v59 }
 0x691   :  { %4643 = vst.msk [vmem:[%s6648_s13] sm:$0x3] %vm4642_vm1, %v4641_v9 }
 0x692   :  { %4648 = vsyncpa [#allocation4], 1 }
 0x693   :  { %4649 = vsyncpa [#allocation6], 1 }
 0x694   :  { %4650 = vsyncpa [#allocation9], 1 }

</bundles_post_ra>
